<compile_context>
chip_gen: v5e
topology: v5e:2x2
jax: 0.10.0
libtpu: 0.0.40
codegen_flags: <defaults>
</compile_context>

<pallas_src>
import functools

import jax
import jax.numpy as jnp
from jax.experimental import pallas as pl
from jax.experimental.pallas import tpu as pltpu

PREC = jax.lax.Precision.HIGHEST     # reference only; kernel uses bf16 MXU path


def _leaky(x, slope):
    return jnp.where(x >= 0, x, slope * x)


def _round_up(x, m):
    return (x + m - 1) // m * m


# ----------------------------------------------------------------------------
# Pallas kernel: full FeatureAggregation chain for one tile of points.
# ----------------------------------------------------------------------------
def feature_agg_kernel(se_ref, f_ref,
                       w_m1, b_m1,
                       w_l1, c_l1, wa1_hh, wa1_xh, wc1_h, wc1_x, c_c1,
                       w_l2, c_l2, wa2_hh, wa2_xh, wc2_h, wc2_x, c_c2,
                       w_m2, b_m2, w_sc, c_sc,
                       o_ref, *, use_bf16_exp):
    exp_dt = jnp.bfloat16 if use_bf16_exp else jnp.float32

    f = f_ref[...]                        # (TN, Cin)     bf16
    se2d = se_ref[...]                    # (TN*K, 7)     bf16  [ctr, nbr, dist]
    TN = f.shape[0]
    K = se2d.shape[0] // TN

    # mlp1: 1x1 conv + LeakyReLU(0.2)
    x = jnp.dot(f, w_m1[...], preferred_element_type=jnp.float32) + b_m1[...]
    x = _leaky(x, 0.2).astype(jnp.bfloat16)             # (TN, D1) bf16 operand

    def softmax_k(sc):                    # softmax over the K (neighbor) axis
        s = sc - jnp.max(sc, axis=1, keepdims=True)
        # exp runs in bf16 on v6e/v7x (2x EUP throughput); reductions,
        # normalization and pooling accumulate in f32.
        e = jnp.exp(s.astype(exp_dt)).astype(jnp.float32)
        return e * pl.reciprocal(jnp.sum(e, axis=1, keepdims=True), approx=True)

    def stage(w_l, c_l, wa_hh, wa_xh, wc_h, wc_x, c_c, xin):
        # LocSE shared-MLP on the 7-channel encoding (diff rows folded into
        # w_l, conv bias + BN folded into c_l) + ReLU: one (TN*K, 7) @ (7, D1)
        # bf16 MXU matmul.  Reshape to (TN, K, D1) is layout-free when K is a
        # multiple of 8 (perf-only assumption, not correctness).
        h2d = jnp.maximum(
            jnp.dot(se2d, w_l[...], preferred_element_type=jnp.float32) + c_l[...],
            0.0)                                            # (TN*K, D1) f32
        D1 = h2d.shape[-1]

        # AttentionPooling — h-half only.  fe = concat(h, broadcast(x)) is
        # never materialized: softmax over K is channel-independent, so the
        # x-half pooling is the exact identity pooled_x == xin and its whole
        # score branch (sc_x / score_x / pooled_x) is deleted.
        sc = (jnp.dot(h2d.astype(jnp.bfloat16), wa_hh[...],
                      preferred_element_type=jnp.float32).reshape(TN, K, D1)
              + jnp.dot(xin, wa_xh[...],
                        preferred_element_type=jnp.float32)[:, None, :])
        score = softmax_k(sc)                               # (TN, K, D1) f32
        pooled = jnp.sum(score * h2d.reshape(TN, K, D1), axis=1)   # (TN, D1)

        # Post-pooling shared-MLP (conv bias + BN folded) + ReLU.
        y = (jnp.dot(pooled.astype(jnp.bfloat16), wc_h[...],
                     preferred_element_type=jnp.float32)
             + jnp.dot(xin, wc_x[...], preferred_element_type=jnp.float32)
             + c_c[...])
        return jnp.maximum(y, 0.0).astype(jnp.bfloat16)

    x = stage(w_l1, c_l1, wa1_hh, wa1_xh, wc1_h, wc1_x, c_c1, x)
    x = stage(w_l2, c_l2, wa2_hh, wa2_xh, wc2_h, wc2_x, c_c2, x)

    # mlp2 (no BN/act) + shortcut (conv + folded BN), residual add, LeakyReLU(0.01)
    y = jnp.dot(x, w_m2[...], preferred_element_type=jnp.float32) + b_m2[...]
    sh = jnp.dot(f, w_sc[...], preferred_element_type=jnp.float32) + c_sc[...]
    o_ref[...] = _leaky(y + sh, 0.01).astype(o_ref.dtype)


# ----------------------------------------------------------------------------
# Glue: kNN + spatial encoding (the PyTorch module does the kNN on CPU).
# ----------------------------------------------------------------------------
def _knn(coords, k):
    d2 = jnp.sum((coords[:, :, None, :] - coords[:, None, :, :]) ** 2, axis=-1)
    neg_d2, idx = jax.lax.top_k(-d2, k)                       # (B, N, K)
    dist = jnp.sqrt(jnp.maximum(-neg_d2, 0.0))                # Euclidean dist
    return idx, dist


def _spatial_encoding7_flat(coords, k, p_pad):
    """7-channel spatial encoding [center, neighbor, dist], flattened to
    (p_pad * k, 7) bf16.  The diff channels of the reference 10-channel
    encoding are folded into the LocSE weights (see _prepare_kernel_params),
    so the dominant HBM stream is 30% smaller."""
    B, N, _ = coords.shape
    idx, dist = _knn(coords, k)
    neighbors = jax.vmap(lambda c, i: c[i])(coords, idx)      # (B, N, K, 3)
    center = jnp.broadcast_to(coords[:, :, None, :], neighbors.shape)
    se = jnp.concatenate([center, neighbors, dist[..., None]], axis=-1)
    se = se.astype(jnp.bfloat16).reshape(B * N, k, 7)
    if p_pad != B * N:
        se = jnp.pad(se, ((0, p_pad - B * N), (0, 0), (0, 0)))
    return se.reshape(p_pad * k, 7)


def _spatial_encoding10(coords, k):
    """Reference 10-channel encoding, channel order matching
    torch.concat((coords, neighbors, diff, dist), dim=-3)."""
    idx, dist = _knn(coords, k)
    neighbors = jax.vmap(lambda c, i: c[i])(coords, idx)
    center = jnp.broadcast_to(coords[:, :, None, :], neighbors.shape)
    return jnp.concatenate(
        [center, neighbors, center - neighbors, dist[..., None]], axis=-1)


# ----------------------------------------------------------------------------
# Generation-aware tuning.
# ----------------------------------------------------------------------------
def _tpu_tuning():
    """Return (tile_n, vmem_limit_bytes, split_for_two_cores, use_bf16_exp).

    v5e/v6e: 128 MiB VMEM -> deep tiles and a high scoped-VMEM limit.
    v7x:     64 MiB VMEM per TensorCore, 2 TensorCores -> smaller tiles, lower
             limit, and at least 2 grid tiles so both cores get work.
    bf16 VPU/EUP exists on v6e/v7x only (f32 exp path on v5e / unknown).
    """
    kind = ""
    try:
        kind = jax.devices()[0].device_kind.lower()
    except Exception:
        pass
    gen = 0
    for g in (7, 6, 5, 4, 3, 2):
        if f"v{g}" in kind:
            gen = g
            break
    if gen >= 7:
        return 512, 40 * 1024 * 1024, True, True
    if gen == 6:
        return 1024, 96 * 1024 * 1024, False, True
    if gen == 5:
        return 1024, 96 * 1024 * 1024, False, False
    return 512, 40 * 1024 * 1024, False, False   # unknown: conservative


# ----------------------------------------------------------------------------
# Weight preprocessing: fold conv bias + eval-mode BN into weights/shifts,
# fold the diff rows of the LocSE weight into the 7-channel encoding, split
# the attention weight along the (never-materialized) concat halves (the
# x-half output columns are dropped entirely — exact identity), cast all
# weight matrices to bf16 and pad output channels to a lane-dense 128x.
# ----------------------------------------------------------------------------
_KP_NAMES = ['w_m1', 'b_m1',
             'w_l1', 'c_l1', 'wa1_hh', 'wa1_xh', 'wc1_h', 'wc1_x', 'c_c1',
             'w_l2', 'c_l2', 'wa2_hh', 'wa2_xh', 'wc2_h', 'wc2_x', 'c_c2',
             'w_m2', 'b_m2', 'w_sc', 'c_sc']


def _prepare_kernel_params(p, D1, C2, C2p):
    wdt = jnp.bfloat16

    def fold7(w10):   # (10, D1) -> (7, D1): h = ctr@(Wc+Wd) + nbr@(Wn-Wd) + dist@Wr
        w_c, w_n, w_d, w_r = w10[0:3], w10[3:6], w10[6:9], w10[9:10]
        return jnp.concatenate([w_c + w_d, w_n - w_d, w_r], axis=0)

    q = {'w_m1': p['w_m1'].astype(wdt), 'b_m1': p['b_m1']}
    for i in (1, 2):
        q[f'w_l{i}'] = (fold7(p[f'w_l{i}']) * p[f's_l{i}']).astype(wdt)    # (7, D1)
        q[f'c_l{i}'] = p[f'b_l{i}'] * p[f's_l{i}'] + p[f't_l{i}']          # (1, D1)
        wa = p[f'w_a{i}']                                                  # (C, C)
        q[f'wa{i}_hh'] = wa[:D1, :D1].astype(wdt)
        q[f'wa{i}_xh'] = wa[D1:, :D1].astype(wdt)
        wc = p[f'w_c{i}'] * p[f's_c{i}']                                   # (C, Dout)
        q[f'wc{i}_h'] = wc[:D1].astype(wdt)
        q[f'wc{i}_x'] = wc[D1:].astype(wdt)
        q[f'c_c{i}'] = p[f'b_c{i}'] * p[f's_c{i}'] + p[f't_c{i}']
    pad = lambda a: jnp.pad(a, ((0, 0), (0, C2p - C2)))
    q['w_m2'] = pad(p['w_m2']).astype(wdt)
    q['b_m2'] = pad(p['b_m2'])
    q['w_sc'] = pad(p['w_s'] * p['s_s']).astype(wdt)
    q['c_sc'] = pad(p['b_s'] * p['s_s'] + p['t_s'])
    return q


# ----------------------------------------------------------------------------
# Wrapper.
# ----------------------------------------------------------------------------
def feature_aggregation(coords, features_nchw, params, k,
                        tile_n=None, vmem_limit_bytes=None):
    B, N, _ = coords.shape
    Cin = features_nchw.shape[1]
    C = params['w_m2'].shape[0]                # out_channels
    C2 = params['w_m2'].shape[1]               # 2 * out_channels
    D1 = C // 2
    C2p = _round_up(C2, 128)                   # lane-dense output channels

    auto_tile, auto_vmem, split_two, use_bf16_exp = _tpu_tuning()
    if tile_n is None:
        tile_n = auto_tile
    if vmem_limit_bytes is None:
        vmem_limit_bytes = auto_vmem

    # --- flatten (batch, point) into one axis; pick tile & padding ----------
    P = B * N
    TN = min(tile_n, _round_up(P, 8))                          # tile (mult of 8)
    if split_two and P > 8 and _round_up(P, TN) // TN < 2:
        TN = _round_up((P + 1) // 2, 8)        # give both v7x TensorCores work
    P_pad = _round_up(P, TN)

    # spatial encoding: built flattened / padded / bf16 inside its producer
    se_flat = _spatial_encoding7_flat(coords, k, P_pad)        # (P_pad*k, 7) bf16
    feats = jnp.transpose(features_nchw[..., 0], (0, 2, 1)).reshape(P, Cin)
    feats = jnp.pad(feats, ((0, P_pad - P), (0, 0))).astype(jnp.bfloat16)

    kp = _prepare_kernel_params(params, D1, C2, C2p)
    weights = [kp[n] for n in _KP_NAMES]

    # TODO(synk): pipeline_mode=pl.Buffered(1) on these resident-weight specs
    # would drop their double buffers (only matters at production widths).
    def const_spec(shape):
        nd = len(shape)
        return pl.BlockSpec(shape, lambda i, _nd=nd: (0,) * _nd)

    grid = (P_pad // TN,)
    kernel = functools.partial(feature_agg_kernel, use_bf16_exp=use_bf16_exp)
    out = pl.pallas_call(
        kernel,
        out_shape=jax.ShapeDtypeStruct((P_pad, C2p), jnp.bfloat16),
        grid=grid,
        in_specs=[pl.BlockSpec((TN * k, 7), lambda i: (i, 0)),
                  pl.BlockSpec((TN, Cin), lambda i: (i, 0))]
                 + [const_spec(w.shape) for w in weights],
        out_specs=pl.BlockSpec((TN, C2p), lambda i: (i, 0)),
        compiler_params=pltpu.CompilerParams(
            dimension_semantics=("parallel",),
            vmem_limit_bytes=vmem_limit_bytes),
    )(se_flat, feats, *weights)

    out = out[:P, :C2].astype(jnp.float32).reshape(B, N, C2)   # strip padding
    # back to PyTorch NCHW: (B, 2*Cout, N, 1)
    return jnp.transpose(out, (0, 2, 1))[..., None]


# ----------------------------------------------------------------------------
# Deterministic parameter init (Conv2d 1x1 weights stored transposed so that
# channels-last y = x @ W;  BatchNorm2d folded to eval-mode scale/shift).
# TODO(synk): train-mode BatchNorm (per-batch statistics) is not replicated;
#             BN is applied in eval mode with deterministic running stats.
# ----------------------------------------------------------------------------
def init_params(key, in_channels, out_channels):
    C, D1, C2 = out_channels, out_channels // 2, 2 * out_channels
    eps = 1e-6
    ks = iter(jax.random.split(key, 64))

    def w(shape, scale=0.1):
        return scale * jax.random.normal(next(ks), shape, jnp.float32)

    def bn(c):
        gamma = 1.0 + 0.1 * jax.random.normal(next(ks), (1, c), jnp.float32)
        beta = 0.1 * jax.random.normal(next(ks), (1, c), jnp.float32)
        mean = 0.1 * jax.random.normal(next(ks), (1, c), jnp.float32)
        var = jnp.abs(1.0 + 0.1 * jax.random.normal(next(ks), (1, c), jnp.float32))
        scale = gamma / jnp.sqrt(var + eps)
        shift = beta - mean * scale
        return scale, shift

    p = {}
    p['w_m1'] = w((in_channels, D1)); p['b_m1'] = w((1, D1))            # mlp1
    p['w_l1'] = w((10, D1)); p['b_l1'] = w((1, D1))                     # lse1 mlp
    p['s_l1'], p['t_l1'] = bn(D1)
    p['w_a1'] = w((C, C))                                               # attn1 linear
    p['w_c1'] = w((C, D1)); p['b_c1'] = w((1, D1))                      # attn1 mlp
    p['s_c1'], p['t_c1'] = bn(D1)
    p['w_l2'] = w((10, D1)); p['b_l2'] = w((1, D1))                     # lse2 mlp
    p['s_l2'], p['t_l2'] = bn(D1)
    p['w_a2'] = w((C, C))                                               # attn2 linear
    p['w_c2'] = w((C, C)); p['b_c2'] = w((1, C))                        # attn2 mlp
    p['s_c2'], p['t_c2'] = bn(C)
    p['w_m2'] = w((C, C2)); p['b_m2'] = w((1, C2))                      # mlp2
    p['w_s'] = w((in_channels, C2)); p['b_s'] = w((1, C2))              # shortcut
    p['s_s'], p['t_s'] = bn(C2)
    return p


# ----------------------------------------------------------------------------
# Pure-JAX reference (same semantics, full f32, no Pallas) for validation.
# ----------------------------------------------------------------------------
def reference_forward(coords, features_nchw, p, k):
    se = _spatial_encoding10(coords, k)                       # (B, N, K, 10)
    f = jnp.transpose(features_nchw[..., 0], (0, 2, 1))       # (B, N, Cin)
    dot = functools.partial(jnp.matmul, precision=PREC)

    x = _leaky(dot(f, p['w_m1']) + p['b_m1'], 0.2)

    def locse(w_l, b_l, s_l, t_l, feats):
        h = jnp.einsum('bnkc,cd->bnkd', se, w_l, precision=PREC) + b_l
        h = jnp.maximum(h * s_l + t_l, 0.0)
        fexp = jnp.broadcast_to(feats[:, :, None, :],
                                h.shape[:3] + (feats.shape[-1],))
        return jnp.concatenate([h, fexp], axis=-1)

    def attn(fe, w_a, w_c, b_c, s_c, t_c):
        sc = jnp.einsum('bnkc,cd->bnkd', fe, w_a, precision=PREC)
        score = jax.nn.softmax(sc, axis=2)
        pooled = jnp.sum(score * fe, axis=2)
        y = dot(pooled, w_c) + b_c
        return jnp.maximum(y * s_c + t_c, 0.0)

    x = attn(locse(p['w_l1'], p['b_l1'], p['s_l1'], p['t_l1'], x),
             p['w_a1'], p['w_c1'], p['b_c1'], p['s_c1'], p['t_c1'])
    x = attn(locse(p['w_l2'], p['b_l2'], p['s_l2'], p['t_l2'], x),
             p['w_a2'], p['w_c2'], p['b_c2'], p['s_c2'], p['t_c2'])
    x = dot(x, p['w_m2']) + p['b_m2']
    sh = (dot(f, p['w_s']) + p['b_s']) * p['s_s'] + p['t_s']
    out = _leaky(x + sh, 0.01)
    return jnp.transpose(out, (0, 2, 1))[..., None]


if __name__ == "__main__":
    B, N, K = 2, 16, 8
    Cin, Cout = 8, 32                    # in_channels=8, out_channels=32

    key = jax.random.PRNGKey(0)
    k1, k2, k3 = jax.random.split(key, 3)
    coords = jax.random.normal(k1, (B, N, 3), jnp.float32)
    features = jax.random.normal(k2, (B, Cin, N, 1), jnp.float32)   # NCHW
    params = init_params(k3, Cin, Cout)

    fa = jax.jit(feature_aggregation,
                 static_argnames=("k", "tile_n", "vmem_limit_bytes"))
    out = jax.block_until_ready(fa(coords, features, params, k=K))
    assert out.shape == (B, 2 * Cout, N, 1), out.shape

    ref = reference_forward(coords, features, params, K)
    max_err = float(jnp.max(jnp.abs(out - ref)))
    # Kernel runs an end-to-end bf16 transport/weight path with f32 MXU
    # accumulation; reference is full f32 (HIGHEST) — hence the relaxed
    # tolerance.
    if not jnp.allclose(out, ref, rtol=5e-2, atol=5e-2):
        raise AssertionError(f"kernel/reference mismatch, max abs err {max_err}")

    print("KERNEL_OK")
</pallas_src>

<mosaic_0001>
module attributes {stable_mosaic.version = 11 : i64} {
  func.func @feature_agg_kernel(%arg0: i32, %arg1: memref<256x7xbf16, #tpu.memory_space<vmem>>, %arg2: memref<32x8xbf16, #tpu.memory_space<vmem>>, %arg3: memref<8x16xbf16, #tpu.memory_space<vmem>>, %arg4: memref<1x16xf32, #tpu.memory_space<vmem>>, %arg5: memref<7x16xbf16, #tpu.memory_space<vmem>>, %arg6: memref<1x16xf32, #tpu.memory_space<vmem>>, %arg7: memref<16x16xbf16, #tpu.memory_space<vmem>>, %arg8: memref<16x16xbf16, #tpu.memory_space<vmem>>, %arg9: memref<16x16xbf16, #tpu.memory_space<vmem>>, %arg10: memref<16x16xbf16, #tpu.memory_space<vmem>>, %arg11: memref<1x16xf32, #tpu.memory_space<vmem>>, %arg12: memref<7x16xbf16, #tpu.memory_space<vmem>>, %arg13: memref<1x16xf32, #tpu.memory_space<vmem>>, %arg14: memref<16x16xbf16, #tpu.memory_space<vmem>>, %arg15: memref<16x16xbf16, #tpu.memory_space<vmem>>, %arg16: memref<16x32xbf16, #tpu.memory_space<vmem>>, %arg17: memref<16x32xbf16, #tpu.memory_space<vmem>>, %arg18: memref<1x32xf32, #tpu.memory_space<vmem>>, %arg19: memref<32x128xbf16, #tpu.memory_space<vmem>>, %arg20: memref<1x128xf32, #tpu.memory_space<vmem>>, %arg21: memref<8x128xbf16, #tpu.memory_space<vmem>>, %arg22: memref<1x128xf32, #tpu.memory_space<vmem>>, %arg23: memref<32x128xbf16, #tpu.memory_space<vmem>>) attributes {dimension_semantics = [#tpu.dimension_semantics<parallel>], iteration_bounds = array<i64: 1>, scalar_prefetch = 0 : i64, scratch_operands = 0 : i64, tpu.core_type = #tpu.core_type<tc>, window_params = [{transform_indices = @transform_0, window_bounds = array<i64: 256, 7>}, {transform_indices = @transform_1, window_bounds = array<i64: 32, 8>}, {pipeline_mode = #tpu.pipeline_mode<synchronous>, transform_indices = @transform_2, window_bounds = array<i64: 8, 16>}, {pipeline_mode = #tpu.pipeline_mode<synchronous>, transform_indices = @transform_3, window_bounds = array<i64: 1, 16>}, {pipeline_mode = #tpu.pipeline_mode<synchronous>, transform_indices = @transform_4, window_bounds = array<i64: 7, 16>}, {pipeline_mode = #tpu.pipeline_mode<synchronous>, transform_indices = @transform_5, window_bounds = array<i64: 1, 16>}, {pipeline_mode = #tpu.pipeline_mode<synchronous>, transform_indices = @transform_6, window_bounds = array<i64: 16, 16>}, {pipeline_mode = #tpu.pipeline_mode<synchronous>, transform_indices = @transform_7, window_bounds = array<i64: 16, 16>}, {pipeline_mode = #tpu.pipeline_mode<synchronous>, transform_indices = @transform_8, window_bounds = array<i64: 16, 16>}, {pipeline_mode = #tpu.pipeline_mode<synchronous>, transform_indices = @transform_9, window_bounds = array<i64: 16, 16>}, {pipeline_mode = #tpu.pipeline_mode<synchronous>, transform_indices = @transform_10, window_bounds = array<i64: 1, 16>}, {pipeline_mode = #tpu.pipeline_mode<synchronous>, transform_indices = @transform_11, window_bounds = array<i64: 7, 16>}, {pipeline_mode = #tpu.pipeline_mode<synchronous>, transform_indices = @transform_12, window_bounds = array<i64: 1, 16>}, {pipeline_mode = #tpu.pipeline_mode<synchronous>, transform_indices = @transform_13, window_bounds = array<i64: 16, 16>}, {pipeline_mode = #tpu.pipeline_mode<synchronous>, transform_indices = @transform_14, window_bounds = array<i64: 16, 16>}, {pipeline_mode = #tpu.pipeline_mode<synchronous>, transform_indices = @transform_15, window_bounds = array<i64: 16, 32>}, {pipeline_mode = #tpu.pipeline_mode<synchronous>, transform_indices = @transform_16, window_bounds = array<i64: 16, 32>}, {pipeline_mode = #tpu.pipeline_mode<synchronous>, transform_indices = @transform_17, window_bounds = array<i64: 1, 32>}, {pipeline_mode = #tpu.pipeline_mode<synchronous>, transform_indices = @transform_18, window_bounds = array<i64: 32, 128>}, {pipeline_mode = #tpu.pipeline_mode<synchronous>, transform_indices = @transform_19, window_bounds = array<i64: 1, 128>}, {pipeline_mode = #tpu.pipeline_mode<synchronous>, transform_indices = @transform_20, window_bounds = array<i64: 8, 128>}, {pipeline_mode = #tpu.pipeline_mode<synchronous>, transform_indices = @transform_21, window_bounds = array<i64: 1, 128>}, {transform_indices = @transform_22, window_bounds = array<i64: 32, 128>}]} {
    %c0 = arith.constant 0 : index
    %c0_0 = arith.constant 0 : index
    %0 = vector.load %arg2[%c0, %c0_0] : memref<32x8xbf16, #tpu.memory_space<vmem>>, vector<32x8xbf16>
    %c0_1 = arith.constant 0 : index
    %c0_2 = arith.constant 0 : index
    %1 = vector.load %arg1[%c0_1, %c0_2] : memref<256x7xbf16, #tpu.memory_space<vmem>>, vector<256x7xbf16>
    %c0_3 = arith.constant 0 : index
    %c0_4 = arith.constant 0 : index
    %2 = vector.load %arg3[%c0_3, %c0_4] : memref<8x16xbf16, #tpu.memory_space<vmem>>, vector<8x16xbf16>
    %cst = arith.constant dense<0.000000e+00> : vector<32x16xf32>
    %3 = tpu.matmul %0, %2, %cst {dimension_numbers = #tpu.dot_dimension_numbers<[1], [0], [0], [1], [0, 0, 1, 1], [], []>} : vector<32x8xbf16>, vector<8x16xbf16>, vector<32x16xf32> -> vector<32x16xf32>
    %c0_5 = arith.constant 0 : index
    %c0_6 = arith.constant 0 : index
    %4 = vector.load %arg4[%c0_5, %c0_6] : memref<1x16xf32, #tpu.memory_space<vmem>>, vector<1x16xf32>
    %5 = vector.broadcast %4 : vector<1x16xf32> to vector<32x16xf32>
    %6 = arith.addf %3, %5 : vector<32x16xf32>
    %cst_7 = arith.constant 0.000000e+00 : f32
    %7 = vector.broadcast %cst_7 : f32 to vector<32x16xf32>
    %8 = arith.cmpf oge, %6, %7 : vector<32x16xf32>
    %cst_8 = arith.constant 2.000000e-01 : f32
    %9 = vector.broadcast %cst_8 : f32 to vector<32x16xf32>
    %10 = arith.mulf %9, %6 : vector<32x16xf32>
    %11 = arith.select %8, %6, %10 : vector<32x16xi1>, vector<32x16xf32>
    %12 = arith.truncf %11 : vector<32x16xf32> to vector<32x16xbf16>
    %c0_9 = arith.constant 0 : index
    %c0_10 = arith.constant 0 : index
    %13 = vector.load %arg5[%c0_9, %c0_10] : memref<7x16xbf16, #tpu.memory_space<vmem>>, vector<7x16xbf16>
    %cst_11 = arith.constant dense<0.000000e+00> : vector<256x16xf32>
    %14 = tpu.matmul %1, %13, %cst_11 {dimension_numbers = #tpu.dot_dimension_numbers<[1], [0], [0], [1], [0, 0, 1, 1], [], []>} : vector<256x7xbf16>, vector<7x16xbf16>, vector<256x16xf32> -> vector<256x16xf32>
    %c0_12 = arith.constant 0 : index
    %c0_13 = arith.constant 0 : index
    %15 = vector.load %arg6[%c0_12, %c0_13] : memref<1x16xf32, #tpu.memory_space<vmem>>, vector<1x16xf32>
    %16 = vector.broadcast %15 : vector<1x16xf32> to vector<256x16xf32>
    %17 = arith.addf %14, %16 : vector<256x16xf32>
    %cst_14 = arith.constant 0.000000e+00 : f32
    %18 = vector.broadcast %cst_14 : f32 to vector<256x16xf32>
    %19 = arith.maximumf %17, %18 : vector<256x16xf32>
    %20 = arith.truncf %19 : vector<256x16xf32> to vector<256x16xbf16>
    %c0_15 = arith.constant 0 : index
    %c0_16 = arith.constant 0 : index
    %21 = vector.load %arg7[%c0_15, %c0_16] : memref<16x16xbf16, #tpu.memory_space<vmem>>, vector<16x16xbf16>
    %cst_17 = arith.constant dense<0.000000e+00> : vector<256x16xf32>
    %22 = tpu.matmul %20, %21, %cst_17 {dimension_numbers = #tpu.dot_dimension_numbers<[1], [0], [0], [1], [0, 0, 1, 1], [], []>} : vector<256x16xbf16>, vector<16x16xbf16>, vector<256x16xf32> -> vector<256x16xf32>
    %23 = vector.shape_cast %22 : vector<256x16xf32> to vector<32x8x16xf32>
    %c0_18 = arith.constant 0 : index
    %c0_19 = arith.constant 0 : index
    %24 = vector.load %arg8[%c0_18, %c0_19] : memref<16x16xbf16, #tpu.memory_space<vmem>>, vector<16x16xbf16>
    %cst_20 = arith.constant dense<0.000000e+00> : vector<32x16xf32>
    %25 = tpu.matmul %12, %24, %cst_20 {dimension_numbers = #tpu.dot_dimension_numbers<[1], [0], [0], [1], [0, 0, 1, 1], [], []>} : vector<32x16xbf16>, vector<16x16xbf16>, vector<32x16xf32> -> vector<32x16xf32>
    %26 = vector.shape_cast %25 : vector<32x16xf32> to vector<32x1x16xf32>
    %27 = vector.broadcast %26 : vector<32x1x16xf32> to vector<32x8x16xf32>
    %28 = arith.addf %23, %27 : vector<32x8x16xf32>
    %cst_21 = arith.constant dense<0xFF800000> : vector<32x16xf32>
    %29 = vector.multi_reduction <maximumf>, %28, %cst_21 [1] : vector<32x8x16xf32> to vector<32x16xf32>
    %30 = vector.shape_cast %29 : vector<32x16xf32> to vector<32x1x16xf32>
    %31 = vector.broadcast %30 : vector<32x1x16xf32> to vector<32x8x16xf32>
    %32 = arith.subf %28, %31 : vector<32x8x16xf32>
    %33 = math.exp %32 : vector<32x8x16xf32>
    %cst_22 = arith.constant dense<0.000000e+00> : vector<32x16xf32>
    %34 = vector.multi_reduction <add>, %33, %cst_22 [1] : vector<32x8x16xf32> to vector<32x16xf32>
    %35 = vector.shape_cast %34 : vector<32x16xf32> to vector<32x1x16xf32>
    %36 = tpu.reciprocal %35 {approx = true} : vector<32x1x16xf32> -> vector<32x1x16xf32>
    %37 = vector.broadcast %36 : vector<32x1x16xf32> to vector<32x8x16xf32>
    %38 = arith.mulf %33, %37 : vector<32x8x16xf32>
    %39 = vector.shape_cast %19 : vector<256x16xf32> to vector<32x8x16xf32>
    %40 = arith.mulf %38, %39 : vector<32x8x16xf32>
    %cst_23 = arith.constant dense<0.000000e+00> : vector<32x16xf32>
    %41 = vector.multi_reduction <add>, %40, %cst_23 [1] : vector<32x8x16xf32> to vector<32x16xf32>
    %42 = arith.truncf %41 : vector<32x16xf32> to vector<32x16xbf16>
    %c0_24 = arith.constant 0 : index
    %c0_25 = arith.constant 0 : index
    %43 = vector.load %arg9[%c0_24, %c0_25] : memref<16x16xbf16, #tpu.memory_space<vmem>>, vector<16x16xbf16>
    %cst_26 = arith.constant dense<0.000000e+00> : vector<32x16xf32>
    %44 = tpu.matmul %42, %43, %cst_26 {dimension_numbers = #tpu.dot_dimension_numbers<[1], [0], [0], [1], [0, 0, 1, 1], [], []>} : vector<32x16xbf16>, vector<16x16xbf16>, vector<32x16xf32> -> vector<32x16xf32>
    %c0_27 = arith.constant 0 : index
    %c0_28 = arith.constant 0 : index
    %45 = vector.load %arg10[%c0_27, %c0_28] : memref<16x16xbf16, #tpu.memory_space<vmem>>, vector<16x16xbf16>
    %cst_29 = arith.constant dense<0.000000e+00> : vector<32x16xf32>
    %46 = tpu.matmul %12, %45, %cst_29 {dimension_numbers = #tpu.dot_dimension_numbers<[1], [0], [0], [1], [0, 0, 1, 1], [], []>} : vector<32x16xbf16>, vector<16x16xbf16>, vector<32x16xf32> -> vector<32x16xf32>
    %47 = arith.addf %44, %46 : vector<32x16xf32>
    %c0_30 = arith.constant 0 : index
    %c0_31 = arith.constant 0 : index
    %48 = vector.load %arg11[%c0_30, %c0_31] : memref<1x16xf32, #tpu.memory_space<vmem>>, vector<1x16xf32>
    %49 = vector.broadcast %48 : vector<1x16xf32> to vector<32x16xf32>
    %50 = arith.addf %47, %49 : vector<32x16xf32>
    %cst_32 = arith.constant 0.000000e+00 : f32
    %51 = vector.broadcast %cst_32 : f32 to vector<32x16xf32>
    %52 = arith.maximumf %50, %51 : vector<32x16xf32>
    %53 = arith.truncf %52 : vector<32x16xf32> to vector<32x16xbf16>
    %c0_33 = arith.constant 0 : index
    %c0_34 = arith.constant 0 : index
    %54 = vector.load %arg12[%c0_33, %c0_34] : memref<7x16xbf16, #tpu.memory_space<vmem>>, vector<7x16xbf16>
    %cst_35 = arith.constant dense<0.000000e+00> : vector<256x16xf32>
    %55 = tpu.matmul %1, %54, %cst_35 {dimension_numbers = #tpu.dot_dimension_numbers<[1], [0], [0], [1], [0, 0, 1, 1], [], []>} : vector<256x7xbf16>, vector<7x16xbf16>, vector<256x16xf32> -> vector<256x16xf32>
    %c0_36 = arith.constant 0 : index
    %c0_37 = arith.constant 0 : index
    %56 = vector.load %arg13[%c0_36, %c0_37] : memref<1x16xf32, #tpu.memory_space<vmem>>, vector<1x16xf32>
    %57 = vector.broadcast %56 : vector<1x16xf32> to vector<256x16xf32>
    %58 = arith.addf %55, %57 : vector<256x16xf32>
    %cst_38 = arith.constant 0.000000e+00 : f32
    %59 = vector.broadcast %cst_38 : f32 to vector<256x16xf32>
    %60 = arith.maximumf %58, %59 : vector<256x16xf32>
    %61 = arith.truncf %60 : vector<256x16xf32> to vector<256x16xbf16>
    %c0_39 = arith.constant 0 : index
    %c0_40 = arith.constant 0 : index
    %62 = vector.load %arg14[%c0_39, %c0_40] : memref<16x16xbf16, #tpu.memory_space<vmem>>, vector<16x16xbf16>
    %cst_41 = arith.constant dense<0.000000e+00> : vector<256x16xf32>
    %63 = tpu.matmul %61, %62, %cst_41 {dimension_numbers = #tpu.dot_dimension_numbers<[1], [0], [0], [1], [0, 0, 1, 1], [], []>} : vector<256x16xbf16>, vector<16x16xbf16>, vector<256x16xf32> -> vector<256x16xf32>
    %64 = vector.shape_cast %63 : vector<256x16xf32> to vector<32x8x16xf32>
    %c0_42 = arith.constant 0 : index
    %c0_43 = arith.constant 0 : index
    %65 = vector.load %arg15[%c0_42, %c0_43] : memref<16x16xbf16, #tpu.memory_space<vmem>>, vector<16x16xbf16>
    %cst_44 = arith.constant dense<0.000000e+00> : vector<32x16xf32>
    %66 = tpu.matmul %53, %65, %cst_44 {dimension_numbers = #tpu.dot_dimension_numbers<[1], [0], [0], [1], [0, 0, 1, 1], [], []>} : vector<32x16xbf16>, vector<16x16xbf16>, vector<32x16xf32> -> vector<32x16xf32>
    %67 = vector.shape_cast %66 : vector<32x16xf32> to vector<32x1x16xf32>
    %68 = vector.broadcast %67 : vector<32x1x16xf32> to vector<32x8x16xf32>
    %69 = arith.addf %64, %68 : vector<32x8x16xf32>
    %cst_45 = arith.constant dense<0xFF800000> : vector<32x16xf32>
    %70 = vector.multi_reduction <maximumf>, %69, %cst_45 [1] : vector<32x8x16xf32> to vector<32x16xf32>
    %71 = vector.shape_cast %70 : vector<32x16xf32> to vector<32x1x16xf32>
    %72 = vector.broadcast %71 : vector<32x1x16xf32> to vector<32x8x16xf32>
    %73 = arith.subf %69, %72 : vector<32x8x16xf32>
    %74 = math.exp %73 : vector<32x8x16xf32>
    %cst_46 = arith.constant dense<0.000000e+00> : vector<32x16xf32>
    %75 = vector.multi_reduction <add>, %74, %cst_46 [1] : vector<32x8x16xf32> to vector<32x16xf32>
    %76 = vector.shape_cast %75 : vector<32x16xf32> to vector<32x1x16xf32>
    %77 = tpu.reciprocal %76 {approx = true} : vector<32x1x16xf32> -> vector<32x1x16xf32>
    %78 = vector.broadcast %77 : vector<32x1x16xf32> to vector<32x8x16xf32>
    %79 = arith.mulf %74, %78 : vector<32x8x16xf32>
    %80 = vector.shape_cast %60 : vector<256x16xf32> to vector<32x8x16xf32>
    %81 = arith.mulf %79, %80 : vector<32x8x16xf32>
    %cst_47 = arith.constant dense<0.000000e+00> : vector<32x16xf32>
    %82 = vector.multi_reduction <add>, %81, %cst_47 [1] : vector<32x8x16xf32> to vector<32x16xf32>
    %83 = arith.truncf %82 : vector<32x16xf32> to vector<32x16xbf16>
    %c0_48 = arith.constant 0 : index
    %c0_49 = arith.constant 0 : index
    %84 = vector.load %arg16[%c0_48, %c0_49] : memref<16x32xbf16, #tpu.memory_space<vmem>>, vector<16x32xbf16>
    %cst_50 = arith.constant dense<0.000000e+00> : vector<32x32xf32>
    %85 = tpu.matmul %83, %84, %cst_50 {dimension_numbers = #tpu.dot_dimension_numbers<[1], [0], [0], [1], [0, 0, 1, 1], [], []>} : vector<32x16xbf16>, vector<16x32xbf16>, vector<32x32xf32> -> vector<32x32xf32>
    %c0_51 = arith.constant 0 : index
    %c0_52 = arith.constant 0 : index
    %86 = vector.load %arg17[%c0_51, %c0_52] : memref<16x32xbf16, #tpu.memory_space<vmem>>, vector<16x32xbf16>
    %cst_53 = arith.constant dense<0.000000e+00> : vector<32x32xf32>
    %87 = tpu.matmul %53, %86, %cst_53 {dimension_numbers = #tpu.dot_dimension_numbers<[1], [0], [0], [1], [0, 0, 1, 1], [], []>} : vector<32x16xbf16>, vector<16x32xbf16>, vector<32x32xf32> -> vector<32x32xf32>
    %88 = arith.addf %85, %87 : vector<32x32xf32>
    %c0_54 = arith.constant 0 : index
    %c0_55 = arith.constant 0 : index
    %89 = vector.load %arg18[%c0_54, %c0_55] : memref<1x32xf32, #tpu.memory_space<vmem>>, vector<1x32xf32>
    %90 = vector.broadcast %89 : vector<1x32xf32> to vector<32x32xf32>
    %91 = arith.addf %88, %90 : vector<32x32xf32>
    %cst_56 = arith.constant 0.000000e+00 : f32
    %92 = vector.broadcast %cst_56 : f32 to vector<32x32xf32>
    %93 = arith.maximumf %91, %92 : vector<32x32xf32>
    %94 = arith.truncf %93 : vector<32x32xf32> to vector<32x32xbf16>
    %c0_57 = arith.constant 0 : index
    %c0_58 = arith.constant 0 : index
    %95 = vector.load %arg19[%c0_57, %c0_58] : memref<32x128xbf16, #tpu.memory_space<vmem>>, vector<32x128xbf16>
    %cst_59 = arith.constant dense<0.000000e+00> : vector<32x128xf32>
    %96 = tpu.matmul %94, %95, %cst_59 {dimension_numbers = #tpu.dot_dimension_numbers<[1], [0], [0], [1], [0, 0, 1, 1], [], []>} : vector<32x32xbf16>, vector<32x128xbf16>, vector<32x128xf32> -> vector<32x128xf32>
    %c0_60 = arith.constant 0 : index
    %c0_61 = arith.constant 0 : index
    %97 = vector.load %arg20[%c0_60, %c0_61] : memref<1x128xf32, #tpu.memory_space<vmem>>, vector<1x128xf32>
    %98 = vector.broadcast %97 : vector<1x128xf32> to vector<32x128xf32>
    %99 = arith.addf %96, %98 : vector<32x128xf32>
    %c0_62 = arith.constant 0 : index
    %c0_63 = arith.constant 0 : index
    %100 = vector.load %arg21[%c0_62, %c0_63] : memref<8x128xbf16, #tpu.memory_space<vmem>>, vector<8x128xbf16>
    %cst_64 = arith.constant dense<0.000000e+00> : vector<32x128xf32>
    %101 = tpu.matmul %0, %100, %cst_64 {dimension_numbers = #tpu.dot_dimension_numbers<[1], [0], [0], [1], [0, 0, 1, 1], [], []>} : vector<32x8xbf16>, vector<8x128xbf16>, vector<32x128xf32> -> vector<32x128xf32>
    %c0_65 = arith.constant 0 : index
    %c0_66 = arith.constant 0 : index
    %102 = vector.load %arg22[%c0_65, %c0_66] : memref<1x128xf32, #tpu.memory_space<vmem>>, vector<1x128xf32>
    %103 = vector.broadcast %102 : vector<1x128xf32> to vector<32x128xf32>
    %104 = arith.addf %101, %103 : vector<32x128xf32>
    %105 = arith.addf %99, %104 : vector<32x128xf32>
    %cst_67 = arith.constant 0.000000e+00 : f32
    %106 = vector.broadcast %cst_67 : f32 to vector<32x128xf32>
    %107 = arith.cmpf oge, %105, %106 : vector<32x128xf32>
    %cst_68 = arith.constant 0.00999999977 : f32
    %108 = vector.broadcast %cst_68 : f32 to vector<32x128xf32>
    %109 = arith.mulf %108, %105 : vector<32x128xf32>
    %110 = arith.select %107, %105, %109 : vector<32x128xi1>, vector<32x128xf32>
    %111 = arith.truncf %110 : vector<32x128xf32> to vector<32x128xbf16>
    %c0_69 = arith.constant 0 : index
    %c0_70 = arith.constant 0 : index
    %112 = vector.load %arg23[%c0_69, %c0_70] : memref<32x128xbf16, #tpu.memory_space<vmem>>, vector<32x128xbf16>
    tpu.vector_store %arg23[%c0_69, %c0_70], %111 {strides = array<i32>} : memref<32x128xbf16, #tpu.memory_space<vmem>>, vector<32x128xbf16>,
    return
  }
  func.func @transform_0(%arg0: i32) -> (i32, i32) {
    %c0_i32 = arith.constant 0 : i32
    %c0_i32_0 = arith.constant 0 : i32
    return %arg0, %c0_i32 : i32, i32
  }
  func.func @transform_1(%arg0: i32) -> (i32, i32) {
    %c0_i32 = arith.constant 0 : i32
    %c0_i32_0 = arith.constant 0 : i32
    return %arg0, %c0_i32 : i32, i32
  }
  func.func @transform_2(%arg0: i32) -> (i32, i32) {
    %c0_i32 = arith.constant 0 : i32
    %c0_i32_0 = arith.constant 0 : i32
    %c0_i32_1 = arith.constant 0 : i32
    return %c0_i32, %c0_i32_0 : i32, i32
  }
  func.func @transform_3(%arg0: i32) -> (i32, i32) {
    %c0_i32 = arith.constant 0 : i32
    %c0_i32_0 = arith.constant 0 : i32
    %c0_i32_1 = arith.constant 0 : i32
    return %c0_i32, %c0_i32_0 : i32, i32
  }
  func.func @transform_4(%arg0: i32) -> (i32, i32) {
    %c0_i32 = arith.constant 0 : i32
    %c0_i32_0 = arith.constant 0 : i32
    %c0_i32_1 = arith.constant 0 : i32
    return %c0_i32, %c0_i32_0 : i32, i32
  }
  func.func @transform_5(%arg0: i32) -> (i32, i32) {
    %c0_i32 = arith.constant 0 : i32
    %c0_i32_0 = arith.constant 0 : i32
    %c0_i32_1 = arith.constant 0 : i32
    return %c0_i32, %c0_i32_0 : i32, i32
  }
  func.func @transform_6(%arg0: i32) -> (i32, i32) {
    %c0_i32 = arith.constant 0 : i32
    %c0_i32_0 = arith.constant 0 : i32
    %c0_i32_1 = arith.constant 0 : i32
    return %c0_i32, %c0_i32_0 : i32, i32
  }
  func.func @transform_7(%arg0: i32) -> (i32, i32) {
    %c0_i32 = arith.constant 0 : i32
    %c0_i32_0 = arith.constant 0 : i32
    %c0_i32_1 = arith.constant 0 : i32
    return %c0_i32, %c0_i32_0 : i32, i32
  }
  func.func @transform_8(%arg0: i32) -> (i32, i32) {
    %c0_i32 = arith.constant 0 : i32
    %c0_i32_0 = arith.constant 0 : i32
    %c0_i32_1 = arith.constant 0 : i32
    return %c0_i32, %c0_i32_0 : i32, i32
  }
  func.func @transform_9(%arg0: i32) -> (i32, i32) {
    %c0_i32 = arith.constant 0 : i32
    %c0_i32_0 = arith.constant 0 : i32
    %c0_i32_1 = arith.constant 0 : i32
    return %c0_i32, %c0_i32_0 : i32, i32
  }
  func.func @transform_10(%arg0: i32) -> (i32, i32) {
    %c0_i32 = arith.constant 0 : i32
    %c0_i32_0 = arith.constant 0 : i32
    %c0_i32_1 = arith.constant 0 : i32
    return %c0_i32, %c0_i32_0 : i32, i32
  }
  func.func @transform_11(%arg0: i32) -> (i32, i32) {
    %c0_i32 = arith.constant 0 : i32
    %c0_i32_0 = arith.constant 0 : i32
    %c0_i32_1 = arith.constant 0 : i32
    return %c0_i32, %c0_i32_0 : i32, i32
  }
  func.func @transform_12(%arg0: i32) -> (i32, i32) {
    %c0_i32 = arith.constant 0 : i32
    %c0_i32_0 = arith.constant 0 : i32
    %c0_i32_1 = arith.constant 0 : i32
    return %c0_i32, %c0_i32_0 : i32, i32
  }
  func.func @transform_13(%arg0: i32) -> (i32, i32) {
    %c0_i32 = arith.constant 0 : i32
    %c0_i32_0 = arith.constant 0 : i32
    %c0_i32_1 = arith.constant 0 : i32
    return %c0_i32, %c0_i32_0 : i32, i32
  }
  func.func @transform_14(%arg0: i32) -> (i32, i32) {
    %c0_i32 = arith.constant 0 : i32
    %c0_i32_0 = arith.constant 0 : i32
    %c0_i32_1 = arith.constant 0 : i32
    return %c0_i32, %c0_i32_0 : i32, i32
  }
  func.func @transform_15(%arg0: i32) -> (i32, i32) {
    %c0_i32 = arith.constant 0 : i32
    %c0_i32_0 = arith.constant 0 : i32
    %c0_i32_1 = arith.constant 0 : i32
    return %c0_i32, %c0_i32_0 : i32, i32
  }
  func.func @transform_16(%arg0: i32) -> (i32, i32) {
    %c0_i32 = arith.constant 0 : i32
    %c0_i32_0 = arith.constant 0 : i32
    %c0_i32_1 = arith.constant 0 : i32
    return %c0_i32, %c0_i32_0 : i32, i32
  }
  func.func @transform_17(%arg0: i32) -> (i32, i32) {
    %c0_i32 = arith.constant 0 : i32
    %c0_i32_0 = arith.constant 0 : i32
    %c0_i32_1 = arith.constant 0 : i32
    return %c0_i32, %c0_i32_0 : i32, i32
  }
  func.func @transform_18(%arg0: i32) -> (i32, i32) {
    %c0_i32 = arith.constant 0 : i32
    %c0_i32_0 = arith.constant 0 : i32
    %c0_i32_1 = arith.constant 0 : i32
    return %c0_i32, %c0_i32_0 : i32, i32
  }
  func.func @transform_19(%arg0: i32) -> (i32, i32) {
    %c0_i32 = arith.constant 0 : i32
    %c0_i32_0 = arith.constant 0 : i32
    %c0_i32_1 = arith.constant 0 : i32
    return %c0_i32, %c0_i32_0 : i32, i32
  }
  func.func @transform_20(%arg0: i32) -> (i32, i32) {
    %c0_i32 = arith.constant 0 : i32
    %c0_i32_0 = arith.constant 0 : i32
    %c0_i32_1 = arith.constant 0 : i32
    return %c0_i32, %c0_i32_0 : i32, i32
  }
  func.func @transform_21(%arg0: i32) -> (i32, i32) {
    %c0_i32 = arith.constant 0 : i32
    %c0_i32_0 = arith.constant 0 : i32
    %c0_i32_1 = arith.constant 0 : i32
    return %c0_i32, %c0_i32_0 : i32, i32
  }
  func.func @transform_22(%arg0: i32) -> (i32, i32) {
    %c0_i32 = arith.constant 0 : i32
    %c0_i32_0 = arith.constant 0 : i32
    return %arg0, %c0_i32 : i32, i32
  }
}

</mosaic_0001>

<bundles_post_ra>
// kernel: neg.2
= control target key start
LH: loop header
LB: loop body
LE: loop exit
PB: predicated region body
PF: predicated region fallthrough
CT: control target
= control target key end

     0   :  { %s72_s0 = inlined_call_operand.vmem [shape: f32[2,16,16], index: 0, kind: input, shape index: {}]   ;;  %s73_s1 = inlined_call_operand.vmem [shape: f32[2,16,16], index: 1, kind: output, shape index: {}]  }
   0x1   :  { %v2_v0 = vld [vmem:[%s72_s0] sm:$0xff]  ;;  %v32_v1 = vld [vmem:[%s72_s0 + $0x10] sm:$0xff]  ;;  %v34_v2 = vld [vmem:[%s72_s0 + $0x8] sm:$0xff] }
   0x2   :  { %v5_v3 = vxor.u32 2147483648, %v2_v0  ;;  %v12_v4 = vxor.u32 2147483648, %v32_v1  ;;  %v20_v5 = vxor.u32 2147483648, %v34_v2  ;;  %v36_v6 = vld [vmem:[%s72_s0 + $0x18] sm:$0xff] }
   0x3   :  { %v28_v7 = vxor.u32 2147483648, %v36_v6 }
   0x4   :  { %7 = vst [vmem:[%s73_s1] sm:$0xff] %v5_v3 }
   0x5   :  { %33 = vst [vmem:[%s73_s1 + $0x10] sm:$0xff] %v12_v4 }
   0x6   :  { %35 = vst [vmem:[%s73_s1 + $0x8] sm:$0xff] %v20_v5 }
   0x7   :  { %37 = vst [vmem:[%s73_s1 + $0x18] sm:$0xff] %v28_v7 }

// kernel: feature_aggregation.1
= control target key start
LH: loop header
LB: loop body
LE: loop exit
PB: predicated region body
PF: predicated region fallthrough
CT: control target
= control target key end

     0   :  { %vm130_vm0 = vcmask 1043456   ;;  %vm301_vm1 = vcmask 1042432   ;;  %v3942_v1 = vmov 65535   ;;  %vm123_vm2 = vcmask 64512   ;;  %s5701_s2 = inlined_call_operand.vmem [shape: bf16[8,16], index: 2, kind: input, shape index: {}]   ;;  %s5702_s1 = inlined_call_operand.vmem [shape: bf16[32,8], index: 1, kind: input, shape index: {}]   ;;  %s5703_s4 = inlined_call_operand.vmem [shape: bf16[7,16], index: 4, kind: input, shape index: {}]   ;;  %s5704_s3 = inlined_call_operand.vmem [shape: f32[1,16], index: 3, kind: input, shape index: {}]   ;;  %s5705_s5 = inlined_call_operand.vmem [shape: f32[1,16], index: 5, kind: input, shape index: {}]   ;;  %s5706_s0 = inlined_call_operand.vmem [shape: bf16[256,7], index: 0, kind: input, shape index: {}]   ;;  %s5707_s11 = inlined_call_operand.vmem [shape: bf16[7,16], index: 11, kind: input, shape index: {}]   ;;  %s5708_s7 = inlined_call_operand.vmem [shape: bf16[16,16], index: 7, kind: input, shape index: {}]   ;;  %s5709_s9 = inlined_call_operand.vmem [shape: bf16[16,16], index: 9, kind: input, shape index: {}]   ;;  %s5710_s6 = inlined_call_operand.vmem [shape: bf16[16,16], index: 6, kind: input, shape index: {}]   ;;  %s5711_s8 = inlined_call_operand.vmem [shape: bf16[16,16], index: 8, kind: input, shape index: {}]   ;;  %s5712_s12 = inlined_call_operand.vmem [shape: f32[1,16], index: 12, kind: input, shape index: {}]   ;;  %s5713_s10 = inlined_call_operand.vmem [shape: f32[1,16], index: 10, kind: input, shape index: {}]   ;;  %s5714_s14 = inlined_call_operand.vmem [shape: bf16[16,16], index: 14, kind: input, shape index: {}]   ;;  %s5715_s13 = inlined_call_operand.vmem [shape: bf16[16,16], index: 13, kind: input, shape index: {}]   ;;  %s5716_s16 = inlined_call_operand.vmem [shape: bf16[16,32], index: 16, kind: input, shape index: {}]   ;;  %s5717_s15 = inlined_call_operand.vmem [shape: bf16[16,32], index: 15, kind: input, shape index: {}]   ;;  %s5718_s17 = inlined_call_operand.vmem [shape: f32[1,32], index: 17, kind: input, shape index: {}]   ;;  %s5719_s20 = inlined_call_operand.vmem [shape: bf16[8,128], index: 20, kind: input, shape index: {}]   ;;  %s5720_s18 = inlined_call_operand.vmem [shape: bf16[32,128], index: 18, kind: input, shape index: {}]   ;;  %s5721_s19 = inlined_call_operand.vmem [shape: f32[1,128], index: 19, kind: input, shape index: {}]   ;;  %s5722_s21 = inlined_call_operand.vmem [shape: f32[1,128], index: 21, kind: input, shape index: {}]   ;;  %s5723_s22 = inlined_call_operand.vmem [shape: bf16[32,128], index: 22, kind: output, shape index: {}]  }
   0x1   :  { %5796 = sst [smem:[#allocation15_spill]] %s5701_s2  ;;  %v302_v2 = vsel %vm301_vm1, 4294967295, %v3942_v1  ;;  %vm252_vm3 = vcmask 56320   ;;  %v3651_v17 = vld [vmem:[%s5708_s7] sm:$0xff]  ;;  %vm452_vm6 = vcmask 130048   ;;  %vm1740_vm9 = vcmask 1041409  }
   0x2   :  { %5797 = sst [smem:[#allocation16_spill]] %s5702_s1  ;;  %v303_v7 = vsel %vm130_vm0, %v302_v2, 0  ;;  %v3653_v18 = vld [vmem:[%s5709_s9] sm:$0xff]  ;;  %611 = vmatpush.bf16.msra.mxu3 %v3651_v17  ;;  %vm1742_vm10 = vcmask 1042434   ;;  %vm1744_vm11 = vcmask 1043459   ;;  %vm1746_vm12 = vcmask 1044484  }
   0x3   :  { %5798 = sst [smem:[#allocation17_spill]] %s5703_s4  ;;  %v3650_v20 = vld [vmem:[%s5710_s6] sm:$0xff]  ;;  %vm1748_vm13 = vcmask 1045509   ;;  %vm1750_vm14 = vcmask 1046534   ;;  %vm1752_vm15 = vcmask 1047559  }
   0x4   :  { %5799 = sst [smem:[#allocation18_spill]] %s5704_s3  ;;  %508 = vmatpush.bf16.msra.mxu2 %v3650_v20 }
   0x5   :  { %5800 = sst [smem:[#allocation19_spill]] %s5705_s5 }
   0x6   :  { %5801 = sst [smem:[#allocation20_spill]] %s5706_s0 }
   0x7   :  { %5802 = sst [smem:[#allocation21_spill]] %s5707_s11 }
   0x8   :  { %s5803_s29 = sld [smem:[#allocation15_spill]] }
   0x9   :  { %s5804_s2 = sld [smem:[#allocation16_spill]] }
   0xa   :  { %s5805_s11 = sld [smem:[#allocation17_spill]] }
   0xb   :  { %s5806_s4 = sld [smem:[#allocation20_spill]] }
   0xc   :  { %s5807_s26 = sld [smem:[#allocation21_spill]] }
   0xd   :  { %s5809_s3 = sld [smem:[#allocation19_spill]] }
   0xe   :  { %v108_v0 = vld [vmem:[%s5803_s29] sm:$0xf] }
   0xf   :  { %v132_v3 = vsel %vm130_vm0, %v108_v0, 0  ;;  %v3632_v4 = vld [vmem:[%s5804_s2] sm:$0xff]  ;;  %v3633_v5 = vld [vmem:[%s5804_s2 + $0x8] sm:$0xff] }
  0x10   :  { %v167_v6 = vld [vmem:[%s5805_s11] sm:$0xf]  ;;  %141 = vmatpush.bf16.msra.mxu0 %v132_v3  ;;  %3671 = vmatpush.bf16.msra.mxu1 %v132_v3  ;;  %s5808_s11 = sld [smem:[#allocation18_spill]] }
  0x11   :  { %v305_v8 = vand.u32 %v303_v7, %v167_v6  ;;  %v4077_v9 = vld [vmem:[%s5806_s4] sm:$0xff]  ;;  %v4084_v10 = vld [vmem:[%s5806_s4 + $0x8] sm:$0xff]  ;;  %v4091_v11 = vld [vmem:[%s5806_s4 + $0x10] sm:$0xff] }
  0x12   :  { %v4098_v12 = vld [vmem:[%s5806_s4 + $0x18] sm:$0xff]  ;;  %v4105_v13 = vld [vmem:[%s5806_s4 + $0x20] sm:$0xff]  ;;  %v4112_v14 = vld [vmem:[%s5806_s4 + $0x28] sm:$0xff] }
  0x13   :  { %3446 = vmatmul.msk.bf16.vlgmr.msra.gmra.mxu0 %vm123_vm2, %v3632_v4  ;;  %3447 = vmatmul.msk.bf16.vlgmr.msra.gmra.mxu1 %vm123_vm2, %v3633_v5  ;;  %v1822_v15 = vld [vmem:[%s5807_s26] sm:$0xf]  ;;  %v4128_v19 = vld [vmem:[%s5806_s4 + $0x30] sm:$0xff]  ;;  %v4138_v21 = vld [vmem:[%s5806_s4 + $0x38] sm:$0xff] }
  0x14   :  { %314 = vmatpush.bf16.msrb.mxu1 %v305_v8  ;;  %v1828_v16 = vand.u32 %v1822_v15, %v303_v7  ;;  %1664 = vmatpush.bf16.msrb.mxu0 %v3653_v18  ;;  %v4148_v34 = vld [vmem:[%s5806_s4 + $0x40] sm:$0xff]  ;;  %v4175_v50 = vld [vmem:[%s5806_s4 + $0x48] sm:$0xff]  ;;  %v4197_v58 = vld [vmem:[%s5806_s4 + $0x50] sm:$0xff] }
  0x15   :  { %v4155_v37 = vld [vmem:[%s5809_s3] ss:$0 sm:$0xff]  ;;  %v4219_v2 = vld [vmem:[%s5806_s4 + $0x58] sm:$0xff] }
  0x16   :  { %v3673_v24 = vld [vmem:[%s5808_s11] ss:$0 sm:$0xff] }
  0x18   :  { %1837 = vmatpush.bf16.msra.mxu0 %v1828_v16 }
  0x23   :  { %3512 = vmatmul.msk.bf16.vlgmr.msrb.gmra.mxu1 %vm252_vm3, %v4077_v9 }
  0x33   :  { %3513 = vmatmul.msk.bf16.gmra.mxu1 %vm252_vm3, %v4084_v10 }
  0x43   :  { %3514 = vmatmul.msk.bf16.gmra.mxu1 %vm252_vm3, %v4091_v11 }
  0x53   :  { %3515 = vmatmul.msk.bf16.gmra.mxu1 %vm252_vm3, %v4098_v12 }
  0x63   :  { %3516 = vmatmul.msk.bf16.gmra.mxu1 %vm252_vm3, %v4105_v13 }
  0x73   :  { %3517 = vmatmul.msk.bf16.gmra.mxu1 %vm252_vm3, %v4112_v14 }
  0x83   :  { %3518 = vmatmul.msk.bf16.gmra.mxu1 %vm252_vm3, %v4128_v19 }
  0x90   :  { %v143_v22 = vpop.f32.mrf.mxu0  ;;  %v148_v23 = vpop.f32.mrf.mxu1 }
  0x91   :  { %v144_v25 = vadd.f32 %v3673_v24, %v143_v22  ;;  %v149_v38 = vadd.f32 %v3673_v24, %v148_v23 }
  0x93   :  { %3519 = vmatmul.msk.bf16.gmra.mxu1 %vm252_vm3, %v4138_v21  ;;  %v157_v26 = vmul.f32 0.2, %v144_v25  ;;  %vm153_vm4 = vcmp.ge.f32.partialorder %v144_v25, 0.0  ;;  %v159_v42 = vmul.f32 0.2, %v149_v38  ;;  %vm155_vm8 = vcmp.ge.f32.partialorder %v149_v38, 0.0 }
  0x95   :  { %v161_v31 = vsel %vm153_vm4, %v144_v25, %v157_v26  ;;  %v163_v48 = vsel %vm155_vm8, %v149_v38, %v159_v42 }
  0x98   :  { %v145_v27 = vpop.f32.mrf.mxu0  ;;  %v150_v28 = vpop.f32.mrf.mxu1 }
  0x99   :  { %v146_v29 = vadd.f32 %v3673_v24, %v145_v27  ;;  %v151_v36 = vadd.f32 %v3673_v24, %v150_v28 }
  0x9b   :  { %vm154_vm5 = vcmp.ge.f32.partialorder %v146_v29, 0.0  ;;  %v158_v30 = vmul.f32 0.2, %v146_v29  ;;  %v160_v39 = vmul.f32 0.2, %v151_v36  ;;  %vm156_vm7 = vcmp.ge.f32.partialorder %v151_v36, 0.0 }
  0x9d   :  { %v162_v32 = vsel %vm154_vm5, %v146_v29, %v158_v30  ;;  %v164_v46 = vsel %vm156_vm7, %v151_v36, %v160_v39 }
  0x9e   :  { %v165_v33 = vpack.c.bf16 %v162_v32, %v161_v31  ;;  %v166_v49 = vpack.c.bf16 %v164_v46, %v163_v48 }
  0xa0   :  { %v316_v35 = vpop.f32.mrf.mxu1  ;;  %3552 = vmatmul.msk.bf16.vlgmr.msra.gmra.mxu3 %vm452_vm6, %v165_v33  ;;  %3558 = vmatmul.msk.bf16.vlgmr.msrb.gmra.mxu0 %vm452_vm6, %v165_v33 }
  0xa1   :  { %v4160_v40 = vadd.f32 %v4155_v37, %v316_v35 }
  0xa3   :  { %3520 = vmatmul.msk.bf16.gmra.mxu1 %vm252_vm3, %v4148_v34  ;;  %v5751_v44 = vmax.f32 %v4160_v40, 0.0 }
  0xa8   :  { %v318_v41 = vpop.f32.mrf.mxu1 }
  0xa9   :  { %v4163_v43 = vadd.f32 %v4155_v37, %v318_v41 }
  0xab   :  { %v5750_v45 = vmax.f32 %v4163_v43, 0.0 }
  0xad   :  { %v428_v47 = vpack.c.bf16 %v5750_v45, %v5751_v44 }
  0xaf   :  { %3532 = vmatmul.msk.bf16.vlgmr.msra.gmra.mxu2 %vm452_vm6, %v428_v47 }
  0xb0   :  { %v321_v51 = vpop.f32.mrf.mxu1  ;;  %3553 = vmatmul.msk.bf16.gmra.mxu3 %vm452_vm6, %v166_v49  ;;  %3559 = vmatmul.msk.bf16.gmra.mxu0 %vm452_vm6, %v166_v49 }
  0xb1   :  { %v4182_v52 = vadd.f32 %v4155_v37, %v321_v51 }
  0xb3   :  { %3521 = vmatmul.msk.bf16.gmra.mxu1 %vm252_vm3, %v4175_v50  ;;  %v5749_v55 = vmax.f32 %v4182_v52, 0.0 }
  0xb8   :  { %v323_v53 = vpop.f32.mrf.mxu1 }
  0xb9   :  { %v4185_v54 = vadd.f32 %v4155_v37, %v323_v53 }
  0xbb   :  { %v5746_v56 = vmax.f32 %v4185_v54, 0.0 }
  0xbd   :  { %v429_v57 = vpack.c.bf16 %v5746_v56, %v5749_v55 }
  0xbf   :  { %3533 = vmatmul.msk.bf16.gmra.mxu2 %vm452_vm6, %v429_v57 }
  0xc0   :  { %v326_v59 = vpop.f32.mrf.mxu1  ;;  %3566 = vmatmul.msk.bf16.vlgmr.msra.gmra.mxu0 %vm252_vm3, %v4077_v9 }
  0xc1   :  { %v4204_v60 = vadd.f32 %v4155_v37, %v326_v59 }
  0xc3   :  { %3522 = vmatmul.msk.bf16.gmra.mxu1 %vm252_vm3, %v4197_v58  ;;  %v5745_v63 = vmax.f32 %v4204_v60, 0.0 }
  0xc8   :  { %v328_v61 = vpop.f32.mrf.mxu1 }
  0xc9   :  { %v4207_v62 = vadd.f32 %v4155_v37, %v328_v61 }
  0xcb   :  { %v5744_v0 = vmax.f32 %v4207_v62, 0.0 }
  0xcd   :  { %v430_v1 = vpack.c.bf16 %v5744_v0, %v5745_v63 }
  0xcf   :  { %3534 = vmatmul.msk.bf16.gmra.mxu2 %vm452_vm6, %v430_v1 }
  0xd0   :  { %v331_v3 = vpop.f32.mrf.mxu1  ;;  %3567 = vmatmul.msk.bf16.gmra.mxu0 %vm252_vm3, %v4084_v10  ;;  %v3646_v10 = vld [vmem:[%s5806_s4 + $0x60] sm:$0xff] }
  0xd1   :  { %v4226_v4 = vadd.f32 %v4155_v37, %v331_v3 }
  0xd3   :  { %3523 = vmatmul.msk.bf16.gmra.mxu1 %vm252_vm3, %v4219_v2  ;;  %v5743_v7 = vmax.f32 %v4226_v4, 0.0 }
  0xd8   :  { %v333_v5 = vpop.f32.mrf.mxu1 }
  0xd9   :  { %v4229_v6 = vadd.f32 %v4155_v37, %v333_v5 }
  0xdb   :  { %v5742_v8 = vmax.f32 %v4229_v6, 0.0 }
  0xdd   :  { %v431_v9 = vpack.c.bf16 %v5742_v8, %v5743_v7 }
  0xdf   :  { %3535 = vmatmul.msk.bf16.gmra.mxu2 %vm452_vm6, %v431_v9 }
  0xe0   :  { %v336_v15 = vpop.f32.mrf.mxu1  ;;  %3568 = vmatmul.msk.bf16.gmra.mxu0 %vm252_vm3, %v4091_v11  ;;  %v3647_v11 = vld [vmem:[%s5806_s4 + $0x68] sm:$0xff] }
  0xe1   :  { %v4245_v16 = vadd.f32 %v4155_v37, %v336_v15 }
  0xe3   :  { %3524 = vmatmul.msk.bf16.gmra.mxu1 %vm252_vm3, %v3646_v10  ;;  %v5737_v20 = vmax.f32 %v4245_v16, 0.0 }
  0xe8   :  { %v338_v17 = vpop.f32.mrf.mxu1 }
  0xe9   :  { %v4248_v18 = vadd.f32 %v4155_v37, %v338_v17 }
  0xeb   :  { %v5741_v22 = vmax.f32 %v4248_v18, 0.0 }
  0xed   :  { %v432_v23 = vpack.c.bf16 %v5741_v22, %v5737_v20 }
  0xef   :  { %3536 = vmatmul.msk.bf16.gmra.mxu2 %vm452_vm6, %v432_v23 }
  0xf0   :  { %v341_v24 = vpop.f32.mrf.mxu1  ;;  %3569 = vmatmul.msk.bf16.gmra.mxu0 %vm252_vm3, %v4098_v12  ;;  %v3648_v12 = vld [vmem:[%s5806_s4 + $0x70] sm:$0xff] }
  0xf1   :  { %v4264_v25 = vadd.f32 %v4155_v37, %v341_v24 }
  0xf3   :  { %3525 = vmatmul.msk.bf16.gmra.mxu1 %vm252_vm3, %v3647_v11  ;;  %v5740_v28 = vmax.f32 %v4264_v25, 0.0 }
  0xf8   :  { %v343_v26 = vpop.f32.mrf.mxu1 }
  0xf9   :  { %v4267_v27 = vadd.f32 %v4155_v37, %v343_v26 }
  0xfb   :  { %v5736_v29 = vmax.f32 %v4267_v27, 0.0 }
  0xfd   :  { %v433_v30 = vpack.c.bf16 %v5736_v29, %v5740_v28 }
  0xff   :  { %3537 = vmatmul.msk.bf16.gmra.mxu2 %vm452_vm6, %v433_v30 }
 0x100   :  { %v346_v31 = vpop.f32.mrf.mxu1  ;;  %3570 = vmatmul.msk.bf16.gmra.mxu0 %vm252_vm3, %v4105_v13  ;;  %v3649_v13 = vld [vmem:[%s5806_s4 + $0x78] sm:$0xff] }
 0x101   :  { %v4283_v32 = vadd.f32 %v4155_v37, %v346_v31 }
 0x103   :  { %3526 = vmatmul.msk.bf16.gmra.mxu1 %vm252_vm3, %v3648_v12  ;;  %v5735_v36 = vmax.f32 %v4283_v32, 0.0 }
 0x108   :  { %v348_v33 = vpop.f32.mrf.mxu1 }
 0x109   :  { %v4286_v35 = vadd.f32 %v4155_v37, %v348_v33 }
 0x10b   :  { %v5734_v38 = vmax.f32 %v4286_v35, 0.0 }
 0x10d   :  { %v434_v39 = vpack.c.bf16 %v5734_v38, %v5735_v36 }
 0x10f   :  { %3538 = vmatmul.msk.bf16.gmra.mxu2 %vm452_vm6, %v434_v39 }
 0x110   :  { %v351_v41 = vpop.f32.mrf.mxu1  ;;  %3571 = vmatmul.msk.bf16.gmra.mxu0 %vm252_vm3, %v4112_v14 }
 0x111   :  { %v4302_v42 = vadd.f32 %v4155_v37, %v351_v41 }
 0x113   :  { %3527 = vmatmul.msk.bf16.gmra.mxu1 %vm252_vm3, %v3649_v13  ;;  %v5733_v48 = vmax.f32 %v4302_v42, 0.0 }
 0x118   :  { %v353_v46 = vpop.f32.mrf.mxu1 }
 0x119   :  { %v4305_v47 = vadd.f32 %v4155_v37, %v353_v46 }
 0x11b   :  { %v5730_v49 = vmax.f32 %v4305_v47, 0.0 }
 0x11d   :  { %v435_v51 = vpack.c.bf16 %v5730_v49, %v5733_v48 }
 0x11f   :  { %3539 = vmatmul.msk.bf16.gmra.mxu2 %vm452_vm6, %v435_v51 }
 0x120   :  { %v356_v14 = vpop.f32.mrf.mxu1  ;;  %3572 = vmatmul.msk.bf16.gmra.mxu0 %vm252_vm3, %v4128_v19 }
 0x121   :  { %v4317_v53 = vadd.f32 %v4155_v37, %v356_v14 }
 0x123   :  { %v5729_v61 = vmax.f32 %v4317_v53, 0.0  ;;  %v4328_v5 = vpop.f32.mrf.mxu3 }
 0x124   :  { %v655_v19 = vperm.slane %v4328_v5, 0  ;;  %v627_v17 = vrot.slane %v4328_v5, 1  ;;  %v628_v46 = vrot.slane %v4328_v5, 2 }
 0x126   :  { %v656_v26 = vperm.slane %v627_v17, 0 }
 0x128   :  { %v358_v57 = vpop.f32.mrf.mxu1 }
 0x129   :  { %v4320_v59 = vadd.f32 %v4155_v37, %v358_v57 }
 0x12b   :  { %v5728_v1 = vmax.f32 %v4320_v59, 0.0 }
 0x12d   :  { %v436_v3 = vpack.c.bf16 %v5728_v1, %v5729_v61 }
 0x12f   :  { %3540 = vmatmul.msk.bf16.gmra.mxu2 %vm452_vm6, %v436_v3 }
 0x130   :  { %v361_v9 = vpop.f32.mrf.mxu1  ;;  %3573 = vmatmul.msk.bf16.gmra.mxu0 %vm252_vm3, %v4138_v21 }
 0x131   :  { %v4337_v24 = vadd.f32 %v4155_v37, %v361_v9 }
 0x132   :  { %v510_v10 = vpop.f32.mrf.mxu2 }
 0x133   :  { %v719_v15 = vadd.f32 %v655_v19, %v510_v10  ;;  %v5727_v21 = vmax.f32 %v4337_v24, 0.0  ;;  %v657_v19 = vperm.slane %v628_v46, 0 }
 0x135   :  { %v751_v23 = vsel %vm452_vm6, %v719_v15, -inf }
 0x136   :  { %v752_v11 = vrot.slane %v751_v23, 4 }
 0x138   :  { %v753_v30 = vmax.f32 %v751_v23, %v752_v11  ;;  %v363_v12 = vpop.f32.mrf.mxu1 }
 0x139   :  { %v4340_v31 = vadd.f32 %v4155_v37, %v363_v12 }
 0x13a   :  { %v754_v33 = vrot.slane %v753_v30, 2  ;;  %v512_v39 = vpop.f32.mrf.mxu2 }
 0x13b   :  { %v5726_v13 = vmax.f32 %v4340_v31, 0.0  ;;  %v720_v41 = vadd.f32 %v656_v26, %v512_v39 }
 0x13c   :  { %v755_v51 = vmax.f32 %v753_v30, %v754_v33  ;;  %v629_v30 = vrot.slane %v4328_v5, 3 }
 0x13d   :  { %v437_v14 = vpack.c.bf16 %v5726_v13, %v5727_v21  ;;  %v758_v57 = vsel %vm452_vm6, %v720_v41, -inf }
 0x13e   :  { %v759_v3 = vrot.slane %v758_v57, 4  ;;  %v756_v9 = vrot.slane %v755_v51, 1  ;;  %v658_v46 = vperm.slane %v629_v30, 0 }
 0x13f   :  { %3541 = vmatmul.msk.bf16.gmra.mxu2 %vm452_vm6, %v437_v14 }
 0x140   :  { %v760_v10 = vmax.f32 %v758_v57, %v759_v3  ;;  %v366_v17 = vpop.f32.mrf.mxu1  ;;  %3574 = vmatmul.msk.bf16.gmra.mxu0 %vm252_vm3, %v4148_v34  ;;  %v757_v12 = vmax.f32 %v755_v51, %v756_v9 }
 0x141   :  { %v4356_v14 = vadd.f32 %v4155_v37, %v366_v17  ;;  %v630_v17 = vrot.slane %v4328_v5, 4 }
 0x142   :  { %v761_v23 = vrot.slane %v760_v10, 2  ;;  %v515_v11 = vpop.f32.mrf.mxu2  ;;  %v975_v57 = vsub.f32 %v719_v15, %v757_v12 }
 0x143   :  { %v721_v26 = vadd.f32 %v657_v19, %v515_v11  ;;  %v5732_v51 = vmax.f32 %v4356_v14, 0.0  ;;  %v659_v12 = vperm.slane %v630_v17, 0 }
 0x144   :  { %v762_v33 = vmax.f32 %v760_v10, %v761_v23  ;;  %v1007_v23 = vmul.f32 1.442695, %v975_v57 }
 0x145   :  { %v765_v39 = vsel %vm452_vm6, %v721_v26, -inf }
 0x146   :  { %v763_v13 = vrot.slane %v762_v33, 1  ;;  %v766_v21 = vrot.slane %v765_v39, 4  ;;  %3680 = vpow2.f32 %v1007_v23 }
 0x148   :  { %v764_v3 = vmax.f32 %v762_v33, %v763_v13  ;;  %v767_v1 = vmax.f32 %v765_v39, %v766_v21  ;;  %v368_v61 = vpop.f32.mrf.mxu1 }
 0x149   :  { %v4359_v34 = vadd.f32 %v4155_v37, %v368_v61 }
 0x14a   :  { %v976_v19 = vsub.f32 %v720_v41, %v764_v3  ;;  %v768_v11 = vrot.slane %v767_v1, 2  ;;  %v517_v49 = vpop.f32.mrf.mxu2 }
 0x14b   :  { %v5731_v9 = vmax.f32 %v4359_v34, 0.0  ;;  %v4363_v10 = vadd.f32 %v658_v46, %v517_v49 }
 0x14c   :  { %v769_v30 = vmax.f32 %v767_v1, %v768_v11  ;;  %v1009_v15 = vmul.f32 1.442695, %v976_v19  ;;  %v4375_v1 = vpop.f32.mrf.mxu0  ;;  %v631_v11 = vrot.slane %v4328_v5, 5  ;;  %v4382_v23 = vpop.eup %3680 }
 0x14d   :  { %v438_v61 = vpack.c.bf16 %v5731_v9, %v5732_v51  ;;  %v772_v21 = vsel %vm452_vm6, %v4363_v10, -inf  ;;  %5810 = vst [vmem:[#allocation2_spill] sm:$0xff] %v4375_v1 }
 0x14e   :  { %v770_v13 = vrot.slane %v769_v30, 1  ;;  %v773_v41 = vrot.slane %v772_v21, 4  ;;  %3682 = vpow2.f32 %v1009_v15 }
 0x14f   :  { %3542 = vmatmul.msk.bf16.gmra.mxu2 %vm452_vm6, %v438_v61 }
 0x150   :  { %v771_v49 = vmax.f32 %v769_v30, %v770_v13  ;;  %v774_v33 = vmax.f32 %v772_v21, %v773_v41  ;;  %v371_v39 = vpop.f32.mrf.mxu1  ;;  %3575 = vmatmul.msk.bf16.gmra.mxu0 %vm252_vm3, %v4175_v50  ;;  %v660_v21 = vperm.slane %v631_v11, 0 }
 0x151   :  { %v4385_v50 = vadd.f32 %v4155_v37, %v371_v39 }
 0x152   :  { %v977_v46 = vsub.f32 %v721_v26, %v771_v49  ;;  %v775_v57 = vrot.slane %v774_v33, 2  ;;  %v520_v3 = vpop.f32.mrf.mxu2  ;;  %v1071_v49 = vsel %vm452_vm6, %v4382_v23, 0.0 }
 0x153   :  { %v4377_v19 = vadd.f32 %v659_v12, %v520_v3  ;;  %5811 = vst [vmem:[#allocation3_spill] sm:$0xff] %v4385_v50 }
 0x154   :  { %v1011_v9 = vmul.f32 1.442695, %v977_v46  ;;  %v776_v61 = vmax.f32 %v774_v33, %v775_v57  ;;  %v4387_v30 = vpop.eup %3682  ;;  %v632_v46 = vrot.slane %v4328_v5, 6 }
 0x155   :  { %v779_v17 = vsel %vm452_vm6, %v4377_v19, -inf  ;;  %v1078_v33 = vsel %vm452_vm6, %v4387_v30, 0.0 }
 0x156   :  { %3684 = vpow2.f32 %v1011_v9  ;;  %v777_v26 = vrot.slane %v776_v61, 1  ;;  %v780_v15 = vrot.slane %v779_v17, 4  ;;  %v5739_v9 = vmax.f32 %v4385_v50, 0.0 }
 0x157   :  { %v661_v29 = vperm.slane %v632_v46, 0 }
 0x158   :  { %v373_v13 = vpop.f32.mrf.mxu1  ;;  %v781_v41 = vmax.f32 %v779_v17, %v780_v15  ;;  %v778_v57 = vmax.f32 %v776_v61, %v777_v26  ;;  %v4403_v15 = vpop.f32.mrf.mxu0  ;;  %v1079_v61 = vrot.slane %v1078_v33, 4 }
 0x159   :  { %v4390_v12 = vadd.f32 %v4155_v37, %v373_v13  ;;  %5813 = vst [vmem:[#allocation5_spill] sm:$0xff] %v4403_v15  ;;  %v1072_v13 = vrot.slane %v1071_v49, 4 }
 0x15a   :  { %v522_v39 = vpop.f32.mrf.mxu2  ;;  %v782_v3 = vrot.slane %v781_v41, 2 }
 0x15b   :  { %5812 = vst [vmem:[#allocation4_spill] sm:$0xff] %v4390_v12  ;;  %v5738_v11 = vmax.f32 %v4390_v12, 0.0  ;;  %v4399_v51 = vadd.f32 %v660_v21, %v522_v39  ;;  %v978_v39 = vsub.f32 %v4363_v10, %v778_v57 }
 0x15c   :  { %v4401_v17 = vpop.eup %3684  ;;  %v783_v48 = vmax.f32 %v781_v41, %v782_v3  ;;  %v1073_v41 = vadd.f32 %v1072_v13, %v1071_v49 }
 0x15d   :  { %v439_v38 = vpack.c.bf16 %v5738_v11, %v5739_v9  ;;  %v786_v36 = vsel %vm452_vm6, %v4399_v51, -inf  ;;  %v1085_v26 = vsel %vm452_vm6, %v4401_v17, 0.0  ;;  %v1080_v9 = vadd.f32 %v1079_v61, %v1078_v33 }
 0x15e   :  { %v787_v21 = vrot.slane %v786_v36, 4  ;;  %v1086_v3 = vrot.slane %v1085_v26, 4  ;;  %v784_v11 = vrot.slane %v783_v48, 1  ;;  %v1013_v8 = vmul.f32 1.442695, %v978_v39 }
 0x15f   :  { %3543 = vmatmul.msk.bf16.gmra.mxu2 %vm452_vm6, %v439_v38  ;;  %v1074_v0 = vrot.slane %v1073_v41, 2  ;;  %v1081_v38 = vrot.slane %v1080_v9, 2 }
 0x160   :  { %v376_v20 = vpop.f32.mrf.mxu1  ;;  %3576 = vmatmul.msk.bf16.gmra.mxu0 %vm252_vm3, %v4197_v58  ;;  %v788_v28 = vmax.f32 %v786_v36, %v787_v21  ;;  %v1087_v63 = vadd.f32 %v1086_v3, %v1085_v26  ;;  %v785_v56 = vmax.f32 %v783_v48, %v784_v11  ;;  %v4419_v10 = vpop.f32.mrf.mxu0  ;;  %3686 = vpow2.f32 %v1013_v8 }
 0x161   :  { %5814 = vst [vmem:[#allocation6_spill] sm:$0xff] %v4419_v10  ;;  %v4422_v57 = vadd.f32 %v4155_v37, %v376_v20  ;;  %v633_v36 = vrot.slane %v4328_v5, 7  ;;  %v1075_v33 = vadd.f32 %v1074_v0, %v1073_v41  ;;  %v1082_v11 = vadd.f32 %v1081_v38, %v1080_v9 }
 0x162   :  { %v525_v22 = vpop.f32.mrf.mxu2  ;;  %v789_v46 = vrot.slane %v788_v28, 2 }
 0x163   :  { %v4417_v7 = vadd.f32 %v661_v29, %v525_v22  ;;  %5815 = vst [vmem:[#allocation7_spill] sm:$0xff] %v4422_v57  ;;  %v1088_v22 = vrot.slane %v1087_v63, 2  ;;  %v979_v29 = vsub.f32 %v4377_v19, %v785_v56  ;;  %v5748_v20 = vmax.f32 %v4422_v57, 0.0 }
 0x164   :  { %v790_v13 = vmax.f32 %v788_v28, %v789_v46  ;;  %v662_v21 = vperm.slane %v633_v36, 0  ;;  %v1076_v3 = vrot.slane %v1075_v33, 1  ;;  %v1083_v19 = vrot.slane %v1082_v11, 1 }
 0x165   :  { %v793_v58 = vsel %vm452_vm6, %v4417_v7, -inf  ;;  %v1089_v5 = vadd.f32 %v1088_v22, %v1087_v63  ;;  %v1015_v0 = vmul.f32 1.442695, %v979_v29 }
 0x166   :  { %v794_v61 = vrot.slane %v793_v58, 4  ;;  %v4433_v39 = vpop.eup %3686  ;;  %v791_v9 = vrot.slane %v790_v13, 1  ;;  %v1077_v63 = vadd.f32 %v1076_v3, %v1075_v33  ;;  %v1084_v22 = vadd.f32 %v1083_v19, %v1082_v11  ;;  %v4453_v3 = vpop.f32.mrf.mxu3 }
 0x167   :  { %v1092_v38 = vsel %vm452_vm6, %v4433_v39, 0.0  ;;  %3688 = vpow2.f32 %v1015_v0  ;;  %v638_v57 = vrot.slane %v4453_v3, 5 }
 0x168   :  { %v378_v49 = vpop.f32.mrf.mxu1  ;;  %v795_v28 = vmax.f32 %v793_v58, %v794_v61  ;;  %v4440_v41 = vpop.f32.mrf.mxu0  ;;  %v792_v29 = vmax.f32 %v790_v13, %v791_v9  ;;  %v1093_v61 = vrot.slane %v1092_v38, 4  ;;  %3690 = vrcp.f32 %v1077_v63 }
 0x169   :  { %v4429_v48 = vadd.f32 %v4155_v37, %v378_v49  ;;  %5817 = vst [vmem:[#allocation9_spill] sm:$0xff] %v4440_v41  ;;  %v1090_v49 = vrot.slane %v1089_v5, 1  ;;  %3692 = vrcp.f32 %v1084_v22 }
 0x16a   :  { %v527_v8 = vpop.f32.mrf.mxu2  ;;  %v980_v55 = vsub.f32 %v4399_v51, %v792_v29  ;;  %v1094_v33 = vadd.f32 %v1093_v61, %v1092_v38  ;;  %v663_v38 = vperm.slane %v4453_v3, 0 }
 0x16b   :  { %5816 = vst [vmem:[#allocation8_spill] sm:$0xff] %v4429_v48  ;;  %v5747_v26 = vmax.f32 %v4429_v48, 0.0  ;;  %v4446_v36 = vadd.f32 %v662_v21, %v527_v8  ;;  %v634_v21 = vrot.slane %v4453_v3, 1 }
 0x16c   :  { %v1017_v0 = vmul.f32 1.442695, %v980_v55 }
 0x16d   :  { %v440_v56 = vpack.c.bf16 %v5747_v26, %v5748_v20  ;;  %v796_v26 = vrot.slane %v795_v28, 2  ;;  %v800_v20 = vsel %vm452_vm6, %v4446_v36, -inf  ;;  %v664_v61 = vperm.slane %v634_v21, 0 }
 0x16e   :  { %v801_v8 = vrot.slane %v800_v20, 4 }
 0x16f   :  { %3544 = vmatmul.msk.bf16.gmra.mxu2 %vm452_vm6, %v440_v56  ;;  %v1091_v56 = vadd.f32 %v1090_v49, %v1089_v5  ;;  %v797_v45 = vmax.f32 %v795_v28, %v796_v26  ;;  %v1095_v28 = vrot.slane %v1094_v33, 2 }
 0x170   :  { %v381_v46 = vpop.f32.mrf.mxu1  ;;  %3577 = vmatmul.msk.bf16.gmra.mxu0 %vm252_vm3, %v4219_v2  ;;  %v4451_v2 = vpop.eup %3688  ;;  %v802_v49 = vmax.f32 %v800_v20, %v801_v8 }
 0x171   :  { %3694 = vrcp.f32 %v1091_v56  ;;  %v4456_v13 = vadd.f32 %v4155_v37, %v381_v46  ;;  %v1099_v5 = vsel %vm452_vm6, %v4451_v2, 0.0  ;;  %v798_v19 = vrot.slane %v797_v45, 1  ;;  %v3691_v9 = vpop.eup %3690 }
 0x172   :  { %v530_v58 = vpop.f32.mrf.mxu2  ;;  %v3693_v63 = vpop.eup %3692  ;;  %v1100_v22 = vrot.slane %v1099_v5, 4  ;;  %v635_v56 = vrot.slane %v4453_v3, 2  ;;  %v1327_v55 = vmul.f32 %v3691_v9, %v4382_v23  ;;  %3696 = vpow2.f32 %v1017_v0 }
 0x173   :  { %5818 = vst [vmem:[#allocation10_spill] sm:$0xff] %v4456_v13  ;;  %v5754_v29 = vmax.f32 %v4456_v13, 0.0  ;;  %v1328_v41 = vmul.f32 %v3693_v63, %v4387_v30  ;;  %v1096_v10 = vadd.f32 %v1095_v28, %v1094_v33  ;;  %v4470_v15 = vadd.f32 %v663_v38, %v530_v58 }
 0x174   :  { %v803_v8 = vrot.slane %v802_v49, 2  ;;  %v1101_v21 = vadd.f32 %v1100_v22, %v1099_v5  ;;  %v665_v23 = vperm.slane %v635_v56, 0  ;;  %v5821_v33 = vmax.f32 %v4163_v43, 0.0 }
 0x175   :  { %v1097_v28 = vrot.slane %v1096_v10, 1  ;;  %v807_v5 = vsel %vm452_vm6, %v4470_v15, -inf }
 0x176   :  { %v804_v38 = vmax.f32 %v802_v49, %v803_v8  ;;  %v1102_v63 = vrot.slane %v1101_v21, 2 }
 0x177   :  { %v3695_v44 = vpop.eup %3694 }
 0x178   :  { %v383_v11 = vpop.f32.mrf.mxu1  ;;  %v1329_v9 = vmul.f32 %v3695_v44, %v4401_v17  ;;  %v5822_v17 = vmax.f32 %v4182_v52, 0.0 }
 0x179   :  { %v4462_v51 = vadd.f32 %v4155_v37, %v383_v11  ;;  %v799_v11 = vmax.f32 %v797_v45, %v798_v19  ;;  %v5820_v45 = vmax.f32 %v4160_v40, 0.0  ;;  %v1360_v19 = vmul.f32 %v1328_v41, %v5821_v33 }
 0x17a   :  { %v532_v26 = vpop.f32.mrf.mxu2  ;;  %v1361_v56 = vmul.f32 %v1329_v9, %v5822_v17 }
 0x17b   :  { %5819 = vst [vmem:[#allocation11_spill] sm:$0xff] %v4462_v51  ;;  %v5753_v46 = vmax.f32 %v4462_v51, 0.0  ;;  %v4476_v48 = vadd.f32 %v664_v61, %v532_v26  ;;  %v1359_v0 = vmul.f32 %v1327_v55, %v5820_v45  ;;  %v981_v30 = vsub.f32 %v4417_v7, %v799_v11  ;;  %v4487_v26 = vpop.eup %3696 }
 0x17c   :  { %v636_v7 = vrot.slane %v4453_v3, 3  ;;  %v808_v61 = vrot.slane %v807_v5, 4  ;;  %v1398_v44 = vsel %vm452_vm6, %v1360_v19, 0.0  ;;  %v1098_v55 = vadd.f32 %v1097_v28, %v1096_v10 }
 0x17d   :  { %v441_v20 = vpack.c.bf16 %v5753_v46, %v5754_v29  ;;  %v814_v40 = vsel %vm452_vm6, %v4476_v48, -inf  ;;  %v1391_v43 = vsel %vm452_vm6, %v1359_v0, 0.0  ;;  %v1019_v41 = vmul.f32 1.442695, %v981_v30 }
 0x17e   :  { %v1106_v49 = vsel %vm452_vm6, %v4487_v26, 0.0  ;;  %v805_v11 = vrot.slane %v804_v38, 1  ;;  %v1392_v0 = vrot.slane %v1391_v43, 4  ;;  %v1103_v30 = vadd.f32 %v1102_v63, %v1101_v21 }
 0x17f   :  { %3545 = vmatmul.msk.bf16.gmra.mxu2 %vm452_vm6, %v441_v20  ;;  %v815_v20 = vrot.slane %v814_v40, 4  ;;  %3698 = vpow2.f32 %v1019_v41  ;;  %v809_v33 = vmax.f32 %v807_v5, %v808_v61  ;;  %v1399_v9 = vrot.slane %v1398_v44, 4 }
 0x180   :  { %v386_v1 = vpop.f32.mrf.mxu1  ;;  %v1405_v28 = vsel %vm452_vm6, %v1361_v56, 0.0  ;;  %3700 = vrcp.f32 %v1098_v55  ;;  %v806_v17 = vmax.f32 %v804_v38, %v805_v11  ;;  %v637_v5 = vrot.slane %v4453_v3, 4 }
 0x181   :  { %v4501_v8 = vadd.f32 %v4155_v37, %v386_v1  ;;  %v1107_v1 = vrot.slane %v1106_v49, 4  ;;  %v816_v46 = vmax.f32 %v814_v40, %v815_v20  ;;  %v1104_v41 = vrot.slane %v1103_v30, 1 }
 0x182   :  { %v535_v58 = vpop.f32.mrf.mxu2  ;;  %v810_v61 = vrot.slane %v809_v33, 2  ;;  %v1393_v55 = vadd.f32 %v1392_v0, %v1391_v43  ;;  %v1400_v11 = vadd.f32 %v1399_v9, %v1398_v44  ;;  %v982_v20 = vsub.f32 %v4446_v36, %v806_v17 }
 0x183   :  { %v4491_v22 = vadd.f32 %v665_v23, %v535_v58  ;;  %5823 = vst [vmem:[#allocation12_spill] sm:$0xff] %v4501_v8  ;;  %v666_v58 = vperm.slane %v636_v7, 0  ;;  %v5760_v29 = vmax.f32 %v4501_v8, 0.0  ;;  %v1406_v7 = vrot.slane %v1405_v28, 4 }
 0x184   :  { %v1108_v38 = vadd.f32 %v1107_v1, %v1106_v49  ;;  %v667_v8 = vperm.slane %v637_v5, 0  ;;  %v811_v43 = vmax.f32 %v809_v33, %v810_v61  ;;  %v1394_v0 = vrot.slane %v1393_v55, 2 }
 0x185   :  { %v821_v23 = vsel %vm452_vm6, %v4491_v22, -inf  ;;  %v4518_v40 = vpop.eup %3698  ;;  %v1401_v9 = vrot.slane %v1400_v11, 2  ;;  %v1021_v17 = vmul.f32 1.442695, %v982_v20 }
 0x186   :  { %v822_v52 = vrot.slane %v821_v23, 4  ;;  %v1109_v1 = vrot.slane %v1108_v38, 2  ;;  %v1113_v36 = vsel %vm452_vm6, %v4518_v40, 0.0 }
 0x187   :  { %v1114_v33 = vrot.slane %v1113_v36, 4 }
 0x188   :  { %v388_v45 = vpop.f32.mrf.mxu1  ;;  %v823_v21 = vmax.f32 %v821_v23, %v822_v52  ;;  %v817_v23 = vrot.slane %v816_v46, 2  ;;  %v3701_v52 = vpop.eup %3700 }
 0x189   :  { %v4506_v10 = vadd.f32 %v4155_v37, %v388_v45  ;;  %v1330_v12 = vmul.f32 %v3701_v52, %v4433_v39  ;;  %v1115_v52 = vadd.f32 %v1114_v33, %v1113_v36 }
 0x18a   :  { %v537_v19 = vpop.f32.mrf.mxu2 }
 0x18b   :  { %5824 = vst [vmem:[#allocation13_spill] sm:$0xff] %v4506_v10  ;;  %v5759_v51 = vmax.f32 %v4506_v10, 0.0  ;;  %v4511_v63 = vadd.f32 %v666_v58, %v537_v19  ;;  %v824_v19 = vrot.slane %v823_v21, 2  ;;  %v1407_v10 = vadd.f32 %v1406_v7, %v1405_v28 }
 0x18c   :  { %v812_v28 = vrot.slane %v811_v43, 1  ;;  %v1110_v7 = vadd.f32 %v1109_v1, %v1108_v38  ;;  %v5826_v38 = vmax.f32 %v4185_v54, 0.0 }
 0x18d   :  { %v442_v56 = vpack.c.bf16 %v5759_v51, %v5760_v29  ;;  %v828_v45 = vsel %vm452_vm6, %v4511_v63, -inf  ;;  %v1105_v51 = vadd.f32 %v1104_v41, %v1103_v30  ;;  %v818_v29 = vmax.f32 %v816_v46, %v817_v23 }
 0x18e   :  { %v829_v13 = vrot.slane %v828_v45, 4  ;;  %v825_v50 = vmax.f32 %v823_v21, %v824_v19  ;;  %v1408_v30 = vrot.slane %v1407_v10, 2  ;;  %v668_v21 = vperm.slane %v638_v57, 0 }
 0x18f   :  { %3546 = vmatmul.msk.bf16.gmra.mxu2 %vm452_vm6, %v442_v56  ;;  %3702 = vrcp.f32 %v1105_v51  ;;  %v819_v46 = vrot.slane %v818_v29, 1  ;;  %v4535_v23 = vadd.f32 %v1394_v0, %v1393_v55  ;;  %v813_v19 = vmax.f32 %v811_v43, %v812_v28 }
 0x190   :  { %v391_v58 = vpop.f32.mrf.mxu1  ;;  %v830_v44 = vmax.f32 %v828_v45, %v829_v13  ;;  %3704 = vpow2.f32 %v1021_v17  ;;  %v826_v51 = vrot.slane %v825_v50, 1  ;;  %v639_v55 = vrot.slane %v4453_v3, 6 }
 0x191   :  { %v4531_v61 = vadd.f32 %v4155_v37, %v391_v58  ;;  %v1362_v58 = vmul.f32 %v1330_v12, %v5826_v38  ;;  %v1409_v0 = vadd.f32 %v1408_v30, %v1407_v10  ;;  %v1396_v54 = vrot.slane %v4535_v23, 1 }
 0x192   :  { %v540_v49 = vpop.f32.mrf.mxu2  ;;  %v831_v56 = vrot.slane %v830_v44, 2  ;;  %v827_v12 = vmax.f32 %v825_v50, %v826_v51  ;;  %v1116_v30 = vrot.slane %v1115_v52, 2  ;;  %v669_v50 = vperm.slane %v639_v55, 0 }
 0x193   :  { %v4528_v5 = vadd.f32 %v667_v8, %v540_v49  ;;  %v4537_v8 = vadd.f32 %v1401_v9, %v1400_v11  ;;  %v1111_v9 = vrot.slane %v1110_v7, 1  ;;  %v1412_v28 = vsel %vm452_vm6, %v1362_v58, 0.0 }
 0x194   :  { %v832_v41 = vmax.f32 %v830_v44, %v831_v56  ;;  %v5765_v44 = vmax.f32 %v4531_v61, 0.0  ;;  %v820_v56 = vmax.f32 %v818_v29, %v819_v46 }
 0x195   :  { %v835_v13 = vsel %vm452_vm6, %v4528_v5, -inf  ;;  %v3703_v11 = vpop.eup %3702  ;;  %v1112_v51 = vadd.f32 %v1111_v9, %v1110_v7 }
 0x196   :  { %v836_v20 = vrot.slane %v835_v13, 4  ;;  %v833_v49 = vrot.slane %v832_v41, 1  ;;  %v4554_v33 = vpop.eup %3704  ;;  %v984_v38 = vsub.f32 %v4476_v48, %v820_v56  ;;  %v640_v48 = vrot.slane %v4453_v3, 7 }
 0x197   :  { %v1120_v58 = vsel %vm452_vm6, %v4554_v33, 0.0  ;;  %3706 = vrcp.f32 %v1112_v51 }
 0x198   :  { %v393_v39 = vpop.f32.mrf.mxu1  ;;  %v837_v17 = vmax.f32 %v835_v13, %v836_v20  ;;  %v983_v13 = vsub.f32 %v4470_v15, %v813_v19  ;;  %v834_v10 = vmax.f32 %v832_v41, %v833_v49  ;;  %v985_v15 = vsub.f32 %v4491_v22, %v827_v12 }
 0x199   :  { %v4540_v45 = vadd.f32 %v4155_v37, %v393_v39  ;;  %v1403_v39 = vrot.slane %v4537_v8, 1  ;;  %v1413_v19 = vrot.slane %v1412_v28, 4  ;;  %v5827_v22 = vmax.f32 %v4204_v60, 0.0 }
 0x19a   :  { %v542_v1 = vpop.f32.mrf.mxu2  ;;  %v838_v36 = vrot.slane %v837_v17, 2  ;;  %v1023_v49 = vmul.f32 1.442695, %v983_v13  ;;  %v670_v3 = vperm.slane %v640_v48, 0 }
 0x19b   :  { %5825 = vst [vmem:[#allocation14_spill] sm:$0xff] %v4540_v45  ;;  %v5764_v57 = vmax.f32 %v4540_v45, 0.0  ;;  %v4547_v37 = vadd.f32 %v668_v21, %v542_v1  ;;  %v1410_v21 = vrot.slane %v1409_v0, 1  ;;  %v1331_v1 = vmul.f32 %v3703_v11, %v4451_v2 }
 0x19c   :  { %v839_v46 = vmax.f32 %v837_v17, %v838_v36  ;;  %v986_v17 = vsub.f32 %v4511_v63, %v834_v10  ;;  %v1121_v2 = vrot.slane %v1120_v58, 4  ;;  %v1025_v11 = vmul.f32 1.442695, %v984_v38 }
 0x19d   :  { %v443_v43 = vpack.c.bf16 %v5764_v57, %v5765_v44  ;;  %v842_v29 = vsel %vm452_vm6, %v4547_v37, -inf  ;;  %v1117_v57 = vadd.f32 %v1116_v30, %v1115_v52  ;;  %v1363_v12 = vmul.f32 %v1331_v1, %v5827_v22  ;;  %v3707_v1 = vpop.eup %3706 }
 0x19e   :  { %v843_v20 = vrot.slane %v842_v29, 4  ;;  %v840_v41 = vrot.slane %v839_v46, 1  ;;  %3708 = vpow2.f32 %v1023_v49  ;;  %v1029_v52 = vmul.f32 1.442695, %v986_v17 }
 0x19f   :  { %3547 = vmatmul.msk.bf16.gmra.mxu2 %vm452_vm6, %v443_v43  ;;  %v1027_v43 = vmul.f32 1.442695, %v985_v15  ;;  %v1118_v30 = vrot.slane %v1117_v57, 1  ;;  %3710 = vpow2.f32 %v1025_v11  ;;  %v1404_v60 = vadd.f32 %v1403_v39, %v4537_v8 }
 0x1a0   :  { %v844_v55 = vmax.f32 %v842_v29, %v843_v20  ;;  %v841_v7 = vmax.f32 %v839_v46, %v840_v41  ;;  %v1397_v20 = vadd.f32 %v1396_v54, %v4535_v23  ;;  %v1414_v38 = vadd.f32 %v1413_v19, %v1412_v28 }
 0x1a1   :  { %3712 = vpow2.f32 %v1027_v43  ;;  %v1411_v15 = vadd.f32 %v1410_v21, %v1409_v0  ;;  %v1419_v41 = vsel %vm452_vm6, %v1363_v12, 0.0  ;;  %v1616_v48 = vpack.c.bf16 %v1404_v60, %v1404_v60 }
 0x1a2   :  { %v545_v36 = vpop.f32.mrf.mxu2  ;;  %v845_v56 = vrot.slane %v844_v55, 2  ;;  %v987_v13 = vsub.f32 %v4528_v5, %v841_v7  ;;  %3714 = vpow2.f32 %v1029_v52  ;;  %v1615_v54 = vpack.c.bf16 %v1397_v20, %v1397_v20 }
 0x1a3   :  { %v4568_v9 = vadd.f32 %v669_v50, %v545_v36  ;;  %v1122_v50 = vadd.f32 %v1121_v2, %v1120_v58  ;;  %v1415_v28 = vrot.slane %v1414_v38, 2  ;;  %v1420_v39 = vrot.slane %v1419_v41, 4 }
 0x1a4   :  { %v846_v10 = vmax.f32 %v844_v55, %v845_v56  ;;  %v1031_v46 = vmul.f32 1.442695, %v987_v13  ;;  %v1119_v55 = vadd.f32 %v1118_v30, %v1117_v57  ;;  %v4581_v23 = vpop.eup %3708  ;;  %v1617_v57 = vpack.c.bf16 %v1411_v15, %v1411_v15 }
 0x1a5   :  { %v849_v63 = vsel %vm452_vm6, %v4568_v9, -inf  ;;  %v1123_v58 = vrot.slane %v1122_v50, 2  ;;  %v4586_v21 = vpop.eup %3710  ;;  %v1332_v22 = vmul.f32 %v3707_v1, %v4487_v26  ;;  %v1708_v13 = vunpack.c.l.b16 %v1615_v54 }
 0x1a6   :  { %v850_v29 = vrot.slane %v849_v63, 4  ;;  %v847_v51 = vrot.slane %v846_v10, 1  ;;  %3716 = vpow2.f32 %v1031_v46  ;;  %v1421_v30 = vadd.f32 %v1420_v39, %v1419_v41 }
 0x1a7   :  { %v4588_v56 = vpop.eup %3712  ;;  %3718 = vrcp.f32 %v1119_v55  ;;  %v1134_v46 = vsel %vm452_vm6, %v4586_v21, 0.0  ;;  %v1709_v26 = vunpack.c.l.b16 %v1616_v48  ;;  %v5828_v1 = vmax.f32 %v4207_v62, 0.0 }
 0x1a8   :  { %v851_v5 = vmax.f32 %v849_v63, %v850_v29  ;;  %v848_v49 = vmax.f32 %v846_v10, %v847_v51  ;;  %v4593_v43 = vpop.eup %3714  ;;  %v1124_v63 = vadd.f32 %v1123_v58, %v1122_v50  ;;  %v1416_v29 = vadd.f32 %v1415_v28, %v1414_v38 }
 0x1a9   :  { %v1141_v51 = vsel %vm452_vm6, %v4588_v56, 0.0  ;;  %v1364_v50 = vmul.f32 %v1332_v22, %v5828_v1  ;;  %v1148_v15 = vsel %vm452_vm6, %v4593_v43, 0.0  ;;  %v1422_v58 = vrot.slane %v1421_v30, 2 }
 0x1aa   :  { %v547_v17 = vpop.f32.mrf.mxu2  ;;  %v852_v36 = vrot.slane %v851_v5, 2  ;;  %v988_v8 = vsub.f32 %v4547_v37, %v848_v49  ;;  %v1127_v37 = vsel %vm452_vm6, %v4581_v23, 0.0  ;;  %v1125_v41 = vrot.slane %v1124_v63, 1 }
 0x1ab   :  { %v4579_v7 = vadd.f32 %v670_v3, %v547_v17  ;;  %v1128_v20 = vrot.slane %v1127_v37, 4  ;;  %v1135_v49 = vrot.slane %v1134_v46, 4  ;;  %v1417_v54 = vrot.slane %v1416_v29, 1 }
 0x1ac   :  { %v853_v19 = vmax.f32 %v851_v5, %v852_v36  ;;  %v1033_v2 = vmul.f32 1.442695, %v988_v8  ;;  %v4595_v10 = vpop.eup %3716  ;;  %v1710_v5 = vunpack.c.l.b16 %v1617_v57  ;;  %v1142_v8 = vrot.slane %v1141_v51, 4 }
 0x1ad   :  { %v856_v0 = vsel %vm452_vm6, %v4579_v7, -inf  ;;  %v1155_v17 = vsel %vm452_vm6, %v4595_v10, 0.0  ;;  %v3719_v36 = vpop.eup %3718  ;;  %v1129_v62 = vadd.f32 %v1128_v20, %v1127_v37  ;;  %v1426_v48 = vsel %vm452_vm6, %v1364_v50, 0.0 }
 0x1ae   :  { %v857_v11 = vrot.slane %v856_v0, 4  ;;  %v854_v12 = vrot.slane %v853_v19, 1  ;;  %3720 = vpow2.f32 %v1033_v2  ;;  %v1126_v2 = vadd.f32 %v1125_v41, %v1124_v63 }
 0x1af   :  { %v1427_v37 = vrot.slane %v1426_v48, 4  ;;  %v1130_v20 = vrot.slane %v1129_v62, 2  ;;  %v1423_v45 = vadd.f32 %v1422_v58, %v1421_v30 }
 0x1b0   :  { %v858_v52 = vmax.f32 %v856_v0, %v857_v11  ;;  %v855_v3 = vmax.f32 %v853_v19, %v854_v12  ;;  %v1149_v19 = vrot.slane %v1148_v15, 4  ;;  %v1136_v11 = vadd.f32 %v1135_v49, %v1134_v46 }
 0x1b1   :  { %v1418_v49 = vadd.f32 %v1417_v54, %v1416_v29  ;;  %v1424_v30 = vrot.slane %v1423_v45, 1 }
 0x1b2   :  { %v859_v60 = vrot.slane %v858_v52, 2  ;;  %v989_v38 = vsub.f32 %v4568_v9, %v855_v3  ;;  %v1156_v9 = vrot.slane %v1155_v17, 4  ;;  %v1143_v3 = vadd.f32 %v1142_v8, %v1141_v51 }
 0x1b3   :  { %v1150_v1 = vadd.f32 %v1149_v19, %v1148_v15  ;;  %v1137_v63 = vrot.slane %v1136_v11, 2  ;;  %v1618_v58 = vpack.c.bf16 %v1418_v49, %v1418_v49 }
 0x1b4   :  { %v860_v55 = vmax.f32 %v858_v52, %v859_v60  ;;  %v1035_v28 = vmul.f32 1.442695, %v989_v38  ;;  %v4608_v39 = vpop.eup %3720  ;;  %v1333_v52 = vmul.f32 %v3719_v36, %v4518_v40  ;;  %v1741_v60 = vsel %vm1740_vm9, %v1709_v26, %v1708_v13 }
 0x1b5   :  { %v1162_v57 = vsel %vm452_vm6, %v4608_v39, 0.0  ;;  %v1157_v38 = vadd.f32 %v1156_v9, %v1155_v17  ;;  %v1743_v44 = vsel %vm1742_vm10, %v1710_v5, %v1741_v60  ;;  %v5829_v40 = vmax.f32 %v4226_v4, 0.0 }
 0x1b6   :  { %v861_v0 = vrot.slane %v860_v55, 1  ;;  %3722 = vpow2.f32 %v1035_v28  ;;  %v1163_v22 = vrot.slane %v1162_v57, 4  ;;  %v1144_v13 = vrot.slane %v1143_v3, 2 }
 0x1b7   :  { %3724 = vrcp.f32 %v1126_v2  ;;  %v1365_v51 = vmul.f32 %v1333_v52, %v5829_v40  ;;  %v1131_v36 = vadd.f32 %v1130_v20, %v1129_v62  ;;  %v1151_v15 = vrot.slane %v1150_v1, 2  ;;  %v4624_v52 = vpop.f32.mrf.mxu2 }
 0x1b8   :  { %v862_v12 = vmax.f32 %v860_v55, %v861_v0  ;;  %v1164_v46 = vadd.f32 %v1163_v22, %v1162_v57  ;;  %v1428_v55 = vadd.f32 %v1427_v37, %v1426_v48  ;;  %v1158_v8 = vrot.slane %v1157_v38, 2 }
 0x1b9   :  { %v1138_v5 = vadd.f32 %v1137_v63, %v1136_v11  ;;  %v1433_v28 = vsel %vm452_vm6, %v1365_v51, 0.0  ;;  %v1145_v29 = vadd.f32 %v1144_v13, %v1143_v3  ;;  %v1132_v0 = vrot.slane %v1131_v36, 1 }
 0x1ba   :  { %v990_v50 = vsub.f32 %v4579_v7, %v862_v12  ;;  %v1165_v17 = vrot.slane %v1164_v46, 2  ;;  %v1429_v19 = vrot.slane %v1428_v55, 2  ;;  %v1152_v9 = vadd.f32 %v1151_v15, %v1150_v1 }
 0x1bb   :  { %v1159_v48 = vadd.f32 %v1158_v8, %v1157_v38  ;;  %v1425_v57 = vadd.f32 %v1424_v30, %v1423_v45  ;;  %v1434_v2 = vrot.slane %v1433_v28, 4  ;;  %v1139_v22 = vrot.slane %v1138_v5, 1 }
 0x1bc   :  { %v4617_v41 = vpop.eup %3722  ;;  %v1037_v26 = vmul.f32 1.442695, %v990_v50  ;;  %v1166_v12 = vadd.f32 %v1165_v17, %v1164_v46  ;;  %v1711_v11 = vunpack.c.l.b16 %v1618_v58  ;;  %v1146_v20 = vrot.slane %v1145_v29, 1 }
 0x1bd   :  { %v1169_v7 = vsel %vm452_vm6, %v4617_v41, 0.0  ;;  %v3725_v4 = vpop.eup %3724  ;;  %v1430_v50 = vadd.f32 %v1429_v19, %v1428_v55  ;;  %v1133_v63 = vadd.f32 %v1132_v0, %v1131_v36  ;;  %v1153_v49 = vrot.slane %v1152_v9, 1 }
 0x1be   :  { %3726 = vpow2.f32 %v1037_v26  ;;  %v1170_v54 = vrot.slane %v1169_v7, 4  ;;  %v1334_v37 = vmul.f32 %v3725_v4, %v4554_v33  ;;  %v1160_v38 = vrot.slane %v1159_v48, 1 }
 0x1bf   :  { %v1619_v46 = vpack.c.bf16 %v1425_v57, %v1425_v57  ;;  %v1435_v51 = vadd.f32 %v1434_v2, %v1433_v28  ;;  %v1140_v13 = vadd.f32 %v1139_v22, %v1138_v5  ;;  %v1167_v26 = vrot.slane %v1166_v12, 1 }
 0x1c0   :  { %v1171_v62 = vadd.f32 %v1170_v54, %v1169_v7  ;;  %v5830_v15 = vmax.f32 %v4229_v6, 0.0  ;;  %v1147_v33 = vadd.f32 %v1146_v20, %v1145_v29  ;;  %v1154_v55 = vadd.f32 %v1153_v49, %v1152_v9  ;;  %v4635_v29 = vpop.f32.mrf.mxu2 }
 0x1c1   :  { %v1431_v36 = vrot.slane %v1430_v50, 1  ;;  %v1745_v17 = vsel %vm1744_vm11, %v1711_v11, %v1743_v44  ;;  %3728 = vrcp.f32 %v1133_v63  ;;  %v1161_v58 = vadd.f32 %v1160_v38, %v1159_v48  ;;  %v3652_v48 = vld [vmem:[%s5711_s8] sm:$0xff] }
 0x1c2   :  { %v1172_v3 = vrot.slane %v1171_v62, 2  ;;  %v1366_v8 = vmul.f32 %v1334_v37, %v5830_v15  ;;  %v1436_v54 = vrot.slane %v1435_v51, 2  ;;  %3730 = vrcp.f32 %v1140_v13  ;;  %1796 = vmatpush.bf16.msrb.mxu3 %v3652_v48 }
 0x1c3   :  { %v1168_v4 = vadd.f32 %v1167_v26, %v1166_v12  ;;  %3732 = vrcp.f32 %v1147_v33  ;;  %v1712_v0 = vunpack.c.l.b16 %v1619_v46  ;;  %v5831_v33 = vmax.f32 %v4248_v18, 0.0 }
 0x1c4   :  { %v4626_v60 = vpop.eup %3726  ;;  %v1173_v45 = vadd.f32 %v1172_v3, %v1171_v62  ;;  %v1440_v28 = vsel %vm452_vm6, %v1366_v8, 0.0  ;;  %3734 = vrcp.f32 %v1154_v55  ;;  %v1432_v62 = vadd.f32 %v1431_v36, %v1430_v50 }
 0x1c5   :  { %v1176_v1 = vsel %vm452_vm6, %v4626_v60, 0.0  ;;  %3736 = vrcp.f32 %v1161_v58  ;;  %v1437_v9 = vadd.f32 %v1436_v54, %v1435_v51  ;;  %v1441_v2 = vrot.slane %v1440_v28, 4 }
 0x1c6   :  { %v1177_v40 = vrot.slane %v1176_v1, 4  ;;  %v1174_v7 = vrot.slane %v1173_v45, 1  ;;  %3738 = vrcp.f32 %v1168_v4  ;;  %v1747_v22 = vsel %vm1746_vm12, %v1712_v0, %v1745_v17 }
 0x1c7   :  { %v3729_v57 = vpop.eup %3728  ;;  %v1620_v37 = vpack.c.bf16 %v1432_v62, %v1432_v62  ;;  %v1438_v50 = vrot.slane %v1437_v9, 1  ;;  %v1442_v49 = vadd.f32 %v1441_v2, %v1440_v28  ;;  %v5833_v17 = vmax.f32 %v4245_v16, 0.0 }
 0x1c8   :  { %v1178_v30 = vadd.f32 %v1177_v40, %v1176_v1  ;;  %v1175_v5 = vadd.f32 %v1174_v7, %v1173_v45  ;;  %v3731_v12 = vpop.eup %3730  ;;  %v1335_v51 = vmul.f32 %v3729_v57, %v4581_v23  ;;  %v4646_v15 = vpop.f32.mrf.mxu2  ;;  %v5834_v58 = vmax.f32 %v4267_v27, 0.0 }
 0x1c9   :  { %v3733_v20 = vpop.eup %3732  ;;  %v1336_v1 = vmul.f32 %v3731_v12, %v4586_v21  ;;  %v1713_v40 = vunpack.c.l.b16 %v1620_v37  ;;  %v1439_v8 = vadd.f32 %v1438_v50, %v1437_v9  ;;  %v5835_v4 = vmax.f32 %v4283_v32, 0.0 }
 0x1ca   :  { %v1179_v19 = vrot.slane %v1178_v30, 2  ;;  %3740 = vrcp.f32 %v1175_v5  ;;  %v3735_v3 = vpop.eup %3734  ;;  %v1337_v45 = vmul.f32 %v3733_v20, %v4588_v56  ;;  %v5832_v56 = vmax.f32 %v4264_v25, 0.0 }
 0x1cb   :  { %v3737_v63 = vpop.eup %3736  ;;  %v1338_v13 = vmul.f32 %v3735_v3, %v4593_v43  ;;  %v1368_v7 = vmul.f32 %v1336_v1, %v5831_v33  ;;  %v1749_v43 = vsel %vm1748_vm13, %v1713_v40, %v1747_v22  ;;  %v5836_v25 = vmax.f32 %v4286_v35, 0.0 }
 0x1cc   :  { %v1180_v6 = vadd.f32 %v1179_v19, %v1178_v30  ;;  %v3739_v38 = vpop.eup %3738  ;;  %v1339_v26 = vmul.f32 %v3737_v63, %v4595_v10  ;;  %v1443_v30 = vrot.slane %v1442_v49, 2  ;;  %v1369_v36 = vmul.f32 %v1337_v45, %v5832_v56 }
 0x1cd   :  { %v1340_v21 = vmul.f32 %v3739_v38, %v4608_v39  ;;  %v1367_v10 = vmul.f32 %v1335_v51, %v5833_v17  ;;  %v1370_v54 = vmul.f32 %v1338_v13, %v5834_v58  ;;  %v1621_v19 = vpack.c.bf16 %v1439_v8, %v1439_v8 }
 0x1ce   :  { %v1181_v44 = vrot.slane %v1180_v6, 1  ;;  %v1371_v39 = vmul.f32 %v1339_v26, %v5835_v4  ;;  %v1454_v28 = vsel %vm452_vm6, %v1368_v7, 0.0  ;;  %v1461_v0 = vsel %vm452_vm6, %v1369_v36, 0.0 }
 0x1cf   :  { %v1372_v5 = vmul.f32 %v1340_v21, %v5836_v25  ;;  %v5837_v16 = vmax.f32 %v4302_v42, 0.0  ;;  %v1447_v27 = vsel %vm452_vm6, %v1367_v10, 0.0  ;;  %v1468_v62 = vsel %vm452_vm6, %v1370_v54, 0.0 }
 0x1d0   :  { %v1182_v11 = vadd.f32 %v1181_v44, %v1180_v6  ;;  %v3741_v46 = vpop.eup %3740  ;;  %v1455_v9 = vrot.slane %v1454_v28, 4  ;;  %v1475_v44 = vsel %vm452_vm6, %v1371_v39, 0.0  ;;  %v1714_v48 = vunpack.c.l.b16 %v1621_v19 }
 0x1d1   :  { %v1341_v23 = vmul.f32 %v3741_v46, %v4617_v41  ;;  %v1444_v41 = vadd.f32 %v1443_v30, %v1442_v49  ;;  %v1462_v57 = vrot.slane %v1461_v0, 4  ;;  %v1482_v35 = vsel %vm452_vm6, %v1372_v5, 0.0 }
 0x1d2   :  { %3742 = vrcp.f32 %v1182_v11  ;;  %v1448_v22 = vrot.slane %v1447_v27, 4  ;;  %v1469_v12 = vrot.slane %v1468_v62, 4  ;;  %v4675_v11 = vpop.f32.mrf.mxu2  ;;  %v1476_v37 = vrot.slane %v1475_v44, 4 }
 0x1d3   :  { %v1373_v6 = vmul.f32 %v1341_v23, %v5837_v16  ;;  %v1445_v2 = vrot.slane %v1444_v41, 1  ;;  %v1483_v3 = vrot.slane %v1482_v35, 4  ;;  %v1751_v50 = vsel %vm1750_vm14, %v1714_v48, %v1749_v43 }
 0x1d4   :  { %v1463_v63 = vadd.f32 %v1462_v57, %v1461_v0  ;;  %v1449_v38 = vadd.f32 %v1448_v22, %v1447_v27  ;;  %v1470_v45 = vadd.f32 %v1469_v12, %v1468_v62  ;;  %v1477_v46 = vadd.f32 %v1476_v37, %v1475_v44 }
 0x1d5   :  { %v1489_v42 = vsel %vm452_vm6, %v1373_v6, 0.0  ;;  %v1446_v1 = vadd.f32 %v1445_v2, %v1444_v41  ;;  %v1484_v13 = vadd.f32 %v1483_v3, %v1482_v35 }
 0x1d6   :  { %v1490_v49 = vrot.slane %v1489_v42, 4  ;;  %v1464_v26 = vrot.slane %v1463_v63, 2  ;;  %v1450_v7 = vrot.slane %v1449_v38, 2  ;;  %v1471_v21 = vrot.slane %v1470_v45, 2 }
 0x1d7   :  { %v1622_v33 = vpack.c.bf16 %v1446_v1, %v1446_v1  ;;  %v1485_v36 = vrot.slane %v1484_v13, 2 }
 0x1d8   :  { %v3743_v55 = vpop.eup %3742  ;;  %v1491_v8 = vadd.f32 %v1490_v49, %v1489_v42  ;;  %v1465_v43 = vadd.f32 %v1464_v26, %v1463_v63  ;;  %v1451_v58 = vadd.f32 %v1450_v7, %v1449_v38  ;;  %v1472_v54 = vadd.f32 %v1471_v21, %v1470_v45 }
 0x1d9   :  { %v1342_v18 = vmul.f32 %v3743_v55, %v4626_v60  ;;  %v5838_v60 = vmax.f32 %v4305_v47, 0.0  ;;  %v1456_v47 = vadd.f32 %v1455_v9, %v1454_v28  ;;  %v1478_v55 = vrot.slane %v1477_v46, 2 }
 0x1da   :  { %v4679_v23 = vpop.f32.mrf.mxu2  ;;  %v1492_v17 = vrot.slane %v1491_v8, 2  ;;  %v1715_v10 = vunpack.c.l.b16 %v1622_v33  ;;  %v1486_v19 = vadd.f32 %v1485_v36, %v1484_v13  ;;  %v1466_v28 = vrot.slane %v1465_v43, 1 }
 0x1db   :  { %v1374_v32 = vmul.f32 %v1342_v18, %v5838_v60  ;;  %v1457_v51 = vrot.slane %v1456_v47, 2  ;;  %v1479_v4 = vadd.f32 %v1478_v55, %v1477_v46  ;;  %v1452_v41 = vrot.slane %v1451_v58, 1 }
 0x1dc   :  { %v1493_v25 = vadd.f32 %v1492_v17, %v1491_v8  ;;  %v1753_v5 = vsel %vm1752_vm15, %v1715_v10, %v1751_v50  ;;  %v1473_v0 = vrot.slane %v1472_v54, 1  ;;  %v1487_v62 = vrot.slane %v1486_v19, 1 }
 0x1dd   :  { %v1496_v20 = vsel %vm452_vm6, %v1374_v32, 0.0  ;;  %v1458_v56 = vadd.f32 %v1457_v51, %v1456_v47  ;;  %v1480_v6 = vrot.slane %v1479_v4, 1  ;;  %v1467_v60 = vadd.f32 %v1466_v28, %v1465_v43  ;;  %v618_v43 = vpop.f32.mrf.mxu3 }
 0x1de   :  { %v1497_v40 = vrot.slane %v1496_v20, 4  ;;  %v1494_v32 = vrot.slane %v1493_v25, 1  ;;  %v1453_v9 = vadd.f32 %v1452_v41, %v1451_v58  ;;  %v1474_v44 = vadd.f32 %v1473_v0, %v1472_v54 }
 0x1df   :  { %v1459_v39 = vrot.slane %v1458_v56, 1  ;;  %v1481_v35 = vadd.f32 %v1480_v6, %v1479_v4  ;;  %v1488_v22 = vadd.f32 %v1487_v62, %v1486_v19  ;;  %v1625_v12 = vpack.c.bf16 %v1467_v60, %v1467_v60 }
 0x1e0   :  { %v1498_v30 = vadd.f32 %v1497_v40, %v1496_v20  ;;  %v1495_v42 = vadd.f32 %v1494_v32, %v1493_v25  ;;  %v1623_v37 = vpack.c.bf16 %v1453_v9, %v1453_v9  ;;  %v1626_v20 = vpack.c.bf16 %v1474_v44, %v1474_v44 }
 0x1e1   :  { %v1460_v27 = vadd.f32 %v1459_v39, %v1458_v56  ;;  %v1627_v3 = vpack.c.bf16 %v1481_v35, %v1481_v35  ;;  %v1628_v63 = vpack.c.bf16 %v1488_v22, %v1488_v22  ;;  %v1718_v49 = vunpack.c.l.b16 %v1625_v12 }
 0x1e2   :  { %v1499_v18 = vrot.slane %v1498_v30, 2  ;;  %v4682_v48 = vpop.f32.mrf.mxu2  ;;  %v1629_v1 = vpack.c.bf16 %v1495_v42, %v1495_v42  ;;  %v1716_v38 = vunpack.c.l.b16 %v1623_v37  ;;  %v1719_v45 = vunpack.c.l.b16 %v1626_v20 }
 0x1e3   :  { %v1624_v2 = vpack.c.bf16 %v1460_v27, %v1460_v27  ;;  %v1720_v46 = vunpack.c.l.b16 %v1627_v3  ;;  %v1721_v13 = vunpack.c.l.b16 %v1628_v63  ;;  %v671_v10 = vperm.slane %v618_v43, 0 }
 0x1e4   :  { %v1500_v16 = vadd.f32 %v1499_v18, %v1498_v30  ;;  %v1722_v8 = vunpack.c.l.b16 %v1629_v1  ;;  %v641_v18 = vrot.slane %v618_v43, 1  ;;  %v642_v19 = vrot.slane %v618_v43, 2 }
 0x1e5   :  { %v1717_v50 = vunpack.c.l.b16 %v1624_v2  ;;  %v735_v54 = vadd.f32 %v671_v10, %v4624_v52  ;;  %v643_v27 = vrot.slane %v618_v43, 3  ;;  %v644_v32 = vrot.slane %v618_v43, 4 }
 0x1e6   :  { %v1501_v57 = vrot.slane %v1500_v16, 1  ;;  %v672_v39 = vperm.slane %v641_v18, 0  ;;  %v673_v0 = vperm.slane %v642_v19, 0  ;;  %v645_v22 = vrot.slane %v618_v43, 5 }
 0x1e7   :  { %v1754_v26 = vsel %vm1740_vm9, %v1717_v50, %v1716_v38  ;;  %v863_v4 = vsel %vm452_vm6, %v735_v54, -inf  ;;  %v674_v44 = vperm.slane %v643_v27, 0  ;;  %v675_v2 = vperm.slane %v644_v32, 0 }
 0x1e8   :  { %v1502_v47 = vadd.f32 %v1501_v57, %v1500_v16  ;;  %v1755_v33 = vsel %vm1742_vm10, %v1718_v49, %v1754_v26  ;;  %v4695_v28 = vadd.f32 %v672_v39, %v4635_v29  ;;  %v864_v25 = vrot.slane %v863_v4, 4 }
 0x1e9   :  { %v1756_v21 = vsel %vm1744_vm11, %v1719_v45, %v1755_v33  ;;  %v4702_v6 = vadd.f32 %v673_v0, %v4646_v15  ;;  %v4709_v12 = vadd.f32 %v674_v44, %v4675_v11  ;;  %v4712_v42 = vadd.f32 %v675_v2, %v4679_v23 }
 0x1ea   :  { %v1630_v40 = vpack.c.bf16 %v1502_v47, %v1502_v47  ;;  %v565_v51 = vpop.f32.mrf.mxu2  ;;  %v1757_v30 = vsel %vm1746_vm12, %v1720_v46, %v1756_v21  ;;  %v865_v16 = vmax.f32 %v863_v4, %v864_v25  ;;  %v676_v47 = vperm.slane %v645_v22, 0 }
 0x1eb   :  { %v1758_v55 = vsel %vm1748_vm13, %v1721_v13, %v1757_v30  ;;  %v877_v60 = vsel %vm452_vm6, %v4702_v6, -inf  ;;  %v884_v3 = vsel %vm452_vm6, %v4709_v12, -inf  ;;  %v646_v50 = vrot.slane %v618_v43, 6 }
 0x1ec   :  { %v1723_v7 = vunpack.c.l.b16 %v1630_v40  ;;  %v1759_v56 = vsel %vm1750_vm14, %v1722_v8, %v1758_v55  ;;  %v866_v62 = vrot.slane %v865_v16, 2  ;;  %v878_v9 = vrot.slane %v877_v60, 4 }
 0x1ed   :  { %v891_v49 = vsel %vm452_vm6, %v4712_v42, -inf  ;;  %v4719_v1 = vadd.f32 %v676_v47, %v4682_v48  ;;  %v885_v45 = vrot.slane %v884_v3, 4  ;;  %v677_v23 = vperm.slane %v646_v50, 0 }
 0x1ee   :  { %v1760_v36 = vsel %vm1752_vm15, %v1723_v7, %v1759_v56  ;;  %v867_v35 = vmax.f32 %v865_v16, %v866_v62  ;;  %v879_v37 = vmax.f32 %v877_v60, %v878_v9  ;;  %v892_v40 = vrot.slane %v891_v49, 4 }
 0x1ef   :  { %v1775_v17 = vpack.c.b16 %v1760_v36, %v1753_v5  ;;  %v870_v5 = vsel %vm452_vm6, %v4695_v28, -inf  ;;  %v898_v26 = vsel %vm452_vm6, %v4719_v1, -inf  ;;  %v647_v8 = vrot.slane %v618_v43, 7  ;;  %v4729_v43 = vpop.f32.mrf.mxu3 }
 0x1f0   :  { %v871_v52 = vrot.slane %v870_v5, 4  ;;  %v868_v20 = vrot.slane %v867_v35, 1  ;;  %v880_v11 = vrot.slane %v879_v37, 2  ;;  %v4723_v7 = vadd.f32 %v677_v23, %v565_v51 }
 0x1f1   :  { %3564 = vmatmul.msk.bf16.vlgmr.msrb.gmra.mxu3 %vm452_vm6, %v1775_v17  ;;  %v886_v30 = vmax.f32 %v884_v3, %v885_v45  ;;  %v893_v55 = vmax.f32 %v891_v49, %v892_v40  ;;  %v899_v56 = vrot.slane %v898_v26, 4  ;;  %v678_v36 = vperm.slane %v647_v8, 0 }
 0x1f2   :  { %v567_v58 = vpop.f32.mrf.mxu2  ;;  %v872_v29 = vmax.f32 %v870_v5, %v871_v52  ;;  %v869_v38 = vmax.f32 %v867_v35, %v868_v20  ;;  %v881_v33 = vmax.f32 %v879_v37, %v880_v11  ;;  %v905_v10 = vsel %vm452_vm6, %v4723_v7, -inf }
 0x1f3   :  { %v887_v4 = vrot.slane %v886_v30, 2  ;;  %v4727_v39 = vadd.f32 %v678_v36, %v567_v58  ;;  %v894_v19 = vrot.slane %v893_v55, 2  ;;  %v900_v25 = vmax.f32 %v898_v26, %v899_v56 }
 0x1f4   :  { %v873_v15 = vrot.slane %v872_v29, 2  ;;  %v991_v21 = vsub.f32 %v735_v54, %v869_v38  ;;  %v882_v17 = vrot.slane %v881_v33, 1  ;;  %v906_v54 = vrot.slane %v905_v10, 4 }
 0x1f5   :  { %v888_v16 = vmax.f32 %v886_v30, %v887_v4  ;;  %v912_v52 = vsel %vm452_vm6, %v4727_v39, -inf  ;;  %v895_v27 = vmax.f32 %v893_v55, %v894_v19  ;;  %v901_v62 = vrot.slane %v900_v25, 2 }
 0x1f6   :  { %v874_v63 = vmax.f32 %v872_v29, %v873_v15  ;;  %v1039_v18 = vmul.f32 1.442695, %v991_v21  ;;  %v883_v0 = vmax.f32 %v881_v33, %v882_v17  ;;  %v648_v60 = vrot.slane %v4729_v43, 1 }
 0x1f7   :  { %v907_v32 = vmax.f32 %v905_v10, %v906_v54  ;;  %v913_v9 = vrot.slane %v912_v52, 4  ;;  %v889_v44 = vrot.slane %v888_v16, 1  ;;  %v649_v35 = vrot.slane %v4729_v43, 2 }
 0x1f8   :  { %v875_v13 = vrot.slane %v874_v63, 1  ;;  %3744 = vpow2.f32 %v1039_v18  ;;  %v993_v29 = vsub.f32 %v4702_v6, %v883_v0  ;;  %v896_v2 = vrot.slane %v895_v27, 1 }
 0x1f9   :  { %v902_v22 = vmax.f32 %v900_v25, %v901_v62  ;;  %v680_v15 = vperm.slane %v648_v60, 0  ;;  %v650_v37 = vrot.slane %v4729_v43, 3  ;;  %v908_v47 = vrot.slane %v907_v32, 2 }
 0x1fa   :  { %v4697_v41 = vpop.f32.mrf.mxu2  ;;  %v876_v48 = vmax.f32 %v874_v63, %v875_v13  ;;  %v651_v6 = vrot.slane %v4729_v43, 4  ;;  %v1043_v50 = vmul.f32 1.442695, %v993_v29  ;;  %v914_v63 = vmax.f32 %v912_v52, %v913_v9 }
 0x1fb   :  { %v890_v49 = vmax.f32 %v888_v16, %v889_v44  ;;  %v681_v38 = vperm.slane %v649_v35, 0  ;;  %v897_v40 = vmax.f32 %v895_v27, %v896_v2  ;;  %v903_v23 = vrot.slane %v902_v22, 1 }
 0x1fc   :  { %v992_v51 = vsub.f32 %v4695_v28, %v876_v48  ;;  %v679_v28 = vperm.slane %v4729_v43, 0  ;;  %v682_v13 = vperm.slane %v650_v37, 0  ;;  %v909_v8 = vmax.f32 %v907_v32, %v908_v47 }
 0x1fd   :  { %v683_v21 = vperm.slane %v651_v6, 0  ;;  %v915_v30 = vrot.slane %v914_v63, 2  ;;  %v994_v48 = vsub.f32 %v4709_v12, %v890_v49  ;;  %v995_v10 = vsub.f32 %v4712_v42, %v897_v40 }
 0x1fe   :  { %v1041_v58 = vmul.f32 1.442695, %v992_v51  ;;  %v4739_v20 = vpop.eup %3744  ;;  %v4742_v3 = vadd.f32 %v679_v28, %v4697_v41  ;;  %v904_v18 = vmax.f32 %v902_v22, %v903_v23  ;;  %v910_v4 = vrot.slane %v909_v8, 1 }
 0x1ff   :  { %v1183_v45 = vsel %vm452_vm6, %v4739_v20, 0.0  ;;  %v916_v51 = vmax.f32 %v914_v63, %v915_v30  ;;  %v1047_v52 = vmul.f32 1.442695, %v995_v10 }
 0x200   :  { %3746 = vpow2.f32 %v1041_v58  ;;  %v919_v41 = vsel %vm452_vm6, %v4742_v3, -inf  ;;  %v1184_v56 = vrot.slane %v1183_v45, 4  ;;  %v996_v27 = vsub.f32 %v4719_v1, %v904_v18 }
 0x201   :  { %3748 = vpow2.f32 %v1043_v50  ;;  %v911_v32 = vmax.f32 %v909_v8, %v910_v4  ;;  %v917_v9 = vrot.slane %v916_v51, 1 }
 0x202   :  { %v4706_v57 = vpop.f32.mrf.mxu2  ;;  %v1185_v0 = vadd.f32 %v1184_v56, %v1183_v45  ;;  %v1049_v22 = vmul.f32 1.442695, %v996_v27 }
 0x203   :  { %v4746_v11 = vadd.f32 %v680_v15, %v4706_v57  ;;  %v997_v1 = vsub.f32 %v4723_v7, %v911_v32  ;;  %v918_v50 = vmax.f32 %v916_v51, %v917_v9 }
 0x204   :  { %v1186_v35 = vrot.slane %v1185_v0, 2 }
 0x205   :  { %v926_v36 = vsel %vm452_vm6, %v4746_v11, -inf  ;;  %v998_v7 = vsub.f32 %v4727_v39, %v918_v50 }
 0x206   :  { %v4756_v57 = vpop.eup %3746  ;;  %v927_v54 = vrot.slane %v926_v36, 4  ;;  %v1187_v45 = vadd.f32 %v1186_v35, %v1185_v0 }
 0x207   :  { %v1190_v25 = vsel %vm452_vm6, %v4756_v57, 0.0  ;;  %v4772_v42 = vpop.eup %3748  ;;  %v1053_v39 = vmul.f32 1.442695, %v998_v7 }
 0x208   :  { %v1191_v58 = vrot.slane %v1190_v25, 4  ;;  %v928_v44 = vmax.f32 %v926_v36, %v927_v54  ;;  %v1197_v2 = vsel %vm452_vm6, %v4772_v42, 0.0  ;;  %v1188_v18 = vrot.slane %v1187_v45, 1 }
 0x209   :  { %v1198_v40 = vrot.slane %v1197_v2, 4 }
 0x20a   :  { %v575_v46 = vpop.f32.mrf.mxu2  ;;  %v1192_v47 = vadd.f32 %v1191_v58, %v1190_v25  ;;  %v929_v63 = vrot.slane %v928_v44, 2 }
 0x20b   :  { %v4752_v33 = vadd.f32 %v681_v38, %v575_v46  ;;  %v920_v46 = vrot.slane %v919_v41, 4  ;;  %v652_v38 = vrot.slane %v4729_v43, 5 }
 0x20c   :  { %v1193_v8 = vrot.slane %v1192_v47, 2 }
 0x20d   :  { %v933_v19 = vsel %vm452_vm6, %v4752_v33, -inf  ;;  %v921_v62 = vmax.f32 %v919_v41, %v920_v46  ;;  %v1051_v41 = vmul.f32 1.442695, %v997_v1  ;;  %v684_v10 = vperm.slane %v652_v38, 0 }
 0x20e   :  { %v934_v60 = vrot.slane %v933_v19, 4  ;;  %v1199_v46 = vadd.f32 %v1198_v40, %v1197_v2  ;;  %v1194_v54 = vadd.f32 %v1193_v8, %v1192_v47 }
 0x20f   :  { %v922_v15 = vrot.slane %v921_v62, 2 }
 0x210   :  { %v935_v37 = vmax.f32 %v933_v19, %v934_v60  ;;  %v1200_v60 = vrot.slane %v1199_v46, 2 }
 0x211   :  { %v923_v23 = vmax.f32 %v921_v62, %v922_v15  ;;  %v1189_v62 = vadd.f32 %v1188_v18, %v1187_v45 }
 0x212   :  { %v577_v5 = vpop.f32.mrf.mxu2  ;;  %v1201_v1 = vadd.f32 %v1200_v60, %v1199_v46 }
 0x213   :  { %v4754_v55 = vadd.f32 %v682_v13, %v577_v5  ;;  %v1045_v5 = vmul.f32 1.442695, %v994_v48  ;;  %v936_v13 = vrot.slane %v935_v37, 2  ;;  %v930_v48 = vmax.f32 %v928_v44, %v929_v63 }
 0x214   :  { %v924_v19 = vrot.slane %v923_v23, 1 }
 0x215   :  { %v940_v12 = vsel %vm452_vm6, %v4754_v55, -inf  ;;  %3750 = vpow2.f32 %v1045_v5  ;;  %v937_v25 = vmax.f32 %v935_v37, %v936_v13 }
 0x216   :  { %v941_v29 = vrot.slane %v940_v12, 4  ;;  %3752 = vpow2.f32 %v1047_v52  ;;  %v925_v9 = vmax.f32 %v923_v23, %v924_v19 }
 0x217   :  { %3754 = vpow2.f32 %v1049_v22  ;;  %v938_v44 = vrot.slane %v937_v25, 1  ;;  %v1195_v22 = vrot.slane %v1194_v54, 1 }
 0x218   :  { %v942_v6 = vmax.f32 %v940_v12, %v941_v29  ;;  %3756 = vpow2.f32 %v1051_v41  ;;  %v999_v38 = vsub.f32 %v4742_v3, %v925_v9 }
 0x219   :  { %3758 = vpow2.f32 %v1053_v39  ;;  %v939_v45 = vmax.f32 %v937_v25, %v938_v44  ;;  %v1196_v13 = vadd.f32 %v1195_v22, %v1194_v54 }
 0x21a   :  { %v580_v26 = vpop.f32.mrf.mxu2  ;;  %3760 = vrcp.f32 %v1189_v62  ;;  %v1055_v46 = vmul.f32 1.442695, %v999_v38 }
 0x21b   :  { %v4761_v17 = vadd.f32 %v683_v21, %v580_v26  ;;  %v4779_v26 = vpop.eup %3750  ;;  %v943_v21 = vrot.slane %v942_v6, 2  ;;  %v1001_v3 = vsub.f32 %v4752_v33, %v939_v45  ;;  %3762 = vrcp.f32 %v1196_v13 }
 0x21c   :  { %v4781_v56 = vpop.eup %3752  ;;  %v1204_v4 = vsel %vm452_vm6, %v4779_v26, 0.0  ;;  %3764 = vpow2.f32 %v1055_v46 }
 0x21d   :  { %v947_v16 = vsel %vm452_vm6, %v4761_v17, -inf  ;;  %v1211_v12 = vsel %vm452_vm6, %v4781_v56, 0.0  ;;  %v944_v0 = vmax.f32 %v942_v6, %v943_v21  ;;  %v4790_v5 = vpop.eup %3754  ;;  %v1205_v58 = vrot.slane %v1204_v4, 4 }
 0x21e   :  { %v948_v28 = vrot.slane %v947_v16, 4  ;;  %v1212_v29 = vrot.slane %v1211_v12, 4  ;;  %v4796_v47 = vpop.eup %3756  ;;  %v1059_v33 = vmul.f32 1.442695, %v1001_v3 }
 0x21f   :  { %v945_v35 = vrot.slane %v944_v0, 1  ;;  %v1206_v6 = vadd.f32 %v1205_v58, %v1204_v4  ;;  %v1225_v8 = vsel %vm452_vm6, %v4796_v47, 0.0 }
 0x220   :  { %v949_v49 = vmax.f32 %v947_v16, %v948_v28  ;;  %v931_v16 = vrot.slane %v930_v48, 1  ;;  %v1218_v28 = vsel %vm452_vm6, %v4790_v5, 0.0  ;;  %v1213_v63 = vadd.f32 %v1212_v29, %v1211_v12 }
 0x221   :  { %v946_v40 = vmax.f32 %v944_v0, %v945_v35  ;;  %v1207_v7 = vrot.slane %v1206_v6, 2  ;;  %v1226_v19 = vrot.slane %v1225_v8, 4 }
 0x222   :  { %v582_v30 = vpop.f32.mrf.mxu2  ;;  %v950_v36 = vrot.slane %v949_v49, 2  ;;  %v932_v15 = vmax.f32 %v930_v48, %v931_v16 }
 0x223   :  { %v4786_v51 = vadd.f32 %v684_v10, %v582_v30  ;;  %v1202_v30 = vrot.slane %v1201_v1, 1  ;;  %v1214_v10 = vrot.slane %v1213_v63, 2  ;;  %v1002_v25 = vsub.f32 %v4754_v55, %v946_v40 }
 0x224   :  { %v951_v52 = vmax.f32 %v949_v49, %v950_v36  ;;  %v1219_v49 = vrot.slane %v1218_v28, 4  ;;  %v1000_v41 = vsub.f32 %v4746_v11, %v932_v15  ;;  %v4802_v36 = vpop.eup %3758  ;;  %v1208_v39 = vadd.f32 %v1207_v7, %v1206_v6 }
 0x225   :  { %v954_v27 = vsel %vm452_vm6, %v4786_v51, -inf  ;;  %v3761_v4 = vpop.eup %3760  ;;  %v1203_v0 = vadd.f32 %v1202_v30, %v1201_v1  ;;  %v1232_v16 = vsel %vm452_vm6, %v4802_v36, 0.0  ;;  %v1227_v58 = vadd.f32 %v1226_v19, %v1225_v8 }
 0x226   :  { %v955_v32 = vrot.slane %v954_v27, 4  ;;  %v952_v37 = vrot.slane %v951_v52, 1  ;;  %v1220_v18 = vadd.f32 %v1219_v49, %v1218_v28  ;;  %v1057_v12 = vmul.f32 1.442695, %v1000_v41  ;;  %v3763_v28 = vpop.eup %3762 }
 0x227   :  { %v1343_v60 = vmul.f32 %v3761_v4, %v4739_v20  ;;  %v1061_v55 = vmul.f32 1.442695, %v1002_v25  ;;  %v1209_v9 = vrot.slane %v1208_v39, 1  ;;  %v4812_v22 = vpop.eup %3764  ;;  %v5839_v20 = vmax.f32 %v4317_v53, 0.0 }
 0x228   :  { %v956_v2 = vmax.f32 %v954_v27, %v955_v32  ;;  %v953_v21 = vmax.f32 %v951_v52, %v952_v37  ;;  %v1215_v27 = vadd.f32 %v1214_v10, %v1213_v63  ;;  %v1221_v62 = vrot.slane %v1220_v18, 2 }
 0x229   :  { %v1233_v32 = vrot.slane %v1232_v16, 4  ;;  %3766 = vpow2.f32 %v1057_v12  ;;  %v1375_v15 = vmul.f32 %v1343_v60, %v5839_v20  ;;  %v1344_v6 = vmul.f32 %v3763_v28, %v4756_v57 }
 0x22a   :  { %v957_v50 = vrot.slane %v956_v2, 2  ;;  %v1003_v11 = vsub.f32 %v4761_v17, %v953_v21  ;;  %v653_v17 = vrot.slane %v4729_v43, 6  ;;  %3768 = vrcp.f32 %v1203_v0  ;;  %v585_v63 = vpop.f32.mrf.mxu2 }
 0x22b   :  { %v1216_v35 = vrot.slane %v1215_v27, 1  ;;  %3770 = vpow2.f32 %v1059_v33  ;;  %v1234_v37 = vadd.f32 %v1233_v32, %v1232_v16  ;;  %v1239_v53 = vsel %vm452_vm6, %v4812_v22, 0.0 }
 0x22c   :  { %v958_v23 = vmax.f32 %v956_v2, %v957_v50  ;;  %v1063_v29 = vmul.f32 1.442695, %v1003_v11  ;;  %v1222_v2 = vadd.f32 %v1221_v62, %v1220_v18  ;;  %3772 = vpow2.f32 %v1061_v55 }
 0x22d   :  { %v685_v1 = vperm.slane %v653_v17, 0  ;;  %v1210_v50 = vadd.f32 %v1209_v9, %v1208_v39  ;;  %v1217_v38 = vadd.f32 %v1216_v35, %v1215_v27  ;;  %v1503_v41 = vsel %vm452_vm6, %v1375_v15, 0.0 }
 0x22e   :  { %v959_v48 = vrot.slane %v958_v23, 1  ;;  %3774 = vpow2.f32 %v1063_v29  ;;  %v1223_v45 = vrot.slane %v1222_v2, 1  ;;  %v1235_v21 = vrot.slane %v1234_v37, 2 }
 0x22f   :  { %v4817_v49 = vpop.eup %3766  ;;  %v4819_v40 = vadd.f32 %v685_v1, %v585_v63  ;;  %v5840_v7 = vmax.f32 %v4320_v59, 0.0  ;;  %v1240_v4 = vrot.slane %v1239_v53, 4  ;;  %v1504_v11 = vrot.slane %v1503_v41, 4 }
 0x230   :  { %v960_v54 = vmax.f32 %v958_v23, %v959_v48  ;;  %v3769_v23 = vpop.eup %3768  ;;  %v1246_v10 = vsel %vm452_vm6, %v4817_v49, 0.0  ;;  %v1224_v3 = vadd.f32 %v1223_v45, %v1222_v2  ;;  %v1236_v59 = vadd.f32 %v1235_v21, %v1234_v37 }
 0x231   :  { %v4823_v8 = vpop.eup %3770  ;;  %v961_v57 = vsel %vm452_vm6, %v4819_v40, -inf  ;;  %v1376_v48 = vmul.f32 %v1344_v6, %v5840_v7  ;;  %v1247_v0 = vrot.slane %v1246_v10, 4  ;;  %v1241_v33 = vadd.f32 %v1240_v4, %v1239_v53 }
 0x232   :  { %v1004_v52 = vsub.f32 %v4786_v51, %v960_v54  ;;  %v1228_v51 = vrot.slane %v1227_v58, 2  ;;  %v4828_v30 = vpop.eup %3772  ;;  %v962_v18 = vrot.slane %v961_v57, 4  ;;  %v1253_v54 = vsel %vm452_vm6, %v4823_v8, 0.0 }
 0x233   :  { %v1260_v39 = vsel %vm452_vm6, %v4828_v30, 0.0  ;;  %v1510_v16 = vsel %vm452_vm6, %v1376_v48, 0.0  ;;  %v1254_v60 = vrot.slane %v1253_v54, 4  ;;  %v1237_v28 = vrot.slane %v1236_v59, 1 }
 0x234   :  { %v1065_v44 = vmul.f32 1.442695, %v1004_v52  ;;  %v1229_v13 = vadd.f32 %v1228_v51, %v1227_v58  ;;  %v4834_v46 = vpop.eup %3774  ;;  %v963_v12 = vmax.f32 %v961_v57, %v962_v18  ;;  %v1345_v52 = vmul.f32 %v3769_v23, %v4772_v42 }
 0x235   :  { %v1267_v27 = vsel %vm452_vm6, %v4834_v46, 0.0  ;;  %v1261_v29 = vrot.slane %v1260_v39, 4  ;;  %v1248_v35 = vadd.f32 %v1247_v0, %v1246_v10  ;;  %v1511_v42 = vrot.slane %v1510_v16, 4 }
 0x236   :  { %3776 = vpow2.f32 %v1065_v44  ;;  %v1230_v25 = vrot.slane %v1229_v13, 1  ;;  %v964_v62 = vrot.slane %v963_v12, 2  ;;  %v1505_v44 = vadd.f32 %v1504_v11, %v1503_v41 }
 0x237   :  { %3778 = vrcp.f32 %v1210_v50  ;;  %v1268_v2 = vrot.slane %v1267_v27, 4  ;;  %v5841_v51 = vmax.f32 %v4337_v24, 0.0  ;;  %v1242_v6 = vrot.slane %v1241_v33, 2 }
 0x238   :  { %3780 = vrcp.f32 %v1217_v38  ;;  %v1231_v32 = vadd.f32 %v1230_v25, %v1229_v13  ;;  %v965_v17 = vmax.f32 %v963_v12, %v964_v62  ;;  %v1255_v50 = vadd.f32 %v1254_v60, %v1253_v54 }
 0x239   :  { %3782 = vrcp.f32 %v1224_v3  ;;  %v1377_v20 = vmul.f32 %v1345_v52, %v5841_v51  ;;  %v1262_v38 = vadd.f32 %v1261_v29, %v1260_v39  ;;  %v1506_v13 = vrot.slane %v1505_v44, 2 }
 0x23a   :  { %v966_v37 = vrot.slane %v965_v17, 1  ;;  %3784 = vrcp.f32 %v1231_v32  ;;  %v1238_v53 = vadd.f32 %v1237_v28, %v1236_v59  ;;  %v1249_v41 = vrot.slane %v1248_v35, 2 }
 0x23b   :  { %v1269_v21 = vadd.f32 %v1268_v2, %v1267_v27  ;;  %v1512_v57 = vadd.f32 %v1511_v42, %v1510_v16  ;;  %v1517_v24 = vsel %vm452_vm6, %v1377_v20, 0.0  ;;  %v1243_v18 = vadd.f32 %v1242_v6, %v1241_v33 }
 0x23c   :  { %v4836_v19 = vpop.eup %3776  ;;  %v967_v45 = vmax.f32 %v965_v17, %v966_v37  ;;  %v1256_v3 = vrot.slane %v1255_v50, 2  ;;  %v5843_v4 = vmax.f32 %v4356_v14, 0.0  ;;  %v1263_v12 = vrot.slane %v1262_v38, 2 }
 0x23d   :  { %v1274_v58 = vsel %vm452_vm6, %v4836_v19, 0.0  ;;  %v3779_v55 = vpop.eup %3778  ;;  %v1507_v59 = vadd.f32 %v1506_v13, %v1505_v44  ;;  %3786 = vrcp.f32 %v1238_v53  ;;  %v1250_v0 = vadd.f32 %v1249_v41, %v1248_v35 }
 0x23e   :  { %v3781_v9 = vpop.eup %3780  ;;  %v1275_v15 = vrot.slane %v1274_v58, 4  ;;  %v1346_v1 = vmul.f32 %v3779_v55, %v4779_v26  ;;  %v1005_v48 = vsub.f32 %v4819_v40, %v967_v45  ;;  %v5842_v26 = vmax.f32 %v4340_v31, 0.0  ;;  %v587_v55 = vpop.f32.mrf.mxu2 }
 0x23f   :  { %v1347_v63 = vmul.f32 %v3781_v9, %v4781_v56  ;;  %v3783_v23 = vpop.eup %3782  ;;  %v654_v56 = vrot.slane %v4729_v43, 7  ;;  %v1270_v39 = vrot.slane %v1269_v21, 2  ;;  %v1513_v40 = vrot.slane %v1512_v57, 2 }
 0x240   :  { %v1276_v7 = vadd.f32 %v1275_v15, %v1274_v58  ;;  %v1378_v10 = vmul.f32 %v1346_v1, %v5842_v26  ;;  %v1348_v54 = vmul.f32 %v3783_v23, %v4790_v5  ;;  %v1067_v11 = vmul.f32 1.442695, %v1005_v48  ;;  %v3785_v16 = vpop.eup %3784 }
 0x241   :  { %v1379_v25 = vmul.f32 %v1347_v63, %v5843_v4  ;;  %v1518_v52 = vrot.slane %v1517_v24, 4  ;;  %v1244_v27 = vrot.slane %v1243_v18, 1  ;;  %v1257_v62 = vadd.f32 %v1256_v3, %v1255_v50  ;;  %v5845_v63 = vld [vmem:[#allocation3_spill] sm:$0xff] }
 0x242   :  { %v1277_v31 = vrot.slane %v1276_v7, 2  ;;  %3788 = vpow2.f32 %v1067_v11  ;;  %v686_v33 = vperm.slane %v654_v56, 0  ;;  %v1524_v43 = vsel %vm452_vm6, %v1378_v10, 0.0 }
 0x243   :  { %v1531_v14 = vsel %vm452_vm6, %v1379_v25, 0.0  ;;  %v5844_v5 = vmax.f32 %v4359_v34, 0.0  ;;  %v1264_v58 = vadd.f32 %v1263_v12, %v1262_v38  ;;  %v1349_v32 = vmul.f32 %v3785_v16, %v4796_v47  ;;  %v3787_v42 = vpop.eup %3786  ;;  %v5847_v12 = vld [vmem:[#allocation4_spill] sm:$0xff] }
 0x244   :  { %v1251_v29 = vrot.slane %v1250_v0, 1  ;;  %v1271_v17 = vadd.f32 %v1270_v39, %v1269_v21  ;;  %v4865_v9 = vadd.f32 %v686_v33, %v587_v55  ;;  %v1508_v44 = vrot.slane %v1507_v59, 1 }
 0x245   :  { %v1380_v60 = vmul.f32 %v1348_v54, %v5844_v5  ;;  %v1514_v28 = vadd.f32 %v1513_v40, %v1512_v57  ;;  %v1519_v35 = vadd.f32 %v1518_v52, %v1517_v24  ;;  %v1278_v2 = vadd.f32 %v1277_v31, %v1276_v7 }
 0x246   :  { %v1525_v51 = vrot.slane %v1524_v43, 4  ;;  %v1245_v20 = vadd.f32 %v1244_v27, %v1243_v18  ;;  %v1258_v15 = vrot.slane %v1257_v62, 1  ;;  %v968_v34 = vsel %vm452_vm6, %v4865_v9, -inf }
 0x247   :  { %v1532_v1 = vrot.slane %v1531_v14, 4  ;;  %v1538_v47 = vsel %vm452_vm6, %v1380_v60, 0.0  ;;  %v1265_v6 = vrot.slane %v1264_v58, 1  ;;  %v969_v50 = vrot.slane %v968_v34, 4 }
 0x248   :  { %v4869_v37 = vpop.eup %3788  ;;  %v5846_v38 = vmax.f32 %v5845_v63, 0.0  ;;  %v1252_v23 = vadd.f32 %v1251_v29, %v1250_v0  ;;  %v1272_v13 = vrot.slane %v1271_v17, 1  ;;  %v1350_v41 = vmul.f32 %v3787_v42, %v4802_v36 }
 0x249   :  { %v1281_v53 = vsel %vm452_vm6, %v4869_v37, 0.0  ;;  %v1279_v21 = vrot.slane %v1278_v2, 1  ;;  %v970_v24 = vmax.f32 %v968_v34, %v969_v50  ;;  %v1520_v7 = vrot.slane %v1519_v35, 2 }
 0x24a   :  { %v1381_v45 = vmul.f32 %v1349_v32, %v5846_v38  ;;  %v1282_v57 = vrot.slane %v1281_v53, 4  ;;  %v1526_v48 = vadd.f32 %v1525_v51, %v1524_v43  ;;  %3790 = vrcp.f32 %v1245_v20 }
 0x24b   :  { %v1259_v26 = vadd.f32 %v1258_v15, %v1257_v62  ;;  %v1539_v10 = vrot.slane %v1538_v47, 4  ;;  %v1266_v18 = vadd.f32 %v1265_v6, %v1264_v58  ;;  %v971_v56 = vrot.slane %v970_v24, 2 }
 0x24c   :  { %v1283_v3 = vadd.f32 %v1282_v57, %v1281_v53  ;;  %v1533_v4 = vadd.f32 %v1532_v1, %v1531_v14  ;;  %v1545_v25 = vsel %vm452_vm6, %v1381_v45, 0.0  ;;  %3792 = vrcp.f32 %v1252_v23 }
 0x24d   :  { %v1273_v54 = vadd.f32 %v1272_v13, %v1271_v17  ;;  %v5848_v11 = vmax.f32 %v5847_v12, 0.0  ;;  %v1280_v36 = vadd.f32 %v1279_v21, %v1278_v2  ;;  %v972_v16 = vmax.f32 %v970_v24, %v971_v56  ;;  %v5849_v13 = vld [vmem:[#allocation7_spill] sm:$0xff] }
 0x24e   :  { %v1284_v39 = vrot.slane %v1283_v3, 2  ;;  %v1509_v40 = vadd.f32 %v1508_v44, %v1507_v59  ;;  %v1515_v52 = vrot.slane %v1514_v28, 1  ;;  %v1521_v31 = vadd.f32 %v1520_v7, %v1519_v35 }
 0x24f   :  { %v1382_v0 = vmul.f32 %v1350_v41, %v5848_v11  ;;  %3794 = vrcp.f32 %v1259_v26  ;;  %v1540_v27 = vadd.f32 %v1539_v10, %v1538_v47  ;;  %v973_v33 = vrot.slane %v972_v16, 1  ;;  %v3655_v41 = vld [vmem:[%s5714_s14] sm:$0xff]  ;;  %v5851_v10 = vld [vmem:[#allocation8_spill] sm:$0xff] }
 0x250   :  { %3796 = vrcp.f32 %v1266_v18  ;;  %v1285_v62 = vadd.f32 %v1284_v39, %v1283_v3  ;;  %v3791_v43 = vpop.eup %3790  ;;  %v1527_v14 = vrot.slane %v1526_v48, 2  ;;  %v1534_v5 = vrot.slane %v1533_v4, 2  ;;  %2133 = vmatpush.bf16.msra.mxu1 %v3655_v41  ;;  %v5853_v39 = vld [vmem:[#allocation10_spill] sm:$0xff] }
 0x251   :  { %v1546_v60 = vrot.slane %v1545_v25, 4  ;;  %3798 = vrcp.f32 %v1273_v54  ;;  %v1552_v58 = vsel %vm452_vm6, %v1382_v0, 0.0  ;;  %v974_v32 = vmax.f32 %v972_v16, %v973_v33 }
 0x252   :  { %3800 = vrcp.f32 %v1280_v36  ;;  %v1286_v55 = vrot.slane %v1285_v62, 1  ;;  %v3793_v29 = vpop.eup %3792  ;;  %v1516_v17 = vadd.f32 %v1515_v52, %v1514_v28  ;;  %v1522_v59 = vrot.slane %v1521_v31, 1  ;;  %v5855_v52 = vld [vmem:[#allocation11_spill] sm:$0xff] }
 0x253   :  { %v1541_v44 = vrot.slane %v1540_v27, 2  ;;  %v1351_v35 = vmul.f32 %v3791_v43, %v4812_v22  ;;  %v1006_v42 = vsub.f32 %v4865_v9, %v974_v32  ;;  %v1631_v20 = vpack.c.bf16 %v1509_v40, %v1509_v40  ;;  %v5859_v32 = vld [vmem:[#allocation13_spill] sm:$0xff] }
 0x254   :  { %v1287_v2 = vadd.f32 %v1286_v55, %v1285_v62  ;;  %v1528_v15 = vadd.f32 %v1527_v14, %v1526_v48  ;;  %v1547_v34 = vadd.f32 %v1546_v60, %v1545_v25  ;;  %v1553_v1 = vrot.slane %v1552_v58, 4  ;;  %v5857_v14 = vld [vmem:[#allocation12_spill] sm:$0xff] }
 0x255   :  { %v3795_v51 = vpop.eup %3794  ;;  %v1535_v6 = vadd.f32 %v1534_v5, %v1533_v4  ;;  %v1352_v50 = vmul.f32 %v3793_v29, %v4817_v49  ;;  %v1069_v63 = vmul.f32 1.442695, %v1006_v42  ;;  %v1632_v28 = vpack.c.bf16 %v1516_v17, %v1516_v17  ;;  %v3654_v49 = vld [vmem:[%s5715_s13] sm:$0xff] }
 0x256   :  { %v3797_v47 = vpop.eup %3796  ;;  %3802 = vrcp.f32 %v1287_v2  ;;  %v1523_v45 = vadd.f32 %v1522_v59, %v1521_v31  ;;  %v5850_v22 = vmax.f32 %v5849_v13, 0.0  ;;  %v1353_v9 = vmul.f32 %v3795_v51, %v4823_v8  ;;  %2030 = vmatpush.bf16.msra.mxu3 %v3654_v49 }
 0x257   :  { %v3799_v38 = vpop.eup %3798  ;;  %3804 = vpow2.f32 %v1069_v63  ;;  %v1542_v21 = vadd.f32 %v1541_v44, %v1540_v27  ;;  %v4893_v57 = vunpack.c.l.b16 %v1631_v20  ;;  %v1354_v24 = vmul.f32 %v3797_v47, %v4828_v30  ;;  %v4919_v47 = vpop.f32.mrf.mxu0 }
 0x258   :  { %v3801_v23 = vpop.eup %3800  ;;  %v1383_v53 = vmul.f32 %v1351_v35, %v5850_v22  ;;  %v1548_v7 = vrot.slane %v1547_v34, 2  ;;  %v1554_v48 = vadd.f32 %v1553_v1, %v1552_v58  ;;  %v1529_v26 = vrot.slane %v1528_v15, 1 }
 0x259   :  { %v5852_v18 = vmax.f32 %v5851_v10, 0.0  ;;  %v1355_v3 = vmul.f32 %v3799_v38, %v4834_v46  ;;  %v1536_v56 = vrot.slane %v1535_v6, 1  ;;  %v1356_v4 = vmul.f32 %v3801_v23, %v4836_v19 }
 0x25a   :  { %v1543_v25 = vrot.slane %v1542_v21, 1  ;;  %v1549_v54 = vadd.f32 %v1548_v7, %v1547_v34  ;;  %v1555_v12 = vrot.slane %v1554_v48, 2  ;;  %v1725_v0 = vunpack.c.l.b16 %v1632_v28 }
 0x25b   :  { %v1384_v8 = vmul.f32 %v1352_v50, %v5852_v18  ;;  %v1633_v36 = vpack.c.bf16 %v1523_v45, %v1523_v45  ;;  %v1559_v30 = vsel %vm452_vm6, %v1383_v53, 0.0  ;;  %v5854_v16 = vmax.f32 %v5853_v39, 0.0 }
 0x25c   :  { %v3803_v11 = vpop.eup %3802  ;;  %v5856_v31 = vmax.f32 %v5855_v52, 0.0  ;;  %v1550_v62 = vrot.slane %v1549_v54, 1  ;;  %v1556_v33 = vadd.f32 %v1555_v12, %v1554_v48  ;;  %v5858_v5 = vmax.f32 %v5857_v14, 0.0 }
 0x25d   :  { %v1385_v40 = vmul.f32 %v1353_v9, %v5854_v16  ;;  %v1357_v46 = vmul.f32 %v3803_v11, %v4869_v37  ;;  %v4906_v43 = vpop.eup %3804  ;;  %v1566_v19 = vsel %vm452_vm6, %v1384_v8, 0.0  ;;  %v1530_v58 = vadd.f32 %v1529_v26, %v1528_v15 }
 0x25e   :  { %v1386_v27 = vmul.f32 %v1354_v24, %v5856_v31  ;;  %v1387_v60 = vmul.f32 %v1355_v3, %v5858_v5  ;;  %v1537_v55 = vadd.f32 %v1536_v56, %v1535_v6  ;;  %v5860_v29 = vmax.f32 %v5859_v32, 0.0 }
 0x25f   :  { %v1288_v59 = vsel %vm452_vm6, %v4906_v43, 0.0  ;;  %v1544_v44 = vadd.f32 %v1543_v25, %v1542_v21  ;;  %v1557_v35 = vrot.slane %v1556_v33, 1  ;;  %v1573_v37 = vsel %vm452_vm6, %v1385_v40, 0.0 }
 0x260   :  { %v1388_v17 = vmul.f32 %v1356_v4, %v5860_v29  ;;  %v5861_v2 = vmax.f32 %v4531_v61, 0.0  ;;  %v1289_v51 = vrot.slane %v1288_v59, 4  ;;  %v1551_v20 = vadd.f32 %v1550_v62, %v1549_v54 }
 0x261   :  { %v1560_v34 = vrot.slane %v1559_v30, 4  ;;  %v1567_v1 = vrot.slane %v1566_v19, 4  ;;  %v1580_v15 = vsel %vm452_vm6, %v1386_v27, 0.0  ;;  %v1558_v6 = vadd.f32 %v1557_v35, %v1556_v33  ;;  %v5862_v35 = vld [vmem:[#allocation2_spill] sm:$0xff] }
 0x262   :  { %v1389_v42 = vmul.f32 %v1357_v46, %v5861_v2  ;;  %v1587_v50 = vsel %vm452_vm6, %v1387_v60, 0.0  ;;  %v1290_v63 = vadd.f32 %v1289_v51, %v1288_v59  ;;  %v1634_v38 = vpack.c.bf16 %v1530_v58, %v1530_v58  ;;  %v4944_v2 = vld [vmem:[%s5713_s10] ss:$0 sm:$0xff] }
 0x263   :  { %v1635_v28 = vpack.c.bf16 %v1537_v55, %v1537_v55  ;;  %v1726_v45 = vunpack.c.l.b16 %v1633_v36  ;;  %v1574_v23 = vrot.slane %v1573_v37, 4  ;;  %v1594_v13 = vsel %vm452_vm6, %v1388_v17, 0.0 }
 0x264   :  { %v1636_v61 = vpack.c.bf16 %v1544_v44, %v1544_v44  ;;  %v1581_v22 = vrot.slane %v1580_v15, 4  ;;  %v1601_v53 = vsel %vm452_vm6, %v1389_v42, 0.0  ;;  %v1291_v9 = vrot.slane %v1290_v63, 2 }
 0x265   :  { %v1637_v41 = vpack.c.bf16 %v1551_v20, %v1551_v20  ;;  %v1561_v49 = vadd.f32 %v1560_v34, %v1559_v30  ;;  %v1588_v21 = vrot.slane %v1587_v50, 4  ;;  %v1638_v24 = vpack.c.bf16 %v1558_v6, %v1558_v6 }
 0x266   :  { %v1727_v7 = vunpack.c.l.b16 %v1634_v38  ;;  %v1568_v48 = vadd.f32 %v1567_v1, %v1566_v19  ;;  %v1595_v26 = vrot.slane %v1594_v13, 4  ;;  %v1292_v10 = vadd.f32 %v1291_v9, %v1290_v63  ;;  %v3936_v19 = vld [vmem:[%s5806_s4 + $0x60] sm:$0xff] }
 0x267   :  { %v1728_v18 = vunpack.c.l.b16 %v1635_v28  ;;  %v1575_v8 = vadd.f32 %v1574_v23, %v1573_v37  ;;  %v1602_v3 = vrot.slane %v1601_v53, 4  ;;  %v1729_v56 = vunpack.c.l.b16 %v1636_v61  ;;  %v5863_v23 = vld [vmem:[#allocation5_spill] sm:$0xff]  ;;  %v5864_v61 = vld [vmem:[#allocation14_spill] sm:$0xff] }
 0x268   :  { %v1761_v4 = vsel %vm1740_vm9, %v1725_v0, %v4893_v57  ;;  %v1582_v25 = vadd.f32 %v1581_v22, %v1580_v15  ;;  %v1293_v54 = vrot.slane %v1292_v10, 1  ;;  %v1730_v12 = vunpack.c.l.b16 %v1637_v41  ;;  %v4930_v57 = vpop.f32.mrf.mxu0  ;;  %3578 = vmatmul.msk.bf16.gmra.mxu0 %vm252_vm3, %v3936_v19 }
 0x269   :  { %v1762_v11 = vsel %vm1742_vm10, %v1726_v45, %v1761_v4  ;;  %v1589_v36 = vadd.f32 %v1588_v21, %v1587_v50  ;;  %v1731_v30 = vunpack.c.l.b16 %v1638_v24  ;;  %v1569_v16 = vrot.slane %v1568_v48, 2 }
 0x26a   :  { %v1763_v39 = vsel %vm1744_vm11, %v1727_v7, %v1762_v11  ;;  %v1596_v40 = vadd.f32 %v1595_v26, %v1594_v13  ;;  %v1294_v52 = vadd.f32 %v1293_v54, %v1292_v10  ;;  %v1562_v27 = vrot.slane %v1561_v49, 2 }
 0x26b   :  { %v1764_v31 = vsel %vm1746_vm12, %v1728_v18, %v1763_v39  ;;  %v1576_v46 = vrot.slane %v1575_v8, 2  ;;  %v1603_v62 = vadd.f32 %v1602_v3, %v1601_v53  ;;  %v1583_v14 = vrot.slane %v1582_v25, 2  ;;  %v3937_v39 = vld [vmem:[%s5806_s4 + $0x68] sm:$0xff] }
 0x26c   :  { %v1765_v33 = vsel %vm1748_vm13, %v1729_v56, %v1764_v31  ;;  %3806 = vrcp.f32 %v1294_v52  ;;  %v1590_v60 = vrot.slane %v1589_v36, 2  ;;  %v1570_v55 = vadd.f32 %v1569_v16, %v1568_v48 }
 0x26d   :  { %v1766_v5 = vsel %vm1750_vm14, %v1730_v12, %v1765_v33  ;;  %v1597_v32 = vrot.slane %v1596_v40, 2  ;;  %v1563_v29 = vadd.f32 %v1562_v27, %v1561_v49  ;;  %v1577_v17 = vadd.f32 %v1576_v46, %v1575_v8 }
 0x26e   :  { %v4938_v58 = vsel %vm1752_vm15, %v1731_v30, %v1766_v5  ;;  %v1604_v59 = vrot.slane %v1603_v62, 2  ;;  %v1584_v44 = vadd.f32 %v1583_v14, %v1582_v25  ;;  %v1591_v42 = vadd.f32 %v1590_v60, %v1589_v36  ;;  %v3657_v30 = vld [vmem:[%s5716_s16] sm:$0xff] }
 0x26f   :  { %v1571_v20 = vrot.slane %v1570_v55, 1  ;;  %v1598_v34 = vadd.f32 %v1597_v32, %v1596_v40  ;;  %v1564_v1 = vrot.slane %v1563_v29, 1  ;;  %v1578_v15 = vrot.slane %v1577_v17, 1  ;;  %3186 = vmatpush.bf16.msrb.mxu2 %v3657_v30 }
 0x270   :  { %v1605_v50 = vadd.f32 %v1604_v59, %v1603_v62  ;;  %v4947_v63 = vpop.f32.mrf.mxu0  ;;  %v1585_v28 = vrot.slane %v1584_v44, 1  ;;  %v5865_v22 = vmax.f32 %v5864_v61, 0.0  ;;  %v1592_v9 = vrot.slane %v1591_v42, 1 }
 0x271   :  { %v1572_v41 = vadd.f32 %v1571_v20, %v1570_v55  ;;  %v1599_v49 = vrot.slane %v1598_v34, 1  ;;  %v1565_v24 = vadd.f32 %v1564_v1, %v1563_v29  ;;  %v1579_v7 = vadd.f32 %v1578_v15, %v1577_v17 }
 0x272   :  { %v3807_v51 = vpop.eup %3806  ;;  %v1606_v48 = vrot.slane %v1605_v50, 1  ;;  %v1586_v10 = vadd.f32 %v1585_v28, %v1584_v44  ;;  %v1593_v3 = vadd.f32 %v1592_v9, %v1591_v42 }
 0x273   :  { %v1358_v6 = vmul.f32 %v3807_v51, %v4906_v43  ;;  %v1640_v56 = vpack.c.bf16 %v1572_v41, %v1572_v41  ;;  %v1600_v4 = vadd.f32 %v1599_v49, %v1598_v34  ;;  %v1641_v12 = vpack.c.bf16 %v1579_v7, %v1579_v7 }
 0x274   :  { %v1798_v0 = vpop.f32.mrf.mxu3  ;;  %v1607_v11 = vadd.f32 %v1606_v48, %v1605_v50  ;;  %v1639_v16 = vpack.c.bf16 %v1565_v24, %v1565_v24  ;;  %v1642_v52 = vpack.c.bf16 %v1586_v10, %v1586_v10  ;;  %v1643_v31 = vpack.c.bf16 %v1593_v3, %v1593_v3  ;;  %v3938_v50 = vld [vmem:[%s5806_s4 + $0x70] sm:$0xff] }
 0x275   :  { %v1799_v37 = vadd.f32 %v1798_v0, %v5862_v35  ;;  %v1390_v53 = vmul.f32 %v1358_v6, %v5865_v22  ;;  %v1733_v27 = vunpack.c.l.b16 %v1640_v56  ;;  %v1644_v62 = vpack.c.bf16 %v1600_v4, %v1600_v4 }
 0x276   :  { %v1734_v33 = vunpack.c.l.b16 %v1641_v12  ;;  %v1645_v0 = vpack.c.bf16 %v1607_v11, %v1607_v11  ;;  %v1732_v19 = vunpack.c.l.b16 %v1639_v16  ;;  %v1735_v5 = vunpack.c.l.b16 %v1642_v52 }
 0x277   :  { %v1812_v45 = vadd.f32 %v4944_v2, %v1799_v37  ;;  %v1608_v43 = vsel %vm452_vm6, %v1390_v53, 0.0  ;;  %v1736_v60 = vunpack.c.l.b16 %v1643_v31  ;;  %v1737_v32 = vunpack.c.l.b16 %v1644_v62 }
 0x278   :  { %v1609_v26 = vrot.slane %v1608_v43, 4  ;;  %v1846_v36 = vpop.f32.mrf.mxu0  ;;  %3579 = vmatmul.msk.bf16.gmra.mxu0 %vm252_vm3, %v3937_v39  ;;  %v1768_v29 = vsel %vm1740_vm9, %v1733_v27, %v1732_v19  ;;  %v1738_v17 = vunpack.c.l.b16 %v1645_v0 }
 0x279   :  { %v1816_v18 = vmax.f32 %v1812_v45, 0.0  ;;  %v1769_v59 = vsel %vm1742_vm10, %v1734_v33, %v1768_v29 }
 0x27a   :  { %v1610_v25 = vadd.f32 %v1609_v26, %v1608_v43  ;;  %v1770_v37 = vsel %vm1744_vm11, %v1735_v5, %v1769_v59 }
 0x27b   :  { %v1771_v42 = vsel %vm1746_vm12, %v1736_v60, %v1770_v37 }
 0x27c   :  { %v1800_v38 = vpop.f32.mrf.mxu3  ;;  %v1611_v40 = vrot.slane %v1610_v25, 2  ;;  %v1772_v20 = vsel %vm1748_vm13, %v1737_v32, %v1771_v42 }
 0x27d   :  { %v1801_v13 = vadd.f32 %v1800_v38, %v5863_v23  ;;  %v1773_v34 = vsel %vm1750_vm14, %v1738_v17, %v1772_v20  ;;  %v4980_v38 = vld [vmem:[%s5712_s12] ss:$0 sm:$0xff] }
 0x27e   :  { %v1612_v46 = vadd.f32 %v1611_v40, %v1610_v25  ;;  %v4984_v28 = vadd.f32 %v4980_v38, %v4919_v47  ;;  %v3939_v47 = vld [vmem:[%s5806_s4 + $0x78] sm:$0xff]  ;;  %v5006_v53 = vadd.f32 %v4980_v38, %v1846_v36  ;;  %v5866_v20 = vld [vmem:[#allocation6_spill] sm:$0xff] }
 0x27f   :  { %v1813_v21 = vadd.f32 %v4944_v2, %v1801_v13 }
 0x280   :  { %v1613_v14 = vrot.slane %v1612_v46, 1  ;;  %v1849_v44 = vpop.f32.mrf.mxu0  ;;  %v1919_v23 = vmax.f32 %v4984_v28, 0.0  ;;  %v1922_v41 = vmax.f32 %v5006_v53, 0.0 }
 0x281   :  { %v1817_v8 = vmax.f32 %v1813_v21, 0.0  ;;  %v5016_v24 = vadd.f32 %v4980_v38, %v1849_v44 }
 0x282   :  { %v1614_v55 = vadd.f32 %v1613_v14, %v1612_v46 }
 0x283   :  { %v1820_v54 = vpack.c.bf16 %v1817_v8, %v1816_v18  ;;  %v1923_v7 = vmax.f32 %v5016_v24, 0.0 }
 0x284   :  { %v1646_v35 = vpack.c.bf16 %v1614_v55, %v1614_v55 }
 0x285   :  { %3606 = vmatmul.msk.bf16.vlgmr.msra.gmra.mxu1 %vm452_vm6, %v1820_v54  ;;  %3612 = vmatmul.msk.bf16.vlgmr.msrb.gmra.mxu2 %vm452_vm6, %v1820_v54 }
 0x286   :  { %v1739_v51 = vunpack.c.l.b16 %v1646_v35 }
 0x288   :  { %v1774_v1 = vsel %vm1752_vm15, %v1739_v51, %v1773_v34  ;;  %v1851_v6 = vpop.f32.mrf.mxu0  ;;  %3580 = vmatmul.msk.bf16.gmra.mxu0 %vm252_vm3, %v3938_v50 }
 0x289   :  { %v1776_v15 = vpack.c.b16 %v1774_v1, %v4938_v58  ;;  %v4988_v58 = vadd.f32 %v4980_v38, %v4930_v57  ;;  %v5003_v57 = vadd.f32 %v4980_v38, %v4947_v63  ;;  %v5019_v63 = vadd.f32 %v4980_v38, %v1851_v6 }
 0x28b   :  { %3565 = vmatmul.msk.bf16.gmra.mxu3 %vm452_vm6, %v1776_v15  ;;  %v1920_v13 = vmax.f32 %v4988_v58, 0.0  ;;  %v1921_v9 = vmax.f32 %v5003_v57, 0.0  ;;  %v1924_v43 = vmax.f32 %v5019_v63, 0.0 }
 0x28d   :  { %v1951_v61 = vpack.c.bf16 %v1920_v13, %v1919_v23  ;;  %v1952_v49 = vpack.c.bf16 %v1922_v41, %v1921_v9  ;;  %v1953_v48 = vpack.c.bf16 %v1924_v43, %v1923_v7 }
 0x290   :  { %v1854_v45 = vpop.f32.mrf.mxu0 }
 0x291   :  { %v5029_v10 = vadd.f32 %v4980_v38, %v1854_v45 }
 0x293   :  { %v1925_v3 = vmax.f32 %v5029_v10, 0.0 }
 0x298   :  { %v1856_v22 = vpop.f32.mrf.mxu0  ;;  %3581 = vmatmul.msk.bf16.gmra.mxu0 %vm252_vm3, %v3939_v47 }
 0x299   :  { %v5032_v18 = vadd.f32 %v4980_v38, %v1856_v22 }
 0x29b   :  { %3586 = vmatmul.msk.bf16.vlgmr.msra.gmra.mxu3 %vm452_vm6, %v1951_v61  ;;  %v5791_v56 = vmax.f32 %v5032_v18, 0.0  ;;  %v5867_v61 = vld [vmem:[#allocation9_spill] sm:$0xff] }
 0x29d   :  { %v1954_v4 = vpack.c.bf16 %v5791_v56, %v1925_v3 }
 0x2a0   :  { %v1859_v21 = vpop.f32.mrf.mxu0 }
 0x2a1   :  { %v5042_v54 = vadd.f32 %v4980_v38, %v1859_v21 }
 0x2a3   :  { %v5790_v11 = vmax.f32 %v5042_v54, 0.0 }
 0x2a8   :  { %v1861_v26 = vpop.f32.mrf.mxu0 }
 0x2a9   :  { %v5045_v12 = vadd.f32 %v4980_v38, %v1861_v26 }
 0x2ab   :  { %3587 = vmatmul.msk.bf16.gmra.mxu3 %vm452_vm6, %v1952_v49  ;;  %v5787_v36 = vmax.f32 %v5045_v12, 0.0 }
 0x2ad   :  { %v1955_v39 = vpack.c.bf16 %v5787_v36, %v5790_v11 }
 0x2b0   :  { %v1864_v8 = vpop.f32.mrf.mxu0 }
 0x2b1   :  { %v5055_v16 = vadd.f32 %v4980_v38, %v1864_v8 }
 0x2b3   :  { %v5782_v31 = vmax.f32 %v5055_v16, 0.0 }
 0x2b8   :  { %v1866_v25 = vpop.f32.mrf.mxu0 }
 0x2b9   :  { %v5058_v40 = vadd.f32 %v4980_v38, %v1866_v25 }
 0x2bb   :  { %3588 = vmatmul.msk.bf16.gmra.mxu3 %vm452_vm6, %v1953_v48  ;;  %v5781_v27 = vmax.f32 %v5058_v40, 0.0 }
 0x2bd   :  { %v1956_v46 = vpack.c.bf16 %v5781_v27, %v5782_v31 }
 0x2c0   :  { %v1869_v30 = vpop.f32.mrf.mxu0 }
 0x2c1   :  { %v5068_v33 = vadd.f32 %v4980_v38, %v1869_v30 }
 0x2c3   :  { %v5778_v19 = vmax.f32 %v5068_v33, 0.0 }
 0x2c8   :  { %v1871_v52 = vpop.f32.mrf.mxu0 }
 0x2c9   :  { %v5071_v0 = vadd.f32 %v4980_v38, %v1871_v52 }
 0x2cb   :  { %3589 = vmatmul.msk.bf16.gmra.mxu3 %vm452_vm6, %v1954_v4  ;;  %v5777_v14 = vmax.f32 %v5071_v0, 0.0 }
 0x2cd   :  { %v1957_v60 = vpack.c.bf16 %v5777_v14, %v5778_v19 }
 0x2d0   :  { %v1874_v62 = vpop.f32.mrf.mxu0 }
 0x2d1   :  { %v5081_v32 = vadd.f32 %v4980_v38, %v1874_v62 }
 0x2d3   :  { %v5776_v17 = vmax.f32 %v5081_v32, 0.0 }
 0x2d8   :  { %v1876_v5 = vpop.f32.mrf.mxu0 }
 0x2d9   :  { %v5084_v29 = vadd.f32 %v4980_v38, %v1876_v5 }
 0x2db   :  { %3590 = vmatmul.msk.bf16.gmra.mxu3 %vm452_vm6, %v1955_v39  ;;  %v5773_v59 = vmax.f32 %v5084_v29, 0.0 }
 0x2dd   :  { %v1958_v44 = vpack.c.bf16 %v5773_v59, %v5776_v17 }
 0x2e0   :  { %v1879_v55 = vpop.f32.mrf.mxu0 }
 0x2e1   :  { %v5094_v42 = vadd.f32 %v4980_v38, %v1879_v55 }
 0x2e3   :  { %v5771_v15 = vmax.f32 %v5094_v42, 0.0 }
 0x2e8   :  { %v1881_v35 = vpop.f32.mrf.mxu0 }
 0x2e9   :  { %v5097_v51 = vadd.f32 %v4980_v38, %v1881_v35 }
 0x2eb   :  { %3591 = vmatmul.msk.bf16.gmra.mxu3 %vm452_vm6, %v1956_v46  ;;  %v5772_v6 = vmax.f32 %v5097_v51, 0.0 }
 0x2ed   :  { %v1959_v47 = vpack.c.bf16 %v5772_v6, %v5771_v15 }
 0x2f0   :  { %v1884_v1 = vpop.f32.mrf.mxu0 }
 0x2f1   :  { %v5113_v4 = vadd.f32 %v4980_v38, %v1884_v1 }
 0x2f8   :  { %v1886_v8 = vpop.f32.mrf.mxu0 }
 0x2f9   :  { %v5116_v25 = vadd.f32 %v4980_v38, %v1886_v8 }
 0x2fb   :  { %3592 = vmatmul.msk.bf16.gmra.mxu3 %vm452_vm6, %v1957_v60  ;;  %v5767_v39 = vmax.f32 %v5116_v25, 0.0 }
 0x302   :  { %v5118_v30 = vpop.f32.mrf.mxu1 }
 0x303   :  { %v2177_v52 = vperm.slane %v5118_v30, 0  ;;  %v2154_v19 = vrot.slane %v5118_v30, 6 }
 0x30b   :  { %3593 = vmatmul.msk.bf16.gmra.mxu3 %vm452_vm6, %v1958_v44 }
 0x30e   :  { %v1803_v37 = vpop.f32.mrf.mxu3 }
 0x30f   :  { %v1804_v34 = vadd.f32 %v1803_v37, %v5866_v20  ;;  %v2149_v20 = vrot.slane %v5118_v30, 1 }
 0x311   :  { %v1814_v45 = vadd.f32 %v4944_v2, %v1804_v34 }
 0x313   :  { %v1818_v21 = vmax.f32 %v1814_v45, 0.0 }
 0x316   :  { %v1805_v50 = vpop.f32.mrf.mxu3 }
 0x317   :  { %v1806_v22 = vadd.f32 %v1805_v50, %v5867_v61  ;;  %v2178_v50 = vperm.slane %v2149_v20, 0  ;;  %v1889_v20 = vpop.f32.mrf.mxu0 }
 0x319   :  { %v1815_v49 = vadd.f32 %v4944_v2, %v1806_v22  ;;  %v5768_v2 = vmax.f32 %v5113_v4, 0.0 }
 0x31b   :  { %v1819_v48 = vmax.f32 %v1815_v49, 0.0  ;;  %3594 = vmatmul.msk.bf16.gmra.mxu3 %vm452_vm6, %v1959_v47  ;;  %v1960_v62 = vpack.c.bf16 %v5767_v39, %v5768_v2 }
 0x31d   :  { %v1821_v26 = vpack.c.bf16 %v1819_v48, %v1818_v21 }
 0x31e   :  { %v2032_v46 = vpop.f32.mrf.mxu3 }
 0x31f   :  { %3607 = vmatmul.msk.bf16.gmra.mxu1 %vm452_vm6, %v1821_v26  ;;  %3613 = vmatmul.msk.bf16.gmra.mxu2 %vm452_vm6, %v1821_v26  ;;  %v2241_v5 = vadd.f32 %v2177_v52, %v2032_v46 }
 0x321   :  { %v2273_v60 = vsel %vm452_vm6, %v2241_v5, -inf }
 0x322   :  { %v2274_v55 = vrot.slane %v2273_v60, 4 }
 0x324   :  { %v2275_v44 = vmax.f32 %v2273_v60, %v2274_v55 }
 0x326   :  { %v2276_v35 = vrot.slane %v2275_v44, 2  ;;  %v2034_v34 = vpop.f32.mrf.mxu3 }
 0x327   :  { %v2242_v45 = vadd.f32 %v2178_v50, %v2034_v34 }
 0x328   :  { %v2277_v37 = vmax.f32 %v2275_v44, %v2276_v35 }
 0x329   :  { %v2280_v22 = vsel %vm452_vm6, %v2242_v45, -inf }
 0x32a   :  { %v2278_v1 = vrot.slane %v2277_v37, 1  ;;  %v2281_v47 = vrot.slane %v2280_v22, 4 }
 0x32b   :  { %3595 = vmatmul.msk.bf16.gmra.mxu3 %vm452_vm6, %v1960_v62 }
 0x32c   :  { %v2279_v61 = vmax.f32 %v2277_v37, %v2278_v1  ;;  %v2282_v49 = vmax.f32 %v2280_v22, %v2281_v47  ;;  %v1891_v47 = vpop.f32.mrf.mxu0 }
 0x32e   :  { %v2497_v21 = vsub.f32 %v2241_v5, %v2279_v61  ;;  %v2283_v48 = vrot.slane %v2282_v49, 2  ;;  %v5134_v5 = vadd.f32 %v4980_v38, %v1889_v20 }
 0x330   :  { %v2284_v26 = vmax.f32 %v2282_v49, %v2283_v48  ;;  %v2529_v8 = vmul.f32 1.442695, %v2497_v21  ;;  %v5770_v49 = vmax.f32 %v5134_v5, 0.0  ;;  %v5139_v48 = vadd.f32 %v4980_v38, %v1891_v47 }
 0x332   :  { %v2285_v52 = vrot.slane %v2284_v26, 1  ;;  %3808 = vpow2.f32 %v2529_v8 }
 0x334   :  { %v2286_v46 = vmax.f32 %v2284_v26, %v2285_v52  ;;  %v2037_v26 = vpop.f32.mrf.mxu3  ;;  %v1894_v6 = vpop.f32.mrf.mxu0 }
 0x336   :  { %v2498_v62 = vsub.f32 %v2242_v45, %v2286_v46  ;;  %v2150_v45 = vrot.slane %v5118_v30, 2  ;;  %v5769_v46 = vmax.f32 %v5139_v48, 0.0 }
 0x338   :  { %v2531_v60 = vmul.f32 1.442695, %v2498_v62  ;;  %v3809_v55 = vpop.eup %3808  ;;  %v2179_v8 = vperm.slane %v2150_v45, 0 }
 0x339   :  { %v2593_v44 = vsel %vm452_vm6, %v3809_v55, 0.0 }
 0x33a   :  { %3810 = vpow2.f32 %v2531_v60  ;;  %v2594_v37 = vrot.slane %v2593_v44, 4  ;;  %v2243_v62 = vadd.f32 %v2179_v8, %v2037_v26 }
 0x33c   :  { %v2595_v50 = vadd.f32 %v2594_v37, %v2593_v44  ;;  %v1961_v44 = vpack.c.bf16 %v5769_v46, %v5770_v49  ;;  %v2287_v20 = vsel %vm452_vm6, %v2243_v62, -inf  ;;  %v2151_v46 = vrot.slane %v5118_v30, 3 }
 0x33e   :  { %v2596_v22 = vrot.slane %v2595_v50, 2  ;;  %3596 = vmatmul.msk.bf16.gmra.mxu3 %vm452_vm6, %v1961_v44  ;;  %v2180_v59 = vperm.slane %v2151_v46, 0 }
 0x340   :  { %v3811_v35 = vpop.eup %3810  ;;  %v2597_v52 = vadd.f32 %v2596_v22, %v2595_v50 }
 0x341   :  { %v2600_v34 = vsel %vm452_vm6, %v3811_v35, 0.0 }
 0x342   :  { %v2601_v1 = vrot.slane %v2600_v34, 4  ;;  %v2598_v37 = vrot.slane %v2597_v52, 1 }
 0x344   :  { %v2602_v61 = vadd.f32 %v2601_v1, %v2600_v34  ;;  %v2288_v34 = vrot.slane %v2287_v20, 4  ;;  %v2599_v39 = vadd.f32 %v2598_v37, %v2597_v52 }
 0x346   :  { %v2603_v21 = vrot.slane %v2602_v61, 2  ;;  %v2289_v47 = vmax.f32 %v2287_v20, %v2288_v34  ;;  %3812 = vrcp.f32 %v2599_v39  ;;  %v2039_v20 = vpop.f32.mrf.mxu3 }
 0x348   :  { %v2604_v60 = vadd.f32 %v2603_v21, %v2602_v61  ;;  %v2290_v45 = vrot.slane %v2289_v47, 2 }
 0x34a   :  { %v2605_v1 = vrot.slane %v2604_v60, 1  ;;  %v2291_v22 = vmax.f32 %v2289_v47, %v2290_v45  ;;  %v1896_v47 = vpop.f32.mrf.mxu0 }
 0x34b   :  { %v5162_v58 = vadd.f32 %v4980_v38, %v1896_v47 }
 0x34c   :  { %v2606_v50 = vadd.f32 %v2605_v1, %v2604_v60  ;;  %v2292_v26 = vrot.slane %v2291_v22, 1  ;;  %v3813_v8 = vpop.eup %3812  ;;  %v2244_v60 = vadd.f32 %v2180_v59, %v2039_v20  ;;  %v2152_v1 = vrot.slane %v5118_v30, 4 }
 0x34d   :  { %v2849_v15 = vmul.f32 %v3813_v8, %v3809_v55 }
 0x34e   :  { %3814 = vrcp.f32 %v2606_v50  ;;  %v2293_v61 = vmax.f32 %v2291_v22, %v2292_v26  ;;  %v2294_v34 = vsel %vm452_vm6, %v2244_v60, -inf  ;;  %v2042_v50 = vpop.f32.mrf.mxu3  ;;  %v5774_v26 = vmax.f32 %v5162_v58, 0.0 }
 0x34f   :  { %v2881_v52 = vmul.f32 %v2849_v15, %v1919_v23  ;;  %v2295_v55 = vrot.slane %v2294_v34, 4  ;;  %v5159_v23 = vadd.f32 %v4980_v38, %v1894_v6 }
 0x350   :  { %v2499_v21 = vsub.f32 %v2243_v62, %v2293_v61 }
 0x351   :  { %v2296_v46 = vmax.f32 %v2294_v34, %v2295_v55  ;;  %v5775_v22 = vmax.f32 %v5159_v23, 0.0 }
 0x352   :  { %v2533_v2 = vmul.f32 1.442695, %v2499_v21 }
 0x353   :  { %v2297_v45 = vrot.slane %v2296_v46, 2  ;;  %v1962_v6 = vpack.c.bf16 %v5774_v26, %v5775_v22 }
 0x354   :  { %v3815_v49 = vpop.eup %3814  ;;  %3816 = vpow2.f32 %v2533_v2 }
 0x355   :  { %v2850_v44 = vmul.f32 %v3815_v49, %v3811_v35  ;;  %v2913_v35 = vsel %vm452_vm6, %v2881_v52, 0.0  ;;  %v2153_v52 = vrot.slane %v5118_v30, 5  ;;  %3597 = vmatmul.msk.bf16.gmra.mxu3 %vm452_vm6, %v1962_v6 }
 0x356   :  { %v2914_v59 = vrot.slane %v2913_v35, 4  ;;  %v2044_v26 = vpop.f32.mrf.mxu3 }
 0x357   :  { %v2882_v37 = vmul.f32 %v2850_v44, %v1920_v13  ;;  %v2181_v13 = vperm.slane %v2152_v1, 0  ;;  %v2298_v44 = vmax.f32 %v2296_v46, %v2297_v45  ;;  %v1899_v46 = vpop.f32.mrf.mxu0 }
 0x359   :  { %v2920_v28 = vsel %vm452_vm6, %v2882_v37, 0.0  ;;  %v2245_v61 = vadd.f32 %v2181_v13, %v2042_v50  ;;  %v2915_v37 = vadd.f32 %v2914_v59, %v2913_v35  ;;  %v2299_v34 = vrot.slane %v2298_v44, 1 }
 0x35a   :  { %v3817_v39 = vpop.eup %3816  ;;  %v2921_v21 = vrot.slane %v2920_v28, 4  ;;  %v2182_v13 = vperm.slane %v2153_v52, 0 }
 0x35b   :  { %v2607_v62 = vsel %vm452_vm6, %v3817_v39, 0.0  ;;  %v2301_v20 = vsel %vm452_vm6, %v2245_v61, -inf  ;;  %v2300_v47 = vmax.f32 %v2298_v44, %v2299_v34  ;;  %v5176_v34 = vadd.f32 %v4980_v38, %v1899_v46 }
 0x35c   :  { %v2608_v2 = vrot.slane %v2607_v62, 4  ;;  %v2302_v1 = vrot.slane %v2301_v20, 4  ;;  %v2246_v22 = vadd.f32 %v2182_v13, %v2044_v26 }
 0x35d   :  { %v2500_v45 = vsub.f32 %v2244_v60, %v2300_v47 }
 0x35e   :  { %v2609_v49 = vadd.f32 %v2608_v2, %v2607_v62  ;;  %v2922_v2 = vadd.f32 %v2921_v21, %v2920_v28  ;;  %v2308_v59 = vsel %vm452_vm6, %v2246_v22, -inf }
 0x35f   :  { %v2535_v14 = vmul.f32 1.442695, %v2500_v45  ;;  %v2309_v21 = vrot.slane %v2308_v59, 4 }
 0x360   :  { %v2610_v15 = vrot.slane %v2609_v49, 2  ;;  %v2923_v17 = vrot.slane %v2922_v2, 2 }
 0x361   :  { %v2310_v52 = vmax.f32 %v2308_v59, %v2309_v21 }
 0x362   :  { %v2611_v8 = vadd.f32 %v2610_v15, %v2609_v49  ;;  %v2303_v49 = vmax.f32 %v2301_v20, %v2302_v1  ;;  %v2916_v15 = vrot.slane %v2915_v37, 2  ;;  %v2924_v44 = vadd.f32 %v2923_v17, %v2922_v2 }
 0x363   :  { %v2183_v1 = vperm.slane %v2154_v19, 0  ;;  %v5779_v17 = vmax.f32 %v5176_v34, 0.0  ;;  %v2155_v19 = vrot.slane %v5118_v30, 7 }
 0x364   :  { %v2612_v62 = vrot.slane %v2611_v8, 1  ;;  %v2304_v50 = vrot.slane %v2303_v49, 2  ;;  %v2917_v6 = vadd.f32 %v2916_v15, %v2915_v37  ;;  %v2047_v37 = vpop.f32.mrf.mxu3  ;;  %v2925_v46 = vrot.slane %v2924_v44, 1 }
 0x365   :  { %v5185_v13 = vadd.f32 %v2183_v1, %v2047_v37 }
 0x366   :  { %v2613_v55 = vadd.f32 %v2612_v62, %v2611_v8  ;;  %v2305_v35 = vmax.f32 %v2303_v49, %v2304_v50  ;;  %v1901_v62 = vpop.f32.mrf.mxu0  ;;  %v2311_v49 = vrot.slane %v2310_v52, 2  ;;  %v2926_v30 = vadd.f32 %v2925_v46, %v2924_v44 }
 0x367   :  { %v5179_v26 = vadd.f32 %v4980_v38, %v1901_v62 }
 0x368   :  { %3818 = vrcp.f32 %v2613_v55  ;;  %v2306_v28 = vrot.slane %v2305_v35, 1  ;;  %v2918_v55 = vrot.slane %v2917_v6, 1  ;;  %v2312_v45 = vmax.f32 %v2310_v52, %v2311_v49 }
 0x369   :  { %3820 = vpow2.f32 %v2535_v14  ;;  %v5780_v2 = vmax.f32 %v5179_v26, 0.0 }
 0x36a   :  { %v2307_v20 = vmax.f32 %v2305_v35, %v2306_v28  ;;  %v2313_v28 = vrot.slane %v2312_v45, 1  ;;  %v2919_v21 = vadd.f32 %v2918_v55, %v2917_v6  ;;  %v5204_v6 = vpop.f32.mrf.mxu1  ;;  %v3138_v55 = vpack.c.bf16 %v2926_v30, %v2926_v30 }
 0x36b   :  { %v1963_v57 = vpack.c.bf16 %v5780_v2, %v5779_v17 }
 0x36c   :  { %v2501_v47 = vsub.f32 %v2245_v61, %v2307_v20  ;;  %v2314_v62 = vmax.f32 %v2312_v45, %v2313_v28  ;;  %v2049_v17 = vpop.f32.mrf.mxu3  ;;  %v3137_v2 = vpack.c.bf16 %v2919_v21, %v2919_v21  ;;  %v2185_v28 = vperm.slane %v5204_v6, 0 }
 0x36d   :  { %3598 = vmatmul.msk.bf16.gmra.mxu3 %vm452_vm6, %v1963_v57  ;;  %v3231_v21 = vunpack.c.l.b16 %v3138_v55 }
 0x36e   :  { %v3819_v8 = vpop.eup %3818  ;;  %v2537_v15 = vmul.f32 1.442695, %v2501_v47  ;;  %v2184_v47 = vperm.slane %v2155_v19, 0 }
 0x36f   :  { %v2851_v60 = vmul.f32 %v3819_v8, %v3817_v39  ;;  %v5187_v39 = vpop.eup %3820 }
 0x370   :  { %v2614_v50 = vsel %vm452_vm6, %v5187_v39, 0.0  ;;  %3822 = vpow2.f32 %v2537_v15  ;;  %v5200_v31 = vadd.f32 %v2184_v47, %v2049_v17  ;;  %v3230_v17 = vunpack.c.l.b16 %v3137_v2 }
 0x371   :  { %v2883_v14 = vmul.f32 %v2851_v60, %v1921_v9  ;;  %v2315_v9 = vsel %vm452_vm6, %v5185_v13, -inf  ;;  %v2615_v59 = vrot.slane %v2614_v50, 4  ;;  %v1904_v60 = vpop.f32.mrf.mxu0 }
 0x372   :  { %v2316_v8 = vrot.slane %v2315_v9, 4 }
 0x373   :  { %v2927_v61 = vsel %vm452_vm6, %v2883_v14, 0.0  ;;  %v2616_v52 = vadd.f32 %v2615_v59, %v2614_v50  ;;  %v2502_v14 = vsub.f32 %v2246_v22, %v2314_v62  ;;  %v2322_v22 = vsel %vm452_vm6, %v5200_v31, -inf }
 0x374   :  { %v2928_v35 = vrot.slane %v2927_v61, 4  ;;  %v2317_v1 = vmax.f32 %v2315_v9, %v2316_v8  ;;  %v2323_v59 = vrot.slane %v2322_v22, 4 }
 0x375   :  { %v2617_v37 = vrot.slane %v2616_v52, 2 }
 0x376   :  { %v2929_v20 = vadd.f32 %v2928_v35, %v2927_v61  ;;  %v2318_v27 = vrot.slane %v2317_v1, 2  ;;  %v5202_v15 = vpop.eup %3822  ;;  %v2539_v61 = vmul.f32 1.442695, %v2502_v14  ;;  %v2156_v14 = vrot.slane %v5204_v6, 1 }
 0x377   :  { %v2618_v46 = vadd.f32 %v2617_v37, %v2616_v52  ;;  %v2621_v45 = vsel %vm452_vm6, %v5202_v15, 0.0  ;;  %v2052_v37 = vpop.f32.mrf.mxu3 }
 0x378   :  { %v2930_v49 = vrot.slane %v2929_v20, 2  ;;  %v2319_v19 = vmax.f32 %v2317_v1, %v2318_v27  ;;  %v2622_v9 = vrot.slane %v2621_v45, 4  ;;  %3824 = vpow2.f32 %v2539_v61 }
 0x379   :  { %v2619_v57 = vrot.slane %v2618_v46, 1  ;;  %v1906_v52 = vpop.f32.mrf.mxu0  ;;  %v5212_v27 = vadd.f32 %v4980_v38, %v1904_v60  ;;  %v2324_v1 = vmax.f32 %v2322_v22, %v2323_v59  ;;  %v3262_v60 = vsel %vm1740_vm9, %v3231_v21, %v3230_v17 }
 0x37a   :  { %v2931_v44 = vadd.f32 %v2930_v49, %v2929_v20  ;;  %v2320_v35 = vrot.slane %v2319_v19, 1  ;;  %v2623_v20 = vadd.f32 %v2622_v9, %v2621_v45  ;;  %v5215_v47 = vadd.f32 %v4980_v38, %v1906_v52 }
 0x37b   :  { %v2620_v30 = vadd.f32 %v2619_v57, %v2618_v46  ;;  %v2325_v46 = vrot.slane %v2324_v1, 2 }
 0x37c   :  { %v2932_v50 = vrot.slane %v2931_v44, 1  ;;  %v2321_v62 = vmax.f32 %v2319_v19, %v2320_v35  ;;  %v2624_v2 = vrot.slane %v2623_v20, 2  ;;  %v5783_v61 = vmax.f32 %v5215_v47, 0.0 }
 0x37d   :  { %3826 = vrcp.f32 %v2620_v30  ;;  %v2326_v35 = vmax.f32 %v2324_v1, %v2325_v46 }
 0x37e   :  { %v2933_v8 = vadd.f32 %v2932_v50, %v2931_v44  ;;  %v2503_v55 = vsub.f32 %v5185_v13, %v2321_v62  ;;  %v5784_v44 = vmax.f32 %v5212_v27, 0.0  ;;  %v5221_v45 = vpop.eup %3824  ;;  %v2625_v22 = vadd.f32 %v2624_v2, %v2623_v20 }
 0x37f   :  { %v5224_v50 = vadd.f32 %v2185_v28, %v2052_v37  ;;  %v2628_v57 = vsel %vm452_vm6, %v5221_v45, 0.0  ;;  %v2327_v28 = vrot.slane %v2326_v35, 1 }
 0x380   :  { %v3139_v49 = vpack.c.bf16 %v2933_v8, %v2933_v8  ;;  %v2541_v9 = vmul.f32 1.442695, %v2503_v55  ;;  %v1964_v13 = vpack.c.bf16 %v5783_v61, %v5784_v44  ;;  %v2626_v8 = vrot.slane %v2625_v22, 1 }
 0x381   :  { %v2629_v30 = vrot.slane %v2628_v57, 4  ;;  %v2329_v17 = vsel %vm452_vm6, %v5224_v50, -inf  ;;  %v1909_v1 = vpop.f32.mrf.mxu0  ;;  %v2328_v2 = vmax.f32 %v2326_v35, %v2327_v28  ;;  %v2186_v55 = vperm.slane %v2156_v14, 0 }
 0x382   :  { %v3232_v19 = vunpack.c.l.b16 %v3139_v49  ;;  %3828 = vpow2.f32 %v2541_v9  ;;  %v2330_v21 = vrot.slane %v2329_v17, 4  ;;  %3599 = vmatmul.msk.bf16.gmra.mxu3 %vm452_vm6, %v1964_v13  ;;  %v2627_v52 = vadd.f32 %v2626_v8, %v2625_v22 }
 0x383   :  { %v3827_v20 = vpop.eup %3826  ;;  %v2630_v62 = vadd.f32 %v2629_v30, %v2628_v57  ;;  %v2504_v9 = vsub.f32 %v5200_v31, %v2328_v2  ;;  %v2157_v35 = vrot.slane %v5204_v6, 2 }
 0x384   :  { %v5233_v59 = vsel %vm1742_vm10, %v3232_v19, %v3262_v60  ;;  %v2852_v49 = vmul.f32 %v3827_v20, %v5187_v39  ;;  %v2331_v37 = vmax.f32 %v2329_v17, %v2330_v21  ;;  %3830 = vrcp.f32 %v2627_v52  ;;  %v2054_v60 = vpop.f32.mrf.mxu3 }
 0x385   :  { %v2631_v46 = vrot.slane %v2630_v62, 2  ;;  %v5242_v44 = vadd.f32 %v2186_v55, %v2054_v60  ;;  %v2543_v39 = vmul.f32 1.442695, %v2504_v9 }
 0x386   :  { %v2884_v19 = vmul.f32 %v2852_v49, %v1922_v41  ;;  %v2332_v61 = vrot.slane %v2331_v37, 2  ;;  %v2187_v49 = vperm.slane %v2157_v35, 0 }
 0x387   :  { %v2632_v13 = vadd.f32 %v2631_v46, %v2630_v62  ;;  %v2336_v14 = vsel %vm452_vm6, %v5242_v44, -inf  ;;  %3832 = vpow2.f32 %v2543_v39  ;;  %v5254_v62 = vadd.f32 %v4980_v38, %v1909_v1 }
 0x388   :  { %v5244_v22 = vpop.eup %3828  ;;  %v2934_v57 = vsel %vm452_vm6, %v2884_v19, 0.0  ;;  %v2337_v53 = vrot.slane %v2336_v14, 4  ;;  %v2333_v41 = vmax.f32 %v2331_v37, %v2332_v61 }
 0x389   :  { %v2935_v8 = vrot.slane %v2934_v57, 4  ;;  %v2633_v30 = vrot.slane %v2632_v13, 1  ;;  %v2635_v21 = vsel %vm452_vm6, %v5244_v22, 0.0  ;;  %v1911_v20 = vpop.f32.mrf.mxu0  ;;  %5868 = vst [vmem:[#allocation3_spill] sm:$0xff] %v5254_v62  ;;  %v5786_v9 = vmax.f32 %v5254_v62, 0.0 }
 0x38a   :  { %v3831_v17 = vpop.eup %3830  ;;  %v2338_v55 = vmax.f32 %v2336_v14, %v2337_v53  ;;  %v5257_v46 = vadd.f32 %v4980_v38, %v1911_v20  ;;  %v2636_v60 = vrot.slane %v2635_v21, 4  ;;  %v2334_v19 = vrot.slane %v2333_v41, 1 }
 0x38b   :  { %v2936_v31 = vadd.f32 %v2935_v8, %v2934_v57  ;;  %v2634_v28 = vadd.f32 %v2633_v30, %v2632_v13  ;;  %v2853_v52 = vmul.f32 %v3831_v17, %v5202_v15  ;;  %v2158_v30 = vrot.slane %v5204_v6, 3 }
 0x38c   :  { %5869 = vst [vmem:[#allocation4_spill] sm:$0xff] %v5257_v46  ;;  %v2057_v61 = vpop.f32.mrf.mxu3  ;;  %v5785_v15 = vmax.f32 %v5257_v46, 0.0  ;;  %v2339_v8 = vrot.slane %v2338_v55, 2  ;;  %v2637_v24 = vadd.f32 %v2636_v60, %v2635_v21 }
 0x38d   :  { %v2937_v2 = vrot.slane %v2936_v31, 2  ;;  %3834 = vrcp.f32 %v2634_v28  ;;  %v2885_v37 = vmul.f32 %v2853_v52, %v1923_v7  ;;  %v5263_v1 = vadd.f32 %v2187_v49, %v2057_v61  ;;  %v5266_v39 = vpop.eup %3832 }
 0x38e   :  { %v2335_v7 = vmax.f32 %v2333_v41, %v2334_v19  ;;  %v1965_v53 = vpack.c.bf16 %v5785_v15, %v5786_v9  ;;  %v2188_v19 = vperm.slane %v2158_v30, 0 }
 0x38f   :  { %v2938_v13 = vadd.f32 %v2937_v2, %v2936_v31  ;;  %v2941_v57 = vsel %vm452_vm6, %v2885_v37, 0.0  ;;  %v2343_v20 = vsel %vm452_vm6, %v5263_v1, -inf  ;;  %v2642_v2 = vsel %vm452_vm6, %v5266_v39, 0.0 }
 0x390   :  { %v2942_v35 = vrot.slane %v2941_v57, 4  ;;  %v2344_v61 = vrot.slane %v2343_v20, 4  ;;  %v2340_v37 = vmax.f32 %v2338_v55, %v2339_v8 }
 0x391   :  { %v2939_v14 = vrot.slane %v2938_v13, 1  ;;  %v1914_v52 = vpop.f32.mrf.mxu0 }
 0x392   :  { %v2943_v28 = vadd.f32 %v2942_v35, %v2941_v57  ;;  %3600 = vmatmul.msk.bf16.gmra.mxu3 %vm452_vm6, %v1965_v53  ;;  %v2638_v57 = vrot.slane %v2637_v24, 2  ;;  %v2345_v36 = vmax.f32 %v2343_v20, %v2344_v61  ;;  %v2341_v8 = vrot.slane %v2340_v37, 1 }
 0x393   :  { %v3835_v17 = vpop.eup %3834  ;;  %v2940_v31 = vadd.f32 %v2939_v14, %v2938_v13  ;;  %v2505_v14 = vsub.f32 %v5224_v50, %v2335_v7  ;;  %v5291_v20 = vadd.f32 %v4980_v38, %v1914_v52 }
 0x394   :  { %v2854_v49 = vmul.f32 %v3835_v17, %v5221_v45  ;;  %v2944_v21 = vrot.slane %v2943_v28, 2  ;;  %v2059_v60 = vpop.f32.mrf.mxu3  ;;  %v2643_v45 = vrot.slane %v2642_v2, 4 }
 0x395   :  { %v3140_v41 = vpack.c.bf16 %v2940_v31, %v2940_v31  ;;  %v5282_v17 = vadd.f32 %v2188_v19, %v2059_v60  ;;  %v2639_v31 = vadd.f32 %v2638_v57, %v2637_v24  ;;  %v2545_v63 = vmul.f32 1.442695, %v2505_v14  ;;  %5870 = vst [vmem:[#allocation7_spill] sm:$0xff] %v5291_v20 }
 0x396   :  { %v2886_v13 = vmul.f32 %v2854_v49, %v1924_v43  ;;  %v2945_v15 = vadd.f32 %v2944_v21, %v2943_v28  ;;  %v2159_v43 = vrot.slane %v5204_v6, 4  ;;  %v2644_v50 = vadd.f32 %v2643_v45, %v2642_v2 }
 0x397   :  { %v3233_v35 = vunpack.c.l.b16 %v3140_v41  ;;  %v2350_v7 = vsel %vm452_vm6, %v5282_v17, -inf  ;;  %v2346_v28 = vrot.slane %v2345_v36, 2  ;;  %v2342_v21 = vmax.f32 %v2340_v37, %v2341_v8 }
 0x398   :  { %v2948_v9 = vsel %vm452_vm6, %v2886_v13, 0.0  ;;  %v2946_v55 = vrot.slane %v2945_v15, 1  ;;  %v2351_v61 = vrot.slane %v2350_v7, 4  ;;  %v2640_v13 = vrot.slane %v2639_v31, 1 }
 0x399   :  { %v3264_v53 = vsel %vm1744_vm11, %v3233_v35, %v5233_v59  ;;  %v2949_v30 = vrot.slane %v2948_v9, 4  ;;  %v1916_v59 = vpop.f32.mrf.mxu0  ;;  %3836 = vpow2.f32 %v2545_v63  ;;  %v2189_v24 = vperm.slane %v2159_v43, 0 }
 0x39a   :  { %v2947_v49 = vadd.f32 %v2946_v55, %v2945_v15  ;;  %v2645_v14 = vrot.slane %v2644_v50, 2  ;;  %v2352_v15 = vmax.f32 %v2350_v7, %v2351_v61  ;;  %v2347_v2 = vmax.f32 %v2345_v36, %v2346_v28 }
 0x39b   :  { %v2950_v19 = vadd.f32 %v2949_v30, %v2948_v9  ;;  %v5294_v35 = vadd.f32 %v4980_v38, %v1916_v59  ;;  %v2506_v52 = vsub.f32 %v5242_v44, %v2342_v21  ;;  %v5789_v55 = vmax.f32 %v5291_v20, 0.0 }
 0x39c   :  { %v3141_v41 = vpack.c.bf16 %v2947_v49, %v2947_v49  ;;  %v2062_v60 = vpop.f32.mrf.mxu3  ;;  %v2160_v9 = vrot.slane %v5204_v6, 5  ;;  %v2641_v30 = vadd.f32 %v2640_v13, %v2639_v31  ;;  %v2646_v63 = vadd.f32 %v2645_v14, %v2644_v50 }
 0x39d   :  { %5871 = vst [vmem:[#allocation8_spill] sm:$0xff] %v5294_v35  ;;  %v5296_v45 = vadd.f32 %v2189_v24, %v2062_v60  ;;  %v2951_v8 = vrot.slane %v2950_v19, 2  ;;  %v2353_v43 = vrot.slane %v2352_v15, 2  ;;  %v5788_v36 = vmax.f32 %v5294_v35, 0.0 }
 0x39e   :  { %v3234_v57 = vunpack.c.l.b16 %v3141_v41  ;;  %v2348_v7 = vrot.slane %v2347_v2, 1  ;;  %v2190_v21 = vperm.slane %v2160_v9, 0  ;;  %3838 = vrcp.f32 %v2641_v30 }
 0x39f   :  { %v2357_v38 = vsel %vm452_vm6, %v5296_v45, -inf  ;;  %v5307_v49 = vpop.eup %3836  ;;  %v2354_v28 = vmax.f32 %v2352_v15, %v2353_v43  ;;  %v1966_v44 = vpack.c.bf16 %v5788_v36, %v5789_v55  ;;  %v2952_v31 = vadd.f32 %v2951_v8, %v2950_v19 }
 0x3a0   :  { %v5299_v37 = vsel %vm1746_vm12, %v3234_v57, %v3264_v53  ;;  %v2547_v53 = vmul.f32 1.442695, %v2506_v52  ;;  %v2358_v50 = vrot.slane %v2357_v38, 4  ;;  %v2647_v61 = vrot.slane %v2646_v63, 1 }
 0x3a1   :  { %v2649_v59 = vsel %vm452_vm6, %v5307_v49, 0.0  ;;  %v2355_v60 = vrot.slane %v2354_v28, 1  ;;  %v2349_v24 = vmax.f32 %v2347_v2, %v2348_v7  ;;  %v2953_v52 = vrot.slane %v2952_v31, 1 }
 0x3a2   :  { %3601 = vmatmul.msk.bf16.gmra.mxu3 %vm452_vm6, %v1966_v44  ;;  %v2359_v57 = vmax.f32 %v2357_v38, %v2358_v50  ;;  %3840 = vpow2.f32 %v2547_v53  ;;  %v2650_v43 = vrot.slane %v2649_v59, 4  ;;  %v2161_v19 = vrot.slane %v5204_v6, 6 }
 0x3a3   :  { %v2356_v14 = vmax.f32 %v2354_v28, %v2355_v60  ;;  %v2648_v8 = vadd.f32 %v2647_v61, %v2646_v63  ;;  %v2507_v55 = vsub.f32 %v5263_v1, %v2349_v24  ;;  %v2954_v38 = vadd.f32 %v2953_v52, %v2952_v31 }
 0x3a4   :  { %v2064_v41 = vpop.f32.mrf.mxu3  ;;  %v2360_v9 = vrot.slane %v2359_v57, 2  ;;  %v3839_v36 = vpop.eup %3838  ;;  %v2651_v7 = vadd.f32 %v2650_v43, %v2649_v59  ;;  %v2191_v53 = vperm.slane %v2161_v19, 0 }
 0x3a5   :  { %v2254_v13 = vadd.f32 %v2190_v21, %v2064_v41  ;;  %v2508_v41 = vsub.f32 %v5282_v17, %v2356_v14  ;;  %3842 = vrcp.f32 %v2648_v8  ;;  %v2855_v11 = vmul.f32 %v3839_v36, %v5244_v22 }
 0x3a6   :  { %v2361_v21 = vmax.f32 %v2359_v57, %v2360_v9  ;;  %v2549_v63 = vmul.f32 1.442695, %v2507_v55  ;;  %v3142_v17 = vpack.c.bf16 %v2954_v38, %v2954_v38  ;;  %v2652_v57 = vrot.slane %v2651_v7, 2 }
 0x3a7   :  { %v2364_v15 = vsel %vm452_vm6, %v2254_v13, -inf  ;;  %v2551_v56 = vmul.f32 1.442695, %v2508_v41  ;;  %v2162_v22 = vrot.slane %v5204_v6, 7  ;;  %v2887_v55 = vmul.f32 %v2855_v11, %v1925_v3 }
 0x3a8   :  { %v2365_v30 = vrot.slane %v2364_v15, 4  ;;  %v5320_v28 = vpop.eup %3840  ;;  %v2362_v50 = vrot.slane %v2361_v21, 1  ;;  %3844 = vpow2.f32 %v2549_v63  ;;  %v2653_v41 = vadd.f32 %v2652_v57, %v2651_v7  ;;  %v5347_v63 = vpop.f32.mrf.mxu1 }
 0x3a9   :  { %v2656_v31 = vsel %vm452_vm6, %v5320_v28, 0.0  ;;  %3846 = vpow2.f32 %v2551_v56 }
 0x3aa   :  { %v2366_v44 = vmax.f32 %v2364_v15, %v2365_v30  ;;  %v2363_v1 = vmax.f32 %v2361_v21, %v2362_v50  ;;  %v2657_v43 = vrot.slane %v2656_v31, 4  ;;  %v3235_v30 = vunpack.c.l.b16 %v3142_v17 }
 0x3ab   :  { %v3843_v36 = vpop.eup %3842  ;;  %v2654_v56 = vrot.slane %v2653_v41, 1 }
 0x3ac   :  { %v2067_v2 = vpop.f32.mrf.mxu3  ;;  %v2367_v60 = vrot.slane %v2366_v44, 2  ;;  %v2509_v14 = vsub.f32 %v5296_v45, %v2363_v1  ;;  %v2955_v45 = vsel %vm452_vm6, %v2887_v55, 0.0  ;;  %v2856_v38 = vmul.f32 %v3843_v36, %v5266_v39 }
 0x3ad   :  { %v5323_v61 = vadd.f32 %v2191_v53, %v2067_v2  ;;  %v2192_v2 = vperm.slane %v2162_v22, 0  ;;  %v2658_v53 = vadd.f32 %v2657_v43, %v2656_v31  ;;  %v5341_v7 = vsel %vm1748_vm13, %v3235_v30, %v5299_v37 }
 0x3ae   :  { %v2368_v24 = vmax.f32 %v2366_v44, %v2367_v60  ;;  %v2553_v21 = vmul.f32 1.442695, %v2509_v14  ;;  %v5337_v11 = vpop.eup %3844  ;;  %v2956_v60 = vrot.slane %v2955_v45, 4  ;;  %v5872_v1 = vmax.f32 %v5032_v18, 0.0 }
 0x3af   :  { %v2371_v59 = vsel %vm452_vm6, %v5323_v61, -inf  ;;  %v2659_v31 = vrot.slane %v2658_v53, 2  ;;  %v2193_v14 = vperm.slane %v5347_v63, 0 }
 0x3b0   :  { %v2369_v15 = vrot.slane %v2368_v24, 1  ;;  %v2372_v52 = vrot.slane %v2371_v59, 4  ;;  %3848 = vpow2.f32 %v2553_v21  ;;  %v2957_v55 = vadd.f32 %v2956_v60, %v2955_v45 }
 0x3b1   :  { %v2660_v21 = vadd.f32 %v2659_v31, %v2658_v53 }
 0x3b2   :  { %v2370_v9 = vmax.f32 %v2368_v24, %v2369_v15  ;;  %v2373_v19 = vmax.f32 %v2371_v59, %v2372_v52  ;;  %v2888_v24 = vmul.f32 %v2856_v38, %v5872_v1  ;;  %v2663_v59 = vsel %vm452_vm6, %v5337_v11, 0.0 }
 0x3b3   :  { %v2655_v15 = vadd.f32 %v2654_v56, %v2653_v41  ;;  %v2661_v60 = vrot.slane %v2660_v21, 1 }
 0x3b4   :  { %v2069_v8 = vpop.f32.mrf.mxu3  ;;  %v2510_v44 = vsub.f32 %v2254_v13, %v2370_v9  ;;  %v2374_v6 = vrot.slane %v2373_v19, 2  ;;  %v5343_v13 = vpop.eup %3846  ;;  %v2962_v18 = vsel %vm452_vm6, %v2888_v24, 0.0  ;;  %v2664_v9 = vrot.slane %v2663_v59, 4 }
 0x3b5   :  { %v5335_v3 = vadd.f32 %v2192_v2, %v2069_v8  ;;  %v2670_v52 = vsel %vm452_vm6, %v5343_v13, 0.0  ;;  %v2163_v2 = vrot.slane %v5347_v63, 1  ;;  %v2662_v20 = vadd.f32 %v2661_v60, %v2660_v21 }
 0x3b6   :  { %v2555_v10 = vmul.f32 1.442695, %v2510_v44  ;;  %v2375_v50 = vmax.f32 %v2373_v19, %v2374_v6  ;;  %v5356_v43 = vpop.eup %3848  ;;  %v2671_v44 = vrot.slane %v2670_v52, 4  ;;  %v2958_v6 = vrot.slane %v2957_v55, 2 }
 0x3b7   :  { %v2378_v39 = vsel %vm452_vm6, %v5335_v3, -inf  ;;  %v2677_v56 = vsel %vm452_vm6, %v5356_v43, 0.0 }
 0x3b8   :  { %3850 = vpow2.f32 %v2555_v10  ;;  %v2376_v17 = vrot.slane %v2375_v50, 1  ;;  %v2379_v57 = vrot.slane %v2378_v39, 4  ;;  %v2963_v10 = vrot.slane %v2962_v18, 4 }
 0x3b9   :  { %3852 = vrcp.f32 %v2655_v15 }
 0x3ba   :  { %v2377_v22 = vmax.f32 %v2375_v50, %v2376_v17  ;;  %v2380_v36 = vmax.f32 %v2378_v39, %v2379_v57  ;;  %v2672_v39 = vadd.f32 %v2671_v44, %v2670_v52  ;;  %v2194_v17 = vperm.slane %v2163_v2, 0 }
 0x3bb   :  { %v2678_v57 = vrot.slane %v2677_v56, 4  ;;  %v2164_v2 = vrot.slane %v5347_v63, 2 }
 0x3bc   :  { %v2072_v37 = vpop.f32.mrf.mxu3  ;;  %v2511_v19 = vsub.f32 %v5323_v61, %v2377_v22  ;;  %v2381_v41 = vrot.slane %v2380_v36, 2  ;;  %v2665_v61 = vadd.f32 %v2664_v9, %v2663_v59  ;;  %v2959_v9 = vadd.f32 %v2958_v6, %v2957_v55 }
 0x3bd   :  { %v5360_v8 = vadd.f32 %v2193_v14, %v2072_v37  ;;  %v2673_v46 = vrot.slane %v2672_v39, 2  ;;  %v2679_v52 = vadd.f32 %v2678_v57, %v2677_v56 }
 0x3be   :  { %v5362_v30 = vpop.eup %3850  ;;  %v2557_v38 = vmul.f32 1.442695, %v2511_v19  ;;  %v2382_v53 = vmax.f32 %v2380_v36, %v2381_v41  ;;  %v2964_v19 = vadd.f32 %v2963_v10, %v2962_v18  ;;  %v2666_v35 = vrot.slane %v2665_v61, 2 }
 0x3bf   :  { %v2385_v45 = vsel %vm452_vm6, %v5360_v8, -inf  ;;  %v2684_v50 = vsel %vm452_vm6, %v5362_v30, 0.0  ;;  %v3853_v22 = vpop.eup %3852  ;;  %v2674_v56 = vadd.f32 %v2673_v46, %v2672_v39 }
 0x3c0   :  { %3854 = vpow2.f32 %v2557_v38  ;;  %v2386_v1 = vrot.slane %v2385_v45, 4  ;;  %v2383_v31 = vrot.slane %v2382_v53, 1  ;;  %v2685_v37 = vrot.slane %v2684_v50, 4 }
 0x3c1   :  { %v2965_v21 = vrot.slane %v2964_v19, 2  ;;  %v2667_v6 = vadd.f32 %v2666_v35, %v2665_v61  ;;  %3856 = vrcp.f32 %v2662_v20 }
 0x3c2   :  { %v2387_v14 = vmax.f32 %v2385_v45, %v2386_v1  ;;  %v2384_v59 = vmax.f32 %v2382_v53, %v2383_v31  ;;  %v2857_v45 = vmul.f32 %v3853_v22, %v5307_v49  ;;  %v2686_v1 = vadd.f32 %v2685_v37, %v2684_v50 }
 0x3c3   :  { %v2195_v31 = vperm.slane %v2164_v2, 0  ;;  %v2966_v22 = vadd.f32 %v2965_v21, %v2964_v19  ;;  %v2668_v35 = vrot.slane %v2667_v6, 1 }
 0x3c4   :  { %v2074_v24 = vpop.f32.mrf.mxu3  ;;  %v2388_v38 = vrot.slane %v2387_v14, 2  ;;  %v2512_v44 = vsub.f32 %v5335_v3, %v2384_v59  ;;  %v2960_v59 = vrot.slane %v2959_v9, 1  ;;  %v2687_v49 = vrot.slane %v2686_v1, 2 }
 0x3c5   :  { %v5371_v15 = vadd.f32 %v2194_v17, %v2074_v24  ;;  %v2680_v17 = vrot.slane %v2679_v52, 2 }
 0x3c6   :  { %v5373_v36 = vpop.eup %3854  ;;  %v2389_v55 = vmax.f32 %v2387_v14, %v2388_v38  ;;  %v2559_v53 = vmul.f32 1.442695, %v2512_v44  ;;  %v5873_v14 = vmax.f32 %v5042_v54, 0.0  ;;  %v2675_v44 = vrot.slane %v2674_v56, 1 }
 0x3c7   :  { %v2392_v41 = vsel %vm452_vm6, %v5371_v15, -inf  ;;  %v2691_v18 = vsel %vm452_vm6, %v5373_v36, 0.0  ;;  %v2681_v62 = vadd.f32 %v2680_v17, %v2679_v52 }
 0x3c8   :  { %v2692_v10 = vrot.slane %v2691_v18, 4  ;;  %v2390_v60 = vrot.slane %v2389_v55, 1  ;;  %v2393_v3 = vrot.slane %v2392_v41, 4  ;;  %3858 = vpow2.f32 %v2559_v53 }
 0x3c9   :  { %v2889_v38 = vmul.f32 %v2857_v45, %v5873_v14  ;;  %v2967_v53 = vrot.slane %v2966_v22, 1 }
 0x3ca   :  { %v2693_v57 = vadd.f32 %v2692_v10, %v2691_v18  ;;  %v2391_v50 = vmax.f32 %v2389_v55, %v2390_v60  ;;  %v2394_v37 = vmax.f32 %v2392_v41, %v2393_v3  ;;  %v2165_v18 = vrot.slane %v5347_v63, 3  ;;  %v3857_v55 = vpop.eup %3856 }
 0x3cb   :  { %v2688_v41 = vadd.f32 %v2687_v49, %v2686_v1  ;;  %v5392_v10 = vadd.f32 %v2960_v59, %v2959_v9  ;;  %v2669_v60 = vadd.f32 %v2668_v35, %v2667_v6  ;;  %v2858_v1 = vmul.f32 %v3857_v55, %v5320_v28 }
 0x3cc   :  { %v2077_v24 = vpop.f32.mrf.mxu3  ;;  %v2694_v20 = vrot.slane %v2693_v57, 2  ;;  %v2513_v46 = vsub.f32 %v5360_v8, %v2391_v50  ;;  %v2395_v39 = vrot.slane %v2394_v37, 2  ;;  %v2969_v8 = vsel %vm452_vm6, %v2889_v38, 0.0 }
 0x3cd   :  { %v5384_v61 = vadd.f32 %v2195_v31, %v2077_v24  ;;  %v2676_v31 = vadd.f32 %v2675_v44, %v2674_v56  ;;  %v2196_v50 = vperm.slane %v2165_v18, 0  ;;  %v2689_v14 = vrot.slane %v2688_v41, 1 }
 0x3ce   :  { %v2561_v19 = vmul.f32 1.442695, %v2513_v46  ;;  %v2396_v21 = vmax.f32 %v2394_v37, %v2395_v39  ;;  %v5390_v45 = vpop.eup %3858  ;;  %v2695_v3 = vadd.f32 %v2694_v20, %v2693_v57  ;;  %v2682_v37 = vrot.slane %v2681_v62, 1 }
 0x3cf   :  { %v2399_v2 = vsel %vm452_vm6, %v5384_v61, -inf  ;;  %v2698_v52 = vsel %vm452_vm6, %v5390_v45, 0.0  ;;  %v2968_v46 = vadd.f32 %v2967_v53, %v2966_v22  ;;  %v2970_v39 = vrot.slane %v2969_v8, 4 }
 0x3d0   :  { %v2400_v54 = vrot.slane %v2399_v2, 4  ;;  %3860 = vpow2.f32 %v2561_v19  ;;  %v2397_v24 = vrot.slane %v2396_v21, 1  ;;  %v2699_v49 = vrot.slane %v2698_v52, 4 }
 0x3d1   :  { %3862 = vrcp.f32 %v2669_v60  ;;  %v2696_v57 = vrot.slane %v2695_v3, 1  ;;  %v5874_v19 = vmax.f32 %v5045_v12, 0.0  ;;  %v2683_v22 = vadd.f32 %v2682_v37, %v2681_v62 }
 0x3d2   :  { %v2398_v9 = vmax.f32 %v2396_v21, %v2397_v24  ;;  %v2401_v59 = vmax.f32 %v2399_v2, %v2400_v54  ;;  %v2700_v38 = vadd.f32 %v2699_v49, %v2698_v52  ;;  %3864 = vrcp.f32 %v2676_v31 }
 0x3d3   :  { %v2890_v28 = vmul.f32 %v2858_v1, %v5874_v19  ;;  %v2690_v2 = vadd.f32 %v2689_v14, %v2688_v41  ;;  %v2166_v21 = vrot.slane %v5347_v63, 4  ;;  %v2971_v12 = vadd.f32 %v2970_v39, %v2969_v8 }
 0x3d4   :  { %v2079_v17 = vpop.f32.mrf.mxu3  ;;  %v2514_v35 = vsub.f32 %v5371_v15, %v2398_v9  ;;  %v2402_v20 = vrot.slane %v2401_v59, 2  ;;  %v2701_v56 = vrot.slane %v2700_v38, 2  ;;  %v2697_v52 = vadd.f32 %v2696_v57, %v2695_v3 }
 0x3d5   :  { %v5398_v6 = vadd.f32 %v2196_v50, %v2079_v17  ;;  %v3143_v62 = vpack.c.bf16 %v5392_v10, %v5392_v10  ;;  %v3144_v41 = vpack.c.bf16 %v2968_v46, %v2968_v46  ;;  %v2197_v37 = vperm.slane %v2166_v21, 0 }
 0x3d6   :  { %v5405_v18 = vpop.eup %3860  ;;  %v2563_v55 = vmul.f32 1.442695, %v2514_v35  ;;  %v2702_v54 = vadd.f32 %v2701_v56, %v2700_v38  ;;  %v2403_v53 = vmax.f32 %v2401_v59, %v2402_v20  ;;  %v2976_v9 = vsel %vm452_vm6, %v2890_v28, 0.0 }
 0x3d7   :  { %v2406_v44 = vsel %vm452_vm6, %v5398_v6, -inf  ;;  %v2705_v15 = vsel %vm452_vm6, %v5405_v18, 0.0  ;;  %v3863_v50 = vpop.eup %3862  ;;  %v2972_v3 = vrot.slane %v2971_v12, 2  ;;  %v2167_v10 = vrot.slane %v5347_v63, 5 }
 0x3d8   :  { %v2407_v60 = vrot.slane %v2406_v44, 4  ;;  %v2706_v24 = vrot.slane %v2705_v15, 4  ;;  %v2703_v1 = vrot.slane %v2702_v54, 1  ;;  %3866 = vpow2.f32 %v2563_v55  ;;  %v3865_v14 = vpop.eup %3864 }
 0x3d9   :  { %v2404_v31 = vrot.slane %v2403_v53, 1  ;;  %3868 = vrcp.f32 %v2683_v22  ;;  %v5417_v46 = vunpack.c.l.b16 %v3143_v62  ;;  %v2977_v19 = vrot.slane %v2976_v9, 4 }
 0x3da   :  { %v2408_v49 = vmax.f32 %v2406_v44, %v2407_v60  ;;  %3870 = vrcp.f32 %v2690_v2  ;;  %v2704_v39 = vadd.f32 %v2703_v1, %v2702_v54  ;;  %v2707_v57 = vadd.f32 %v2706_v24, %v2705_v15 }
 0x3db   :  { %v2405_v59 = vmax.f32 %v2403_v53, %v2404_v31  ;;  %3872 = vrcp.f32 %v2697_v52  ;;  %v2859_v56 = vmul.f32 %v3863_v50, %v5337_v11  ;;  %v5424_v22 = vunpack.c.l.b16 %v3144_v41 }
 0x3dc   :  { %v2082_v17 = vpop.f32.mrf.mxu3  ;;  %v2409_v8 = vrot.slane %v2408_v49, 2  ;;  %v2860_v2 = vmul.f32 %v3865_v14, %v5343_v13  ;;  %v5427_v54 = vadd.f32 %v2972_v3, %v2971_v12  ;;  %3874 = vrcp.f32 %v2704_v39 }
 0x3dd   :  { %v5413_v38 = vadd.f32 %v2197_v37, %v2082_v17  ;;  %v2515_v35 = vsub.f32 %v5384_v61, %v2405_v59  ;;  %v2708_v52 = vrot.slane %v2707_v57, 2  ;;  %v2198_v17 = vperm.slane %v2167_v10, 0 }
 0x3de   :  { %v2410_v20 = vmax.f32 %v2408_v49, %v2409_v8  ;;  %v5422_v44 = vpop.eup %3866  ;;  %v2978_v31 = vadd.f32 %v2977_v19, %v2976_v9  ;;  %v5875_v13 = vmax.f32 %v5055_v16, 0.0  ;;  %v5876_v12 = vmax.f32 %v5058_v40, 0.0 }
 0x3df   :  { %v2413_v28 = vsel %vm452_vm6, %v5413_v38, -inf  ;;  %v2565_v55 = vmul.f32 1.442695, %v2515_v35  ;;  %v3869_v61 = vpop.eup %3868  ;;  %v2712_v15 = vsel %vm452_vm6, %v5422_v44, 0.0  ;;  %v2974_v8 = vrot.slane %v5427_v54, 1 }
 0x3e0   :  { %v2411_v21 = vrot.slane %v2410_v20, 1  ;;  %v2414_v53 = vrot.slane %v2413_v28, 4  ;;  %v3871_v60 = vpop.eup %3870  ;;  %v2713_v24 = vrot.slane %v2712_v15, 4  ;;  %v2891_v49 = vmul.f32 %v2859_v56, %v5875_v13 }
 0x3e1   :  { %3876 = vpow2.f32 %v2565_v55  ;;  %v3873_v1 = vpop.eup %3872  ;;  %v2892_v41 = vmul.f32 %v2860_v2, %v5876_v12  ;;  %v2861_v37 = vmul.f32 %v3869_v61, %v5356_v43  ;;  %v2862_v3 = vmul.f32 %v3871_v60, %v5362_v30 }
 0x3e2   :  { %v2412_v50 = vmax.f32 %v2410_v20, %v2411_v21  ;;  %v2415_v62 = vmax.f32 %v2413_v28, %v2414_v53  ;;  %v2714_v14 = vadd.f32 %v2713_v24, %v2712_v15  ;;  %v2863_v16 = vmul.f32 %v3873_v1, %v5373_v36  ;;  %v3875_v10 = vpop.eup %3874 }
 0x3e3   :  { %v2709_v35 = vadd.f32 %v2708_v52, %v2707_v57  ;;  %v2979_v19 = vrot.slane %v2978_v31, 2  ;;  %v2983_v55 = vsel %vm452_vm6, %v2891_v49, 0.0  ;;  %v2990_v30 = vsel %vm452_vm6, %v2892_v41, 0.0 }
 0x3e4   :  { %v2084_v11 = vpop.f32.mrf.mxu3  ;;  %v2516_v39 = vsub.f32 %v5398_v6, %v2412_v50  ;;  %v2416_v9 = vrot.slane %v2415_v62, 2  ;;  %v2715_v20 = vrot.slane %v2714_v14, 2  ;;  %v5877_v6 = vmax.f32 %v5068_v33, 0.0 }
 0x3e5   :  { %v5436_v59 = vadd.f32 %v2198_v17, %v2084_v11  ;;  %v5878_v57 = vmax.f32 %v5071_v0, 0.0  ;;  %v5879_v11 = vmax.f32 %v5081_v32, 0.0  ;;  %v2710_v52 = vrot.slane %v2709_v35, 1 }
 0x3e6   :  { %v2567_v43 = vmul.f32 1.442695, %v2516_v39  ;;  %v2417_v56 = vmax.f32 %v2415_v62, %v2416_v9  ;;  %v2893_v21 = vmul.f32 %v2861_v37, %v5877_v6  ;;  %v2716_v36 = vadd.f32 %v2715_v20, %v2714_v14 }
 0x3e7   :  { %v2420_v40 = vsel %vm452_vm6, %v5436_v59, -inf  ;;  %v5444_v2 = vpop.eup %3876  ;;  %v2894_v61 = vmul.f32 %v2862_v3, %v5878_v57  ;;  %v2895_v60 = vmul.f32 %v2863_v16, %v5879_v11  ;;  %v2980_v1 = vadd.f32 %v2979_v19, %v2978_v31 }
 0x3e8   :  { %v2421_v28 = vrot.slane %v2420_v40, 4  ;;  %v2719_v15 = vsel %vm452_vm6, %v5444_v2, 0.0  ;;  %3878 = vpow2.f32 %v2567_v43  ;;  %v2418_v53 = vrot.slane %v2417_v56, 1 }
 0x3e9   :  { %v2717_v24 = vrot.slane %v2716_v36, 1  ;;  %v2720_v17 = vrot.slane %v2719_v15, 4  ;;  %v2864_v13 = vmul.f32 %v3875_v10, %v5390_v45  ;;  %v2984_v50 = vrot.slane %v2983_v55, 4 }
 0x3ea   :  { %v2419_v33 = vmax.f32 %v2417_v56, %v2418_v53  ;;  %v2422_v49 = vmax.f32 %v2420_v40, %v2421_v28  ;;  %v2991_v62 = vrot.slane %v2990_v30, 4  ;;  %v2997_v41 = vsel %vm452_vm6, %v2893_v21, 0.0 }
 0x3eb   :  { %v2718_v0 = vadd.f32 %v2717_v24, %v2716_v36  ;;  %v2721_v12 = vadd.f32 %v2720_v17, %v2719_v15  ;;  %v3267_v32 = vsel %vm1750_vm14, %v5417_v46, %v5341_v7  ;;  %v3004_v3 = vsel %vm452_vm6, %v2894_v61, 0.0 }
 0x3ec   :  { %v2517_v37 = vsub.f32 %v5413_v38, %v2419_v33  ;;  %v2423_v14 = vrot.slane %v2422_v49, 2  ;;  %v3011_v31 = vsel %vm452_vm6, %v2895_v60, 0.0  ;;  %v2711_v45 = vadd.f32 %v2710_v52, %v2709_v35 }
 0x3ed   :  { %v2722_v39 = vrot.slane %v2721_v12, 2  ;;  %v5880_v16 = vmax.f32 %v5084_v29, 0.0  ;;  %v5470_v38 = vsel %vm1752_vm15, %v5424_v22, %v3267_v32  ;;  %v2985_v19 = vadd.f32 %v2984_v50, %v2983_v55 }
 0x3ee   :  { %v5464_v9 = vpop.eup %3878  ;;  %v2569_v40 = vmul.f32 1.442695, %v2517_v37  ;;  %v2424_v10 = vmax.f32 %v2422_v49, %v2423_v14  ;;  %3880 = vrcp.f32 %v2718_v0  ;;  %v2992_v43 = vadd.f32 %v2991_v62, %v2990_v30  ;;  %v2087_v14 = vpop.f32.mrf.mxu3 }
 0x3ef   :  { %v2896_v20 = vmul.f32 %v2864_v13, %v5880_v16  ;;  %v2723_v7 = vadd.f32 %v2722_v39, %v2721_v12  ;;  %v2726_v46 = vsel %vm452_vm6, %v5464_v9, 0.0  ;;  %v2998_v28 = vrot.slane %v2997_v41, 4 }
 0x3f0   :  { %v2727_v35 = vrot.slane %v2726_v46, 4  ;;  %3882 = vpow2.f32 %v2569_v40  ;;  %v2425_v56 = vrot.slane %v2424_v10, 1  ;;  %v3005_v6 = vrot.slane %v3004_v3, 4 }
 0x3f1   :  { %v3012_v29 = vrot.slane %v3011_v31, 4  ;;  %v2724_v21 = vrot.slane %v2723_v7, 1  ;;  %v3018_v36 = vsel %vm452_vm6, %v2896_v20, 0.0  ;;  %3884 = vrcp.f32 %v2711_v45 }
 0x3f2   :  { %v2728_v57 = vadd.f32 %v2727_v35, %v2726_v46  ;;  %v2426_v22 = vmax.f32 %v2424_v10, %v2425_v56  ;;  %v2981_v61 = vrot.slane %v2980_v1, 1  ;;  %v2986_v55 = vrot.slane %v2985_v19, 2 }
 0x3f3   :  { %v2725_v15 = vadd.f32 %v2724_v21, %v2723_v7  ;;  %v2168_v30 = vrot.slane %v5347_v63, 6  ;;  %v5480_v52 = vadd.f32 %v2974_v8, %v5427_v54  ;;  %v2993_v24 = vrot.slane %v2992_v43, 2 }
 0x3f4   :  { %v2729_v53 = vrot.slane %v2728_v57, 2  ;;  %v2518_v11 = vsub.f32 %v5436_v59, %v2426_v22  ;;  %v3881_v60 = vpop.eup %3880  ;;  %v2999_v17 = vadd.f32 %v2998_v28, %v2997_v41  ;;  %v3019_v13 = vrot.slane %v3018_v36, 4 }
 0x3f5   :  { %v3006_v49 = vadd.f32 %v3005_v6, %v3004_v3  ;;  %v3013_v50 = vadd.f32 %v3012_v29, %v3011_v31  ;;  %v5484_v12 = vadd.f32 %v2981_v61, %v2980_v1  ;;  %v2987_v59 = vadd.f32 %v2986_v55, %v2985_v19 }
 0x3f6   :  { %v5482_v33 = vpop.eup %3882  ;;  %v2730_v62 = vadd.f32 %v2729_v53, %v2728_v57  ;;  %v2571_v0 = vmul.f32 1.442695, %v2518_v11  ;;  %3886 = vrcp.f32 %v2725_v15  ;;  %v2866_v54 = vmul.f32 %v3881_v60, %v5422_v44 }
 0x3f7   :  { %v2733_v37 = vsel %vm452_vm6, %v5482_v33, 0.0  ;;  %v3885_v32 = vpop.eup %3884  ;;  %v2199_v41 = vperm.slane %v2168_v30, 0  ;;  %v2994_v45 = vadd.f32 %v2993_v24, %v2992_v43  ;;  %v3000_v39 = vrot.slane %v2999_v17, 2 }
 0x3f8   :  { %v2734_v8 = vrot.slane %v2733_v37, 4  ;;  %3888 = vpow2.f32 %v2571_v0  ;;  %v3020_v3 = vadd.f32 %v3019_v13, %v3018_v36  ;;  %v2731_v31 = vrot.slane %v2730_v62, 1 }
 0x3f9   :  { %v3007_v16 = vrot.slane %v3006_v49, 2  ;;  %v3014_v20 = vrot.slane %v3013_v50, 2  ;;  %v5489_v40 = vadd.f32 %v2199_v41, %v2087_v14  ;;  %v3145_v10 = vpack.c.bf16 %v5480_v52, %v5480_v52 }
 0x3fa   :  { %v2735_v1 = vadd.f32 %v2734_v8, %v2733_v37  ;;  %v3146_v19 = vpack.c.bf16 %v5484_v12, %v5484_v12  ;;  %v2865_v44 = vmul.f32 %v3885_v32, %v5405_v18  ;;  %v5881_v7 = vmax.f32 %v5097_v51, 0.0 }
 0x3fb   :  { %v2427_v35 = vsel %vm452_vm6, %v5489_v40, -inf  ;;  %v2169_v56 = vrot.slane %v5347_v63, 7  ;;  %v3001_v6 = vadd.f32 %v3000_v39, %v2999_v17  ;;  %v3021_v29 = vrot.slane %v3020_v3, 2 }
 0x3fc   :  { %v2898_v46 = vmul.f32 %v2866_v54, %v5881_v7  ;;  %v2736_v43 = vrot.slane %v2735_v1, 2  ;;  %v3887_v28 = vpop.eup %3886  ;;  %v2732_v21 = vadd.f32 %v2731_v31, %v2730_v62  ;;  %v2428_v36 = vrot.slane %v2427_v35, 4 }
 0x3fd   :  { %v2988_v22 = vrot.slane %v2987_v59, 1  ;;  %v2995_v61 = vrot.slane %v2994_v45, 1  ;;  %v3008_v55 = vadd.f32 %v3007_v16, %v3006_v49  ;;  %v3015_v18 = vadd.f32 %v3014_v20, %v3013_v50  ;;  %v2089_v49 = vpop.f32.mrf.mxu3 }
 0x3fe   :  { %v5501_v57 = vpop.eup %3888  ;;  %v5882_v51 = vmax.f32 %v5094_v42, 0.0  ;;  %v2737_v53 = vadd.f32 %v2736_v43, %v2735_v1  ;;  %v2429_v30 = vmax.f32 %v2427_v35, %v2428_v36  ;;  %v3032_v63 = vsel %vm452_vm6, %v2898_v46, 0.0 }
 0x3ff   :  { %v2740_v11 = vsel %vm452_vm6, %v5501_v57, 0.0  ;;  %v2867_v60 = vmul.f32 %v3887_v28, %v5444_v2  ;;  %v2200_v17 = vperm.slane %v2169_v56, 0  ;;  %v3002_v13 = vrot.slane %v3001_v6, 1  ;;  %v3656_v2 = vld [vmem:[%s5717_s15] sm:$0xff] }
 0x400   :  { %v2897_v15 = vmul.f32 %v2865_v44, %v5882_v51  ;;  %v2741_v24 = vrot.slane %v2740_v11, 4  ;;  %v3022_v62 = vadd.f32 %v3021_v29, %v3020_v3  ;;  %3890 = vrcp.f32 %v2732_v21  ;;  %3311 = vmatpush.bf16.msrb.mxu1 %v3656_v2 }
 0x401   :  { %v2430_v0 = vrot.slane %v2429_v30, 2  ;;  %v2989_v50 = vadd.f32 %v2988_v22, %v2987_v59  ;;  %v3009_v12 = vrot.slane %v3008_v55, 1  ;;  %v5509_v37 = vadd.f32 %v2200_v17, %v2089_v49 }
 0x402   :  { %v2742_v42 = vadd.f32 %v2741_v24, %v2740_v11  ;;  %v3025_v14 = vsel %vm452_vm6, %v2897_v15, 0.0  ;;  %v3033_v32 = vrot.slane %v3032_v63, 4  ;;  %v2738_v54 = vrot.slane %v2737_v53, 1 }
 0x403   :  { %v2431_v8 = vmax.f32 %v2429_v30, %v2430_v0  ;;  %v2996_v41 = vadd.f32 %v2995_v61, %v2994_v45  ;;  %v3016_v39 = vrot.slane %v3015_v18, 1  ;;  %v5883_v3 = vmax.f32 %v5113_v4, 0.0 }
 0x404   :  { %v2434_v59 = vsel %vm452_vm6, %v5509_v37, -inf  ;;  %v3003_v16 = vadd.f32 %v3002_v13, %v3001_v6  ;;  %v3023_v20 = vrot.slane %v3022_v62, 1  ;;  %v2743_v1 = vrot.slane %v2742_v42, 2 }
 0x405   :  { %v2899_v31 = vmul.f32 %v2867_v60, %v5883_v3  ;;  %v2432_v44 = vrot.slane %v2431_v8, 1  ;;  %v3239_v7 = vunpack.c.l.b16 %v3146_v19  ;;  %v3010_v46 = vadd.f32 %v3009_v12, %v3008_v55 }
 0x406   :  { %v3026_v43 = vrot.slane %v3025_v14, 4  ;;  %v2435_v35 = vrot.slane %v2434_v59, 4  ;;  %v3891_v56 = vpop.eup %3890  ;;  %v3147_v28 = vpack.c.bf16 %v2989_v50, %v2989_v50  ;;  %v3034_v29 = vadd.f32 %v3033_v32, %v3032_v63 }
 0x407   :  { %v2739_v45 = vadd.f32 %v2738_v54, %v2737_v53  ;;  %v2433_v21 = vmax.f32 %v2431_v8, %v2432_v44  ;;  %v3148_v36 = vpack.c.bf16 %v2996_v41, %v2996_v41  ;;  %v3017_v4 = vadd.f32 %v3016_v39, %v3015_v18 }
 0x408   :  { %v3039_v22 = vsel %vm452_vm6, %v2899_v31, 0.0  ;;  %v2436_v61 = vmax.f32 %v2434_v59, %v2435_v35  ;;  %v3149_v51 = vpack.c.bf16 %v3003_v16, %v3003_v16  ;;  %v3024_v6 = vadd.f32 %v3023_v20, %v3022_v62  ;;  %v5536_v35 = vpop.f32.mrf.mxu1 }
 0x409   :  { %v2744_v15 = vadd.f32 %v2743_v1, %v2742_v42  ;;  %v2519_v11 = vsub.f32 %v5489_v40, %v2433_v21  ;;  %v3150_v30 = vpack.c.bf16 %v3010_v46, %v3010_v46  ;;  %v3027_v19 = vadd.f32 %v3026_v43, %v3025_v14 }
 0x40a   :  { %v2868_v55 = vmul.f32 %v3891_v56, %v5464_v9  ;;  %v2437_v60 = vrot.slane %v2436_v61, 2  ;;  %v3035_v24 = vrot.slane %v3034_v29, 2  ;;  %v3040_v17 = vrot.slane %v3039_v22, 4 }
 0x40b   :  { %3892 = vrcp.f32 %v2739_v45  ;;  %v2573_v53 = vmul.f32 1.442695, %v2519_v11  ;;  %v3238_v18 = vunpack.c.l.b16 %v3145_v10  ;;  %v3240_v63 = vunpack.c.l.b16 %v3147_v28  ;;  %v2092_v11 = vpop.f32.mrf.mxu3 }
 0x40c   :  { %v3151_v13 = vpack.c.bf16 %v3017_v4, %v3017_v4  ;;  %v2438_v0 = vmax.f32 %v2436_v61, %v2437_v60  ;;  %v3241_v62 = vunpack.c.l.b16 %v3148_v36  ;;  %v3152_v49 = vpack.c.bf16 %v3024_v6, %v3024_v6 }
 0x40d   :  { %v2745_v50 = vrot.slane %v2744_v15, 1  ;;  %3894 = vpow2.f32 %v2573_v53  ;;  %v3242_v40 = vunpack.c.l.b16 %v3149_v51  ;;  %v3028_v12 = vrot.slane %v3027_v19, 2 }
 0x40e   :  { %v5884_v9 = vmax.f32 %v5116_v25, 0.0  ;;  %v2439_v14 = vrot.slane %v2438_v0, 1  ;;  %v3269_v32 = vsel %vm1740_vm9, %v3239_v7, %v3238_v18  ;;  %v3243_v54 = vunpack.c.l.b16 %v3150_v30 }
 0x40f   :  { %v3036_v8 = vadd.f32 %v3035_v24, %v3034_v29  ;;  %v3041_v2 = vadd.f32 %v3040_v17, %v3039_v22  ;;  %v3270_v52 = vsel %vm1742_vm10, %v3240_v63, %v3269_v32  ;;  %v3244_v10 = vunpack.c.l.b16 %v3151_v13 }
 0x410   :  { %v2900_v42 = vmul.f32 %v2868_v55, %v5884_v9  ;;  %v2440_v41 = vmax.f32 %v2438_v0, %v2439_v14  ;;  %v3271_v3 = vsel %vm1744_vm11, %v3241_v62, %v3270_v52  ;;  %v3245_v31 = vunpack.c.l.b16 %v3152_v49 }
 0x411   :  { %v3893_v39 = vpop.eup %3892  ;;  %v2746_v59 = vadd.f32 %v2745_v50, %v2744_v15  ;;  %v3272_v16 = vsel %vm1746_vm12, %v3242_v40, %v3271_v3  ;;  %v3029_v20 = vadd.f32 %v3028_v12, %v3027_v19  ;;  %v3037_v7 = vrot.slane %v3036_v8, 1 }
 0x412   :  { %v3046_v25 = vsel %vm452_vm6, %v2900_v42, 0.0  ;;  %v2520_v1 = vsub.f32 %v5509_v37, %v2440_v41  ;;  %v3042_v46 = vrot.slane %v3041_v2, 2  ;;  %v3273_v43 = vsel %vm1748_vm13, %v3243_v54, %v3272_v16 }
 0x413   :  { %v5533_v44 = vpop.eup %3894  ;;  %v2869_v56 = vmul.f32 %v3893_v39, %v5482_v33  ;;  %v3274_v45 = vsel %vm1750_vm14, %v3244_v10, %v3273_v43  ;;  %v3047_v21 = vrot.slane %v3046_v25, 4  ;;  %3896 = vrcp.f32 %v2746_v59  ;;  %v2094_v41 = vpop.f32.mrf.mxu3 }
 0x414   :  { %v2747_v28 = vsel %vm452_vm6, %v5533_v44, 0.0  ;;  %v2575_v29 = vmul.f32 1.442695, %v2520_v1  ;;  %v3275_v37 = vsel %vm1752_vm15, %v3245_v31, %v3274_v45  ;;  %v3030_v4 = vrot.slane %v3029_v20, 1 }
 0x415   :  { %v2748_v36 = vrot.slane %v2747_v28, 4  ;;  %v3290_v22 = vpack.c.b16 %v3275_v37, %v5470_v38  ;;  %v2201_v51 = vperm.slane %v5536_v35, 0  ;;  %v3038_v6 = vadd.f32 %v3037_v7, %v3036_v8 }
 0x416   :  { %3898 = vpow2.f32 %v2575_v29  ;;  %v5885_v33 = vmax.f32 %v5134_v5, 0.0  ;;  %v3043_v30 = vadd.f32 %v3042_v46, %v3041_v2  ;;  %v3048_v19 = vadd.f32 %v3047_v21, %v3046_v25 }
 0x417   :  { %v2749_v61 = vadd.f32 %v2748_v36, %v2747_v28  ;;  %3618 = vmatmul.msk.bf16.vlgmr.msrb.gmra.mxu1 %vm452_vm6, %v3290_v22  ;;  %v5548_v60 = vadd.f32 %v2201_v51, %v2092_v11  ;;  %v3031_v24 = vadd.f32 %v3030_v4, %v3029_v20  ;;  %v2170_v18 = vrot.slane %v5536_v35, 1 }
 0x418   :  { %v2901_v15 = vmul.f32 %v2869_v56, %v5885_v33  ;;  %v3154_v5 = vpack.c.bf16 %v3038_v6, %v3038_v6  ;;  %v3044_v62 = vrot.slane %v3043_v30, 1  ;;  %v3049_v49 = vrot.slane %v3048_v19, 2 }
 0x419   :  { %v2750_v55 = vrot.slane %v2749_v61, 2  ;;  %v3897_v17 = vpop.eup %3896  ;;  %v2441_v38 = vsel %vm452_vm6, %v5548_v60, -inf  ;;  %v3153_v12 = vpack.c.bf16 %v3031_v24, %v3031_v24  ;;  %v2202_v8 = vperm.slane %v2170_v18, 0 }
 0x41a   :  { %v3053_v13 = vsel %vm452_vm6, %v2901_v15, 0.0  ;;  %v2442_v0 = vrot.slane %v2441_v38, 4  ;;  %v2870_v32 = vmul.f32 %v3897_v17, %v5501_v57  ;;  %v3247_v2 = vunpack.c.l.b16 %v3154_v5 }
 0x41b   :  { %v2751_v53 = vadd.f32 %v2750_v55, %v2749_v61  ;;  %v3054_v14 = vrot.slane %v3053_v13, 4  ;;  %v3045_v39 = vadd.f32 %v3044_v62, %v3043_v30  ;;  %v3050_v3 = vadd.f32 %v3049_v49, %v3048_v19  ;;  %v2097_v15 = vpop.f32.mrf.mxu3 }
 0x41c   :  { %v5553_v63 = vpop.eup %3898  ;;  %v2443_v42 = vmax.f32 %v2441_v38, %v2442_v0  ;;  %v2266_v31 = vadd.f32 %v2202_v8, %v2094_v41  ;;  %v3246_v59 = vunpack.c.l.b16 %v3153_v12  ;;  %v5886_v1 = vmax.f32 %v5139_v48, 0.0 }
 0x41d   :  { %v2752_v50 = vrot.slane %v2751_v53, 1  ;;  %v2754_v40 = vsel %vm452_vm6, %v5553_v63, 0.0  ;;  %v3055_v25 = vadd.f32 %v3054_v14, %v3053_v13  ;;  %v2171_v57 = vrot.slane %v5536_v35, 2 }
 0x41e   :  { %v2755_v9 = vrot.slane %v2754_v40, 4  ;;  %v2444_v10 = vrot.slane %v2443_v42, 2  ;;  %v2902_v7 = vmul.f32 %v2870_v32, %v5886_v1  ;;  %v2448_v46 = vsel %vm452_vm6, %v2266_v31, -inf }
 0x41f   :  { %v2753_v54 = vadd.f32 %v2752_v50, %v2751_v53  ;;  %v2449_v28 = vrot.slane %v2448_v46, 4  ;;  %v3276_v29 = vsel %vm1740_vm9, %v3247_v2, %v3246_v59  ;;  %v3155_v45 = vpack.c.bf16 %v3045_v39, %v3045_v39 }
 0x420   :  { %v2756_v52 = vadd.f32 %v2755_v9, %v2754_v40  ;;  %v2445_v20 = vmax.f32 %v2443_v42, %v2444_v10  ;;  %v3051_v21 = vrot.slane %v3050_v3, 1  ;;  %v3056_v22 = vrot.slane %v3055_v25, 2 }
 0x421   :  { %3900 = vrcp.f32 %v2753_v54  ;;  %v2450_v37 = vmax.f32 %v2448_v46, %v2449_v28  ;;  %v3060_v61 = vsel %vm452_vm6, %v2902_v7, 0.0  ;;  %v2203_v51 = vperm.slane %v2171_v57, 0 }
 0x422   :  { %v2757_v16 = vrot.slane %v2756_v52, 2  ;;  %v2446_v56 = vrot.slane %v2445_v20, 1  ;;  %v3248_v11 = vunpack.c.l.b16 %v3155_v45  ;;  %v3052_v30 = vadd.f32 %v3051_v21, %v3050_v3 }
 0x423   :  { %v2451_v33 = vrot.slane %v2450_v37, 2  ;;  %v2267_v19 = vadd.f32 %v2203_v51, %v2097_v15  ;;  %v3061_v55 = vrot.slane %v3060_v61, 4  ;;  %v3057_v53 = vadd.f32 %v3056_v22, %v3055_v25 }
 0x424   :  { %v2758_v43 = vadd.f32 %v2757_v16, %v2756_v52  ;;  %v2447_v6 = vmax.f32 %v2445_v20, %v2446_v56  ;;  %v2172_v18 = vrot.slane %v5536_v35, 3  ;;  %v3156_v62 = vpack.c.bf16 %v3052_v30, %v3052_v30  ;;  %v2099_v52 = vpop.f32.mrf.mxu3 }
 0x425   :  { %v2452_v17 = vmax.f32 %v2450_v37, %v2451_v33  ;;  %v2455_v38 = vsel %vm452_vm6, %v2267_v19, -inf  ;;  %v3277_v49 = vsel %vm1742_vm10, %v3248_v11, %v3276_v29  ;;  %v3062_v50 = vadd.f32 %v3061_v55, %v3060_v61 }
 0x426   :  { %v2759_v36 = vrot.slane %v2758_v43, 1  ;;  %v2521_v5 = vsub.f32 %v5548_v60, %v2447_v6  ;;  %v2456_v0 = vrot.slane %v2455_v38, 4  ;;  %v5887_v40 = vmax.f32 %v5159_v23, 0.0 }
 0x427   :  { %v3901_v4 = vpop.eup %3900  ;;  %v2453_v13 = vrot.slane %v2452_v17, 1  ;;  %v3058_v42 = vrot.slane %v3057_v53, 1  ;;  %v2204_v14 = vperm.slane %v2172_v18, 0  ;;  %v3249_v10 = vunpack.c.l.b16 %v3156_v62 }
 0x428   :  { %v2760_v48 = vadd.f32 %v2759_v36, %v2758_v43  ;;  %v2871_v24 = vmul.f32 %v3901_v4, %v5533_v44  ;;  %v2457_v44 = vmax.f32 %v2455_v38, %v2456_v0  ;;  %v2577_v54 = vmul.f32 1.442695, %v2521_v5 }
 0x429   :  { %v2454_v9 = vmax.f32 %v2452_v17, %v2453_v13  ;;  %v5572_v60 = vadd.f32 %v2204_v14, %v2099_v52  ;;  %v3063_v41 = vrot.slane %v3062_v50, 2  ;;  %v3059_v16 = vadd.f32 %v3058_v42, %v3057_v53 }
 0x42a   :  { %3902 = vrcp.f32 %v2760_v48  ;;  %v2903_v12 = vmul.f32 %v2871_v24, %v5887_v40  ;;  %v2458_v2 = vrot.slane %v2457_v44, 2  ;;  %v2173_v25 = vrot.slane %v5536_v35, 4  ;;  %v3383_v48 = vld [vmem:[%s5719_s20] sm:$0xf] }
 0x42b   :  { %v2522_v8 = vsub.f32 %v2266_v31, %v2454_v9  ;;  %v2462_v20 = vsel %vm452_vm6, %v5572_v60, -inf  ;;  %3904 = vpow2.f32 %v2577_v54  ;;  %v3278_v46 = vsel %vm1744_vm11, %v3249_v10, %v3277_v49  ;;  %v3940_v40 = vld [vmem:[%s5804_s2] sm:$0xff] }
 0x42c   :  { %v3067_v39 = vsel %vm452_vm6, %v2903_v12, 0.0  ;;  %v2459_v59 = vmax.f32 %v2457_v44, %v2458_v2  ;;  %v2463_v1 = vrot.slane %v2462_v20, 4  ;;  %v3064_v57 = vadd.f32 %v3063_v41, %v3062_v50  ;;  %v2102_v37 = vpop.f32.mrf.mxu3 }
 0x42d   :  { %v2579_v3 = vmul.f32 1.442695, %v2522_v8  ;;  %v3068_v7 = vrot.slane %v3067_v39, 4  ;;  %v3157_v28 = vpack.c.bf16 %v3059_v16, %v3059_v16  ;;  %v5888_v29 = vmax.f32 %v5162_v58, 0.0 }
 0x42e   :  { %v2460_v31 = vrot.slane %v2459_v59, 1  ;;  %v2464_v56 = vmax.f32 %v2462_v20, %v2463_v1  ;;  %v3065_v51 = vrot.slane %v3064_v57, 1  ;;  %v2174_v15 = vrot.slane %v5536_v35, 5 }
 0x42f   :  { %3906 = vpow2.f32 %v2579_v3  ;;  %v3069_v4 = vadd.f32 %v3068_v7, %v3067_v39  ;;  %v3389_v11 = vsel %vm130_vm0, %v3383_v48, 0  ;;  %vm3357_vm0 = vcmask 261120  }
 0x430   :  { %v3903_v32 = vpop.eup %3902  ;;  %v2461_v43 = vmax.f32 %v2459_v59, %v2460_v31  ;;  %v2465_v36 = vrot.slane %v2464_v56, 2  ;;  %3398 = vmatpush.bf16.msrb.mxu0 %v3389_v11  ;;  %v3066_v0 = vadd.f32 %v3065_v51, %v3064_v57  ;;  %v2206_v50 = vperm.slane %v2174_v15, 0 }
 0x431   :  { %v2872_v23 = vmul.f32 %v3903_v32, %v5553_v63  ;;  %v2205_v63 = vperm.slane %v2173_v25, 0  ;;  %v5584_v61 = vpop.eup %3904  ;;  %v3070_v17 = vrot.slane %v3069_v4, 2 }
 0x432   :  { %v2523_v21 = vsub.f32 %v2267_v19, %v2461_v43  ;;  %v2466_v33 = vmax.f32 %v2464_v56, %v2465_v36  ;;  %v3250_v19 = vunpack.c.l.b16 %v3157_v28  ;;  %v2761_v53 = vsel %vm452_vm6, %v5584_v61, 0.0 }
 0x433   :  { %v2904_v45 = vmul.f32 %v2872_v23, %v5888_v29  ;;  %v5582_v22 = vadd.f32 %v2205_v63, %v2102_v37  ;;  %3630 = vmatmul.msk.bf16.vlgmr.msrb.gmra.mxu0 %vm123_vm2, %v3940_v40  ;;  %v2762_v12 = vrot.slane %v2761_v53, 4  ;;  %v3158_v42 = vpack.c.bf16 %v3066_v0, %v3066_v0 }
 0x434   :  { %v2581_v6 = vmul.f32 1.442695, %v2523_v21  ;;  %v2467_v24 = vrot.slane %v2466_v33, 1  ;;  %v3279_v18 = vsel %vm1746_vm12, %v3250_v19, %v3278_v46  ;;  %v2104_v44 = vpop.f32.mrf.mxu3  ;;  %v3071_v14 = vadd.f32 %v3070_v17, %v3069_v4 }
 0x435   :  { %v3074_v58 = vsel %vm452_vm6, %v2904_v45, 0.0  ;;  %v2469_v30 = vsel %vm452_vm6, %v5582_v22, -inf  ;;  %v5594_v55 = vpop.eup %3906  ;;  %v5606_v54 = vadd.f32 %v2206_v50, %v2104_v44  ;;  %v3251_v41 = vunpack.c.l.b16 %v3158_v42 }
 0x436   :  { %3908 = vpow2.f32 %v2581_v6  ;;  %v2470_v38 = vrot.slane %v2469_v30, 4  ;;  %v3075_v5 = vrot.slane %v3074_v58, 4  ;;  %v2468_v13 = vmax.f32 %v2466_v33, %v2467_v24 }
 0x437   :  { %v2768_v62 = vsel %vm452_vm6, %v5594_v55, 0.0  ;;  %v2476_v59 = vsel %vm452_vm6, %v5606_v54, -inf  ;;  %v2763_v16 = vadd.f32 %v2762_v12, %v2761_v53  ;;  %v3072_v31 = vrot.slane %v3071_v14, 1  ;;  %v3941_v12 = vld [vmem:[%s5804_s2 + $0x8] sm:$0xff] }
 0x438   :  { %v2471_v49 = vmax.f32 %v2469_v30, %v2470_v38  ;;  %v2524_v9 = vsub.f32 %v5572_v60, %v2468_v13  ;;  %v3076_v2 = vadd.f32 %v3075_v5, %v3074_v58  ;;  %v2769_v52 = vrot.slane %v2768_v62, 4 }
 0x439   :  { %v2175_v60 = vrot.slane %v5536_v35, 6  ;;  %v2477_v20 = vrot.slane %v2476_v59, 4  ;;  %v3280_v1 = vsel %vm1748_vm13, %v3251_v41, %v3279_v18  ;;  %v3073_v29 = vadd.f32 %v3072_v31, %v3071_v14 }
 0x43a   :  { %v2472_v32 = vrot.slane %v2471_v49, 2  ;;  %v2583_v10 = vmul.f32 1.442695, %v2524_v9  ;;  %v3077_v7 = vrot.slane %v3076_v2, 2  ;;  %v2770_v46 = vadd.f32 %v2769_v52, %v2768_v62 }
 0x43b   :  { %v2478_v57 = vmax.f32 %v2476_v59, %v2477_v20  ;;  %v2207_v28 = vperm.slane %v2175_v60, 0  ;;  %v2764_v45 = vrot.slane %v2763_v16, 2  ;;  %v3159_v4 = vpack.c.bf16 %v3073_v29, %v3073_v29 }
 0x43c   :  { %v5608_v8 = vpop.eup %3908  ;;  %v2473_v3 = vmax.f32 %v2471_v49, %v2472_v32  ;;  %3910 = vpow2.f32 %v2583_v10  ;;  %v2107_v21 = vpop.f32.mrf.mxu3  ;;  %v2771_v48 = vrot.slane %v2770_v46, 2  ;;  %v2176_v33 = vrot.slane %v5536_v35, 7 }
 0x43d   :  { %v2775_v39 = vsel %vm452_vm6, %v5608_v8, 0.0  ;;  %v2479_v63 = vrot.slane %v2478_v57, 2  ;;  %v5617_v37 = vadd.f32 %v2207_v28, %v2107_v21  ;;  %v3078_v15 = vadd.f32 %v3077_v7, %v3076_v2 }
 0x43e   :  { %v2776_v23 = vrot.slane %v2775_v39, 4  ;;  %v2474_v25 = vrot.slane %v2473_v3, 1  ;;  %v2765_v24 = vadd.f32 %v2764_v45, %v2763_v16  ;;  %v3252_v18 = vunpack.c.l.b16 %v3159_v4 }
 0x43f   :  { %v2480_v6 = vmax.f32 %v2478_v57, %v2479_v63  ;;  %v2483_v19 = vsel %vm452_vm6, %v5617_v37, -inf  ;;  %v3079_v38 = vrot.slane %v3078_v15, 1  ;;  %v2772_v5 = vadd.f32 %v2771_v48, %v2770_v46 }
 0x440   :  { %v2777_v43 = vadd.f32 %v2776_v23, %v2775_v39  ;;  %v2475_v56 = vmax.f32 %v2473_v3, %v2474_v25  ;;  %v2484_v53 = vrot.slane %v2483_v19, 4  ;;  %v2208_v35 = vperm.slane %v2176_v33, 0 }
 0x441   :  { %v2481_v17 = vrot.slane %v2480_v6, 1  ;;  %v3080_v50 = vadd.f32 %v3079_v38, %v3078_v15  ;;  %v3281_v40 = vsel %vm1750_vm14, %v3252_v18, %v3280_v1  ;;  %v2766_v9 = vrot.slane %v2765_v24, 1 }
 0x442   :  { %v2525_v36 = vsub.f32 %v5582_v22, %v2475_v56  ;;  %v5619_v51 = vpop.eup %3910  ;;  %v2778_v58 = vrot.slane %v2777_v43, 2  ;;  %v2485_v49 = vmax.f32 %v2483_v19, %v2484_v53  ;;  %v2773_v10 = vrot.slane %v2772_v5, 1 }
 0x443   :  { %v2782_v11 = vsel %vm452_vm6, %v5619_v51, 0.0  ;;  %v2482_v0 = vmax.f32 %v2480_v6, %v2481_v17  ;;  %3631 = vmatmul.msk.bf16.gmra.mxu0 %vm123_vm2, %v3941_v12  ;;  %v3160_v52 = vpack.c.bf16 %v3080_v50, %v3080_v50  ;;  %v2767_v20 = vadd.f32 %v2766_v9, %v2765_v24 }
 0x444   :  { %v2585_v30 = vmul.f32 1.442695, %v2525_v36  ;;  %v2783_v22 = vrot.slane %v2782_v11, 4  ;;  %v2779_v62 = vadd.f32 %v2778_v58, %v2777_v43  ;;  %v2109_v14 = vpop.f32.mrf.mxu3  ;;  %v2486_v32 = vrot.slane %v2485_v49, 2 }
 0x445   :  { %v2526_v42 = vsub.f32 %v5606_v54, %v2482_v0  ;;  %v2272_v2 = vadd.f32 %v2208_v35, %v2109_v14  ;;  %v3253_v23 = vunpack.c.l.b16 %v3160_v52  ;;  %v2774_v46 = vadd.f32 %v2773_v10, %v2772_v5 }
 0x446   :  { %3912 = vpow2.f32 %v2585_v30  ;;  %v2784_v13 = vadd.f32 %v2783_v22, %v2782_v11  ;;  %v2780_v59 = vrot.slane %v2779_v62, 1  ;;  %v2487_v60 = vmax.f32 %v2485_v49, %v2486_v32 }
 0x447   :  { %v2587_v39 = vmul.f32 1.442695, %v2526_v42  ;;  %v2490_v16 = vsel %vm452_vm6, %v2272_v2, -inf  ;;  %v5635_v57 = vsel %vm1752_vm15, %v3253_v23, %v3281_v40 }
 0x448   :  { %v2785_v44 = vrot.slane %v2784_v13, 2  ;;  %v2488_v54 = vrot.slane %v2487_v60, 1  ;;  %v2491_v7 = vrot.slane %v2490_v16, 4  ;;  %v2781_v43 = vadd.f32 %v2780_v59, %v2779_v62 }
 0x449   :  { %3914 = vpow2.f32 %v2587_v39 }
 0x44a   :  { %v2786_v41 = vadd.f32 %v2785_v44, %v2784_v13  ;;  %v2489_v28 = vmax.f32 %v2487_v60, %v2488_v54  ;;  %v2492_v29 = vmax.f32 %v2490_v16, %v2491_v7  ;;  %3916 = vrcp.f32 %v2767_v20 }
 0x44b   :  { %3918 = vrcp.f32 %v2774_v46  ;;  %v5892_v60 = vmax.f32 %v5215_v47, 0.0 }
 0x44c   :  { %v3913_v3 = vpop.eup %3912  ;;  %v2787_v25 = vrot.slane %v2786_v41, 1  ;;  %v2527_v21 = vsub.f32 %v5617_v37, %v2489_v28  ;;  %v2493_v36 = vrot.slane %v2492_v29, 2  ;;  %3920 = vrcp.f32 %v2781_v43 }
 0x44d   :  { %v2789_v31 = vsel %vm452_vm6, %v3913_v3, 0.0 }
 0x44e   :  { %v2790_v1 = vrot.slane %v2789_v31, 4  ;;  %v2788_v45 = vadd.f32 %v2787_v25, %v2786_v41  ;;  %v2589_v6 = vmul.f32 1.442695, %v2527_v21  ;;  %v2494_v33 = vmax.f32 %v2492_v29, %v2493_v36 }
 0x44f   :  { %v3915_v4 = vpop.eup %3914 }
 0x450   :  { %v2791_v56 = vadd.f32 %v2790_v1, %v2789_v31  ;;  %3922 = vrcp.f32 %v2788_v45  ;;  %v2796_v15 = vsel %vm452_vm6, %v3915_v4, 0.0  ;;  %v2495_v30 = vrot.slane %v2494_v33, 1  ;;  %v3917_v19 = vpop.eup %3916 }
 0x451   :  { %v2797_v11 = vrot.slane %v2796_v15, 4  ;;  %3924 = vpow2.f32 %v2589_v6  ;;  %v3919_v53 = vpop.eup %3918  ;;  %v2873_v9 = vmul.f32 %v3917_v19, %v5584_v61 }
 0x452   :  { %v2792_v63 = vrot.slane %v2791_v56, 2  ;;  %v2496_v17 = vmax.f32 %v2494_v33, %v2495_v30  ;;  %v3921_v37 = vpop.eup %3920  ;;  %v2874_v62 = vmul.f32 %v3919_v53, %v5594_v55  ;;  %v5890_v55 = vmax.f32 %v5212_v27, 0.0 }
 0x453   :  { %v2798_v22 = vadd.f32 %v2797_v11, %v2796_v15  ;;  %v2875_v50 = vmul.f32 %v3921_v37, %v5608_v8  ;;  %v5891_v8 = vmax.f32 %v5176_v34, 0.0 }
 0x454   :  { %v2793_v48 = vadd.f32 %v2792_v63, %v2791_v56  ;;  %v2528_v18 = vsub.f32 %v2272_v2, %v2496_v17  ;;  %v5889_v2 = vmax.f32 %v5179_v26, 0.0 }
 0x455   :  { %v2799_v38 = vrot.slane %v2798_v22, 2  ;;  %v2907_v41 = vmul.f32 %v2875_v50, %v5890_v55  ;;  %v2905_v59 = vmul.f32 %v2873_v9, %v5891_v8  ;;  %v5897_v50 = vld [vmem:[#allocation7_spill] sm:$0xff] }
 0x456   :  { %v2794_v58 = vrot.slane %v2793_v48, 1  ;;  %v3923_v5 = vpop.eup %3922  ;;  %v2591_v35 = vmul.f32 1.442695, %v2528_v18  ;;  %v2906_v52 = vmul.f32 %v2874_v62, %v5889_v2 }
 0x457   :  { %v3925_v13 = vpop.eup %3924  ;;  %v2800_v0 = vadd.f32 %v2799_v38, %v2798_v22  ;;  %v2876_v44 = vmul.f32 %v3923_v5, %v5619_v51  ;;  %v5893_v51 = vld [vmem:[#allocation3_spill] sm:$0xff]  ;;  %v3095_v27 = vsel %vm452_vm6, %v2907_v41, 0.0  ;;  %v3081_v54 = vsel %vm452_vm6, %v2905_v59, 0.0 }
 0x458   :  { %v2795_v24 = vadd.f32 %v2794_v58, %v2793_v48  ;;  %v2803_v49 = vsel %vm452_vm6, %v3925_v13, 0.0  ;;  %v5894_v23 = vmax.f32 %v5893_v51, 0.0  ;;  %v3088_v26 = vsel %vm452_vm6, %v2906_v52, 0.0  ;;  %v5895_v48 = vld [vmem:[#allocation4_spill] sm:$0xff] }
 0x459   :  { %v2801_v40 = vrot.slane %v2800_v0, 1  ;;  %v2804_v12 = vrot.slane %v2803_v49, 4  ;;  %v2908_v61 = vmul.f32 %v2876_v44, %v5892_v60  ;;  %v3089_v47 = vrot.slane %v3088_v26, 4 }
 0x45a   :  { %3926 = vrcp.f32 %v2795_v24  ;;  %v3096_v28 = vrot.slane %v3095_v27, 4  ;;  %v3082_v45 = vrot.slane %v3081_v54, 4  ;;  %v5896_v6 = vmax.f32 %v5895_v48, 0.0 }
 0x45b   :  { %3928 = vpow2.f32 %v2591_v35  ;;  %v2802_v14 = vadd.f32 %v2801_v40, %v2800_v0  ;;  %v2805_v32 = vadd.f32 %v2804_v12, %v2803_v49  ;;  %v3102_v34 = vsel %vm452_vm6, %v2908_v61, 0.0 }
 0x45c   :  { %v3103_v63 = vrot.slane %v3102_v34, 4  ;;  %v3090_v15 = vadd.f32 %v3089_v47, %v3088_v26  ;;  %v3097_v11 = vadd.f32 %v3096_v28, %v3095_v27  ;;  %v3083_v19 = vadd.f32 %v3082_v45, %v3081_v54 }
 0x45d   :  { %3930 = vrcp.f32 %v2802_v14  ;;  %v2806_v39 = vrot.slane %v2805_v32, 2  ;;  %v5898_v40 = vmax.f32 %v5897_v50, 0.0 }
 0x45e   :  { %v3104_v24 = vadd.f32 %v3103_v63, %v3102_v34  ;;  %v3098_v5 = vrot.slane %v3097_v11, 2  ;;  %v3084_v35 = vrot.slane %v3083_v19, 2  ;;  %v3659_v34 = vld [vmem:[%s5720_s18 + $0x8] sm:$0xff] }
 0x45f   :  { %v2807_v25 = vadd.f32 %v2806_v39, %v2805_v32  ;;  %3370 = vmatpush.bf16.msra.mxu2 %v3659_v34 }
 0x460   :  { %v3927_v42 = vpop.eup %3926  ;;  %v3105_v62 = vrot.slane %v3104_v24, 2  ;;  %v3085_v32 = vadd.f32 %v3084_v35, %v3083_v19 }
 0x461   :  { %v2877_v10 = vmul.f32 %v3927_v42, %v3913_v3  ;;  %v3929_v16 = vpop.eup %3928  ;;  %v2808_v31 = vrot.slane %v2807_v25, 1  ;;  %v3099_v42 = vadd.f32 %v3098_v5, %v3097_v11 }
 0x462   :  { %v2810_v3 = vsel %vm452_vm6, %v3929_v16, 0.0  ;;  %v3106_v2 = vadd.f32 %v3105_v62, %v3104_v24  ;;  %v3086_v60 = vrot.slane %v3085_v32, 1 }
 0x463   :  { %v2909_v20 = vmul.f32 %v2877_v10, %v5894_v23  ;;  %v2811_v1 = vrot.slane %v2810_v3, 4  ;;  %v3931_v7 = vpop.eup %3930  ;;  %v2809_v43 = vadd.f32 %v2808_v31, %v2807_v25  ;;  %v3100_v8 = vrot.slane %v3099_v42, 1 }
 0x464   :  { %v2878_v29 = vmul.f32 %v3931_v7, %v3915_v4  ;;  %v3091_v4 = vrot.slane %v3090_v15, 2  ;;  %v3107_v61 = vrot.slane %v3106_v2, 1  ;;  %v3087_v7 = vadd.f32 %v3086_v60, %v3085_v32  ;;  %v3677_v32 = vld [vmem:[%s5718_s17] ss:$0 sm:$0xff] }
 0x465   :  { %v3109_v46 = vsel %vm452_vm6, %v2909_v20, 0.0  ;;  %v2812_v56 = vadd.f32 %v2811_v1, %v2810_v3  ;;  %3932 = vrcp.f32 %v2809_v43  ;;  %v5899_v20 = vld [vmem:[#allocation8_spill] sm:$0xff]  ;;  %v3101_v1 = vadd.f32 %v3100_v8, %v3099_v42 }
 0x466   :  { %v3110_v36 = vrot.slane %v3109_v46, 4  ;;  %v2910_v33 = vmul.f32 %v2878_v29, %v5896_v6  ;;  %v3092_v9 = vadd.f32 %v3091_v4, %v3090_v15  ;;  %v5900_v25 = vmax.f32 %v5899_v20, 0.0 }
 0x467   :  { %v2813_v21 = vrot.slane %v2812_v56, 2  ;;  %v3108_v47 = vadd.f32 %v3107_v61, %v3106_v2  ;;  %v3163_v63 = vpack.c.bf16 %v3101_v1, %v3101_v1  ;;  %v3678_v1 = vld [vmem:[%s5721_s19] ss:$0 sm:$0xff] }
 0x468   :  { %v3116_v30 = vsel %vm452_vm6, %v2910_v33, 0.0  ;;  %v3111_v53 = vadd.f32 %v3110_v36, %v3109_v46  ;;  %v3093_v41 = vrot.slane %v3092_v9, 1  ;;  %v3161_v36 = vpack.c.bf16 %v3087_v7, %v3087_v7 }
 0x469   :  { %v2814_v58 = vadd.f32 %v2813_v21, %v2812_v56  ;;  %v3117_v22 = vrot.slane %v3116_v30, 4  ;;  %v3658_v56 = vld [vmem:[%s5720_s18] sm:$0xff]  ;;  %v3164_v48 = vpack.c.bf16 %v3108_v47, %v3108_v47 }
 0x46a   :  { %v3112_v49 = vrot.slane %v3111_v53, 2  ;;  %v3094_v3 = vadd.f32 %v3093_v41, %v3092_v9  ;;  %3371 = vmatpush.bf16.msra.mxu2 %v3658_v56  ;;  %v3254_v24 = vunpack.c.l.b16 %v3161_v36 }
 0x46b   :  { %v2815_v17 = vrot.slane %v2814_v58, 1  ;;  %v3933_v37 = vpop.eup %3932  ;;  %v3118_v38 = vadd.f32 %v3117_v22, %v3116_v30  ;;  %v3256_v30 = vunpack.c.l.b16 %v3163_v63  ;;  %v3257_v22 = vunpack.c.l.b16 %v3164_v48 }
 0x46c   :  { %v2879_v0 = vmul.f32 %v3933_v37, %v3925_v13  ;;  %v3113_v10 = vadd.f32 %v3112_v49, %v3111_v53  ;;  %v3162_v28 = vpack.c.bf16 %v3094_v3, %v3094_v3  ;;  %v3188_v49 = vpop.f32.mrf.mxu2 }
 0x46d   :  { %v2816_v18 = vadd.f32 %v2815_v17, %v2814_v58  ;;  %v3119_v44 = vrot.slane %v3118_v38, 2 }
 0x46e   :  { %v2911_v12 = vmul.f32 %v2879_v0, %v5898_v40  ;;  %v3114_v23 = vrot.slane %v3113_v10, 1  ;;  %v3255_v15 = vunpack.c.l.b16 %v3162_v28 }
 0x46f   :  { %3934 = vrcp.f32 %v2816_v18  ;;  %v3120_v39 = vadd.f32 %v3119_v44, %v3118_v38 }
 0x470   :  { %v3123_v14 = vsel %vm452_vm6, %v2911_v12, 0.0  ;;  %v3115_v43 = vadd.f32 %v3114_v23, %v3113_v10  ;;  %v3283_v38 = vsel %vm1740_vm9, %v3255_v15, %v3254_v24 }
 0x471   :  { %v3124_v52 = vrot.slane %v3123_v14, 4  ;;  %v3121_v27 = vrot.slane %v3120_v39, 1  ;;  %v3284_v5 = vsel %vm1742_vm10, %v3256_v30, %v3283_v38 }
 0x472   :  { %v3165_v33 = vpack.c.bf16 %v3115_v43, %v3115_v43  ;;  %v3285_v35 = vsel %vm1744_vm11, %v3257_v22, %v3284_v5 }
 0x473   :  { %v3125_v13 = vadd.f32 %v3124_v52, %v3123_v14  ;;  %v3122_v45 = vadd.f32 %v3121_v27, %v3120_v39 }
 0x474   :  { %v3258_v53 = vunpack.c.l.b16 %v3165_v33  ;;  %v3190_v2 = vpop.f32.mrf.mxu2 }
 0x475   :  { %v3935_v55 = vpop.eup %3934  ;;  %v3126_v51 = vrot.slane %v3125_v13, 2  ;;  %v3166_v11 = vpack.c.bf16 %v3122_v45, %v3122_v45 }
 0x476   :  { %v2880_v59 = vmul.f32 %v3935_v55, %v3929_v16  ;;  %v3286_v62 = vsel %vm1746_vm12, %v3258_v53, %v3285_v35 }
 0x477   :  { %v3127_v31 = vadd.f32 %v3126_v51, %v3125_v13  ;;  %v3259_v4 = vunpack.c.l.b16 %v3166_v11 }
 0x478   :  { %v2912_v26 = vmul.f32 %v2880_v59, %v5900_v25 }
 0x479   :  { %v3128_v46 = vrot.slane %v3127_v31, 1  ;;  %v3287_v40 = vsel %vm1748_vm13, %v3259_v4, %v3286_v62 }
 0x47a   :  { %v3130_v54 = vsel %vm452_vm6, %v2912_v26, 0.0 }
 0x47b   :  { %v3131_v16 = vrot.slane %v3130_v54, 4  ;;  %v3129_v21 = vadd.f32 %v3128_v46, %v3127_v31 }
 0x47c   :  { %v3193_v59 = vpop.f32.mrf.mxu2 }
 0x47d   :  { %v3132_v29 = vadd.f32 %v3131_v16, %v3130_v54  ;;  %v3167_v19 = vpack.c.bf16 %v3129_v21, %v3129_v21  ;;  %v3679_v54 = vld [vmem:[%s5722_s21] ss:$0 sm:$0xff] }
 0x47f   :  { %v3133_v6 = vrot.slane %v3132_v29, 2  ;;  %v3260_v18 = vunpack.c.l.b16 %v3167_v19 }
 0x481   :  { %v3134_v58 = vadd.f32 %v3133_v6, %v3132_v29  ;;  %v3288_v12 = vsel %vm1750_vm14, %v3260_v18, %v3287_v40 }
 0x483   :  { %v3135_v17 = vrot.slane %v3134_v58, 1 }
 0x484   :  { %v3195_v61 = vpop.f32.mrf.mxu2 }
 0x485   :  { %v3136_v37 = vadd.f32 %v3135_v17, %v3134_v58 }
 0x487   :  { %v3168_v0 = vpack.c.bf16 %v3136_v37, %v3136_v37 }
 0x489   :  { %v3261_v50 = vunpack.c.l.b16 %v3168_v0 }
 0x48b   :  { %v3289_v44 = vsel %vm1752_vm15, %v3261_v50, %v3288_v12 }
 0x48c   :  { %v3291_v42 = vpack.c.b16 %v3289_v44, %v5635_v57 }
 0x48e   :  { %3619 = vmatmul.msk.bf16.gmra.mxu1 %vm452_vm6, %v3291_v42 }
 0x494   :  { %v3313_v9 = vpop.f32.mrf.mxu1 }
 0x495   :  { %v3314_v14 = vadd.f32 %v3313_v9, %v3188_v49 }
 0x497   :  { %v3327_v10 = vadd.f32 %v3677_v32, %v3314_v14 }
 0x499   :  { %v3331_v39 = vmax.f32 %v3327_v10, 0.0 }
 0x49c   :  { %v3315_v52 = vpop.f32.mrf.mxu1 }
 0x49d   :  { %v3316_v55 = vadd.f32 %v3315_v52, %v3190_v2 }
 0x49f   :  { %v3328_v41 = vadd.f32 %v3677_v32, %v3316_v55 }
 0x4a1   :  { %v3332_v13 = vmax.f32 %v3328_v41, 0.0 }
 0x4a3   :  { %v3335_v8 = vpack.c.bf16 %v3332_v13, %v3331_v39 }
 0x4a5   :  { %3628 = vmatmul.msk.bf16.vlgmr.msra.gmra.mxu2 %vm3357_vm0, %v3335_v8 }
 0x4b0   :  { %v3400_v27 = vpop.f32.mrf.mxu0 }
 0x4b1   :  { %v3401_v47 = vadd.f32 %v3679_v54, %v3400_v27 }
 0x4b8   :  { %v3402_v16 = vpop.f32.mrf.mxu0 }
 0x4b9   :  { %v3403_v43 = vadd.f32 %v3679_v54, %v3402_v16 }
 0x4c0   :  { %v3405_v6 = vpop.f32.mrf.mxu0 }
 0x4c1   :  { %v3406_v15 = vadd.f32 %v3679_v54, %v3405_v6 }
 0x4c8   :  { %v3407_v11 = vpop.f32.mrf.mxu0 }
 0x4c9   :  { %v3408_v24 = vadd.f32 %v3679_v54, %v3407_v11 }
 0x50b   :  { %v3318_v57 = vpop.f32.mrf.mxu1 }
 0x50c   :  { %v3319_v60 = vadd.f32 %v3318_v57, %v3193_v59 }
 0x50e   :  { %v3329_v23 = vadd.f32 %v3677_v32, %v3319_v60 }
 0x510   :  { %v3333_v26 = vmax.f32 %v3329_v23, 0.0 }
 0x513   :  { %v3320_v51 = vpop.f32.mrf.mxu1 }
 0x514   :  { %v3321_v20 = vadd.f32 %v3320_v51, %v3195_v61 }
 0x516   :  { %v3330_v25 = vadd.f32 %v3677_v32, %v3321_v20 }
 0x518   :  { %v3334_v3 = vmax.f32 %v3330_v25, 0.0 }
 0x51a   :  { %v3336_v31 = vpack.c.bf16 %v3334_v3, %v3333_v26 }
 0x51c   :  { %3629 = vmatmul.msk.bf16.gmra.mxu2 %vm3357_vm0, %v3336_v31 }
 0x528   :  { %v3373_v34 = vpop.f32.mrf.mxu2 }
 0x529   :  { %v3374_v7 = vadd.f32 %v3678_v1, %v3373_v34 }
 0x52b   :  { %v3410_v46 = vadd.f32 %v3401_v47, %v3374_v7 }
 0x52d   :  { %v3418_v29 = vmul.f32 0.01, %v3410_v46  ;;  %vm3414_vm1 = vcmp.ge.f32.partialorder %v3410_v46, 0.0 }
 0x52f   :  { %v3422_v21 = vsel %vm3414_vm1, %v3410_v46, %v3418_v29 }
 0x530   :  { %v3375_v56 = vpop.f32.mrf.mxu2 }
 0x531   :  { %v3376_v28 = vadd.f32 %v3678_v1, %v3375_v56 }
 0x533   :  { %v3411_v45 = vadd.f32 %v3403_v43, %v3376_v28 }
 0x535   :  { %vm3415_vm2 = vcmp.ge.f32.partialorder %v3411_v45, 0.0  ;;  %v3419_v63 = vmul.f32 0.01, %v3411_v45 }
 0x537   :  { %v3423_v36 = vsel %vm3415_vm2, %v3411_v45, %v3419_v63 }
 0x538   :  { %v3663_v48 = vpack.c.bf16 %v3423_v36, %v3422_v21 }
 0x53a   :  { %3664 = vst [vmem:[%s5723_s22] sm:$0xff] %v3663_v48  }
 0x59f   :  { %v3378_v33 = vpop.f32.mrf.mxu2 }
 0x5a0   :  { %v3379_v58 = vadd.f32 %v3678_v1, %v3378_v33 }
 0x5a2   :  { %v3412_v30 = vadd.f32 %v3406_v15, %v3379_v58 }
 0x5a4   :  { %v3420_v17 = vmul.f32 0.01, %v3412_v30  ;;  %vm3416_vm3 = vcmp.ge.f32.partialorder %v3412_v30, 0.0 }
 0x5a6   :  { %v3424_v4 = vsel %vm3416_vm3, %v3412_v30, %v3420_v17 }
 0x5a7   :  { %v3380_v19 = vpop.f32.mrf.mxu2 }
 0x5a8   :  { %v3381_v22 = vadd.f32 %v3678_v1, %v3380_v19 }
 0x5aa   :  { %v3413_v53 = vadd.f32 %v3408_v24, %v3381_v22 }
 0x5ac   :  { %vm3417_vm4 = vcmp.ge.f32.partialorder %v3413_v53, 0.0  ;;  %v3421_v37 = vmul.f32 0.01, %v3413_v53 }
 0x5ae   :  { %v3425_v38 = vsel %vm3417_vm4, %v3413_v53, %v3421_v37 }
 0x5af   :  { %v3668_v18 = vpack.c.bf16 %v3425_v38, %v3424_v4 }
 0x5b1   :  { %3670 = vst [vmem:[%s5723_s22 + $0x8] sm:$0xff] %v3668_v18  }

</bundles_post_ra>
